<compile_context>
chip_gen: v5e
topology: v5e:2x2
jax: 0.10.0
libtpu: 0.0.40
codegen_flags: <defaults>
</compile_context>

<pallas_src>
import functools

import jax
import jax.numpy as jnp
from jax import lax
from jax.experimental import pallas as pl
from jax.experimental.pallas import tpu as pltpu

# bf16 operands (f32 accumulation) for the two 1x1-conv matmuls: ~2x MXU rate on v6e/v7x and
# half the HBM/DMA bytes on v5e.  All elementwise / normalize / softmax math stays in f32.
MATMUL_BF16 = True


# --------------------------------- small helpers ---------------------------------
def _pick_tile(dim, target, align):
    """Largest multiple of `align` that divides `dim` and is <= target, else `dim` (full)."""
    if dim <= target:
        return dim
    t = (target // align) * align
    while t >= align:
        if dim % t == 0:
            return t
        t -= align
    return dim


def _vmem_capacity():
    try:
        return int(pltpu.get_tpu_info().vmem_capacity_bytes)   # 128 MiB v5e/v6e, 64 MiB v7x
    except Exception:
        return 64 * 1024 * 1024                                # conservative (v7x) fallback


def _mosaic_params(semantics, working_set_bytes):
    cap = _vmem_capacity()
    # working_set_bytes already accounts for double-buffering; add headroom for compiler
    # temporaries and stay below ~3/4 of the physical per-core VMEM.
    limit = int(min(int(0.75 * cap),
                    max(32 * 1024 * 1024, int(working_set_bytes) + (8 << 20))))
    return pltpu.CompilerParams(dimension_semantics=semantics, vmem_limit_bytes=limit)


# ------------------------- 1x1 conv == tiled batched matmul -------------------------
def _bmm_fullk_kernel(w_ref, x_ref, o_ref):
    # w_ref: (tm, K)   x_ref: (1, K, tn)   o_ref: (1, tm, tn)
    o_ref[0] = jnp.dot(w_ref[...], x_ref[0], preferred_element_type=jnp.float32)


def _bmm_ktiled_kernel(w_ref, x_ref, o_ref, acc_ref):
    # Fallback for very large K: f32 accumulator over the innermost ("arbitrary") K axis.
    @pl.when(pl.program_id(3) == 0)
    def _init():
        acc_ref[...] = jnp.zeros_like(acc_ref)

    acc_ref[...] += jnp.dot(w_ref[...], x_ref[0], preferred_element_type=jnp.float32)

    @pl.when(pl.program_id(3) == pl.num_programs(3) - 1)
    def _store():
        o_ref[0] = acc_ref[...]


def pallas_conv1x1(x_bks, w, *, cast_bf16=False):
    """Batched 1x1 conv on the flattened NCHW layout: y[b] = w @ x[b].

    x_bks: (B, K, S),  w: (M, K)  ->  (B, M, S) f32
    """
    B, K, S = x_bks.shape
    M = w.shape[0]
    if cast_bf16:
        w = w.astype(jnp.bfloat16)
        x_bks = x_bks.astype(jnp.bfloat16)
    esize = 2 if cast_bf16 else 4
    budget = int(0.5 * _vmem_capacity())

    tm = _pick_tile(M, 256, 128)                    # MXU-aligned output-row tile
    full_k = K <= 2048                              # dim easily fits VMEM -> drop the K axis
    tk = K if full_k else _pick_tile(K, 512, 128)
    tn_target = 2048 if cast_bf16 else 1024         # big lane-dense tiles amortize step cost
    while True:
        tn = _pick_tile(S, tn_target, 128)
        # double-buffered operand/result tiles (+ accumulator scratch on the K-tiled path)
        work = (2 * esize * (tm * tk + tk * tn) + 2 * 4 * tm * tn
                + (0 if full_k else 4 * tm * tn))
        if work <= budget or tn_target <= 128:
            break
        tn_target //= 2

    cost = pl.CostEstimate(
        flops=2 * B * M * S * K, transcendentals=0,
        bytes_accessed=esize * (M * K + B * K * S) + 4 * B * M * S)

    if full_k:
        return pl.pallas_call(
            _bmm_fullk_kernel,
            grid=(B, M // tm, S // tn),             # weight block constant along inner S axis
            in_specs=[
                pl.BlockSpec((tm, K), lambda b, i, j: (i, 0)),
                pl.BlockSpec((1, K, tn), lambda b, i, j: (b, 0, j)),
            ],
            out_specs=pl.BlockSpec((1, tm, tn), lambda b, i, j: (b, i, j)),
            out_shape=jax.ShapeDtypeStruct((B, M, S), jnp.float32),
            compiler_params=_mosaic_params(("parallel", "parallel", "parallel"), work),
            cost_estimate=cost,
        )(w, x_bks)

    return pl.pallas_call(
        _bmm_ktiled_kernel,
        grid=(B, M // tm, S // tn, K // tk),
        in_specs=[
            pl.BlockSpec((tm, tk), lambda b, i, j, k: (i, k)),
            pl.BlockSpec((1, tk, tn), lambda b, i, j, k: (b, k, j)),
        ],
        out_specs=pl.BlockSpec((1, tm, tn), lambda b, i, j, k: (b, i, j)),
        out_shape=jax.ShapeDtypeStruct((B, M, S), jnp.float32),
        scratch_shapes=[pltpu.VMEM((tm, tn), jnp.float32)],
        compiler_params=_mosaic_params(
            ("parallel", "parallel", "parallel", "arbitrary"), work),
        cost_estimate=cost,
    )(w, x_bks)


# ----------------------- depthwise 3x3 conv (pad=1), flattened layout -----------------------
def _dwconv_kernel(x_ref, w_ref, cmask_ref, o_ref, pad_ref, *, W, HW, P):
    # x_ref: (1, tc, HW)   w_ref: (tc, 9)   cmask_ref: (2, HW)   o_ref: (1, tc, HW)
    # pad_ref: (tc, HW + 2P) zero-padded copy so every tap is a static lane-offset slice.
    # Row over/underflow lands in the zero pad; column wrap is killed by the lane masks.
    tc = x_ref.shape[1]
    pad_ref[:, :P] = jnp.zeros((tc, P), jnp.float32)
    pad_ref[:, P + HW:] = jnp.zeros((tc, P), jnp.float32)
    pad_ref[:, P:P + HW] = x_ref[0]

    wts = w_ref[...]                 # (tc, 9) — loaded once
    ok_left = cmask_ref[0:1, :]      # (1, HW): 0.0 where output col == 0      (dj = -1 taps)
    ok_right = cmask_ref[1:2, :]     # (1, HW): 0.0 where output col == W - 1  (dj = +1 taps)

    def tap(di, dj):
        s = di * W + dj
        t = (di + 1) * 3 + (dj + 1)
        return pad_ref[:, P + s:P + s + HW] * wts[:, t:t + 1]

    # Boundary masks factored out of the row sums (2 mask vmuls instead of 6); all 9 taps
    # accumulate in local values and the output block is stored exactly once.
    left = tap(-1, -1) + tap(0, -1) + tap(1, -1)
    mid = tap(-1, 0) + tap(0, 0) + tap(1, 0)
    right = tap(-1, 1) + tap(0, 1) + tap(1, 1)
    o_ref[0] = left * ok_left + mid + right * ok_right


def pallas_dwconv3x3(x_bcs, w9, H, W):
    """Depthwise 3x3 conv, padding=1, groups=C, on flattened NCHW x (B, C, H*W); w9: (C, 9)."""
    B, C3, HW = x_bcs.shape
    P = ((W + 1 + 127) // 128) * 128              # lane-aligned scratch padding (>= W + 1)

    def dw_bytes(t):   # double-buffered in/out blocks + padded scratch + elementwise temps
        return 4 * (2 * t * HW + 2 * t * HW + t * (HW + 2 * P) + 3 * t * HW)

    budget = int(0.45 * _vmem_capacity())
    tc = _pick_tile(C3, 256, 8)
    while dw_bytes(tc) > budget and tc > 8:
        nt = _pick_tile(C3, max(8, tc // 2), 8)
        if nt >= tc:
            break                                  # no smaller aligned divisor exists
        tc = nt
    # TODO(synk): if H*W is so large that even tc == 8 overflows VMEM, add a spatial tile with
    # a one-row halo on top of the channel tile.

    col = jnp.arange(HW, dtype=jnp.int32) % W
    cmask = jnp.stack([(col != 0), (col != W - 1)]).astype(jnp.float32)     # (2, HW)
    kern = functools.partial(_dwconv_kernel, W=W, HW=HW, P=P)
    return pl.pallas_call(
        kern,
        grid=(B, C3 // tc),
        in_specs=[
            pl.BlockSpec((1, tc, HW), lambda b, c: (b, c, 0)),
            pl.BlockSpec((tc, 9), lambda b, c: (c, 0)),
            pl.BlockSpec((2, HW), lambda b, c: (0, 0)),
        ],
        out_specs=pl.BlockSpec((1, tc, HW), lambda b, c: (b, c, 0)),
        out_shape=jax.ShapeDtypeStruct((B, C3, HW), jnp.float32),
        scratch_shapes=[pltpu.VMEM((tc, HW + 2 * P), jnp.float32)],
        compiler_params=_mosaic_params(("parallel", "parallel"), dw_bytes(tc)),
    )(x_bcs, w9, cmask)


# ------------------- attention core: per-(batch, head) fused top-k softmax -------------------
def _attn_kernel(wmix_ref, temp_ref, qkv_ref, o_ref, *, CH, HW, topks):
    # wmix_ref: SMEM (4,)   temp_ref: SMEM (NH,)   qkv_ref: (1, 3, 1, CH, HW)   o_ref: (1,1,CH,HW)
    h = pl.program_id(1)
    q = qkv_ref[0, 0, 0]                 # (CH, HW)
    k = qkv_ref[0, 1, 0]
    v = qkv_ref[0, 2, 0]

    # torch.nn.functional.normalize(dim=-1): x / max(||x||, 1e-12) == x * rsqrt(max(||x||^2, 1e-24))
    qn = q * lax.rsqrt(jnp.maximum(jnp.sum(q * q, axis=-1, keepdims=True), 1e-24))
    kn = k * lax.rsqrt(jnp.maximum(jnp.sum(k * k, axis=-1, keepdims=True), 1e-24))

    # attn[i, j] = <q_i, k_j> * temperature[h]  (one NT matmul on the MXU)
    attn = jnp.einsum('cs,es->ce', qn, kn, preferred_element_type=jnp.float32)
    attn = attn * temp_ref[h]

    # rank[i, j] = #{m : attn[i, m] > attn[i, j]}; top-k membership == rank < k (keeps
    # boundary ties, unlike torch.topk's index tie-break — identical for continuous inputs).
    # TODO(synk): lax.top_k / lax.sort have no Mosaic lowering, hence the compare-count rank.
    if CH <= 64:
        rank = jnp.sum((attn[:, None, :] > attn[:, :, None]).astype(jnp.float32), axis=-1)
    else:
        rank = jnp.zeros((CH, CH), jnp.float32)
        for j in range(CH):
            rank = rank + (attn[:, j:j + 1] > attn).astype(jnp.float32)

    # Fused 4-way sparse softmax: the row max survives every mask (rank 0, min(k) >= 1), so
    # exp() runs once; the four denominators are masked row sums (EUP approx reciprocal);
    # ONE (p @ v) matmul serves all four branches.
    e = jnp.exp(attn - jnp.max(attn, axis=-1, keepdims=True))
    wgt = jnp.zeros((CH, CH), jnp.float32)
    for i, kk in enumerate(topks):
        em = jnp.where(rank < float(kk), e, 0.0)
        inv = pl.reciprocal(jnp.sum(em, axis=-1, keepdims=True), approx=True)
        wgt = wgt + (wmix_ref[i] * em) * inv

    o_ref[0, 0] = jnp.dot(wgt, v, preferred_element_type=jnp.float32)


def pallas_topk_attention(wmix, temperature, qkv5, topks):
    B, _, NH, CH, HW = qkv5.shape
    kern = functools.partial(_attn_kernel, CH=CH, HW=HW, topks=topks)
    smem = pl.BlockSpec(memory_space=pltpu.MemorySpace.SMEM)
    work = 4 * (2 * 3 * CH * HW + 2 * CH * HW + 8 * CH * CH) + (4 * CH ** 3 if CH <= 64 else 0)
    return pl.pallas_call(
        kern,
        grid=(B, NH),                              # >= 2 parallel iterations -> megacore friendly
        in_specs=[
            smem,                                  # wmix (4,) scalars
            smem,                                  # temperature (NH,) scalars
            pl.BlockSpec((1, 3, 1, CH, HW), lambda b, h: (b, 0, h, 0, 0)),
        ],
        out_specs=pl.BlockSpec((1, 1, CH, HW), lambda b, h: (b, h, 0, 0)),
        out_shape=jax.ShapeDtypeStruct((B, NH, CH, HW), jnp.float32),
        compiler_params=_mosaic_params(("parallel", "parallel"), work),
    )(wmix, temperature, qkv5)


# ----------------------------------- full forward -----------------------------------
def attention_forward(x_nchw, params, num_heads):
    B, D, H, W = x_nchw.shape
    HW = H * W
    assert D % num_heads == 0
    CH = D // num_heads
    topks = (int(CH / 2), int(CH * 2 / 3), int(CH * 3 / 4), int(CH * 4 / 5))
    assert min(topks) >= 1, "fused top-k softmax requires every k >= 1"

    # The whole pipeline stays in the flattened NCHW layout (B, channels, H*W): no transposes,
    # only free reshapes between the three Pallas kernels.
    x = x_nchw.reshape(B, D, HW)
    qkv = pallas_conv1x1(x, params["w_qkv"], cast_bf16=MATMUL_BF16)           # (B, 3D, HW) f32
    qkv = pallas_dwconv3x3(qkv, params["w_dw"].reshape(3 * D, 9), H, W)       # (B, 3D, HW) f32
    # TODO(synk): fuse conv1x1 + dwconv + attention into a single per-(batch, head-group)
    # pallas_call so the qkv tensor never round-trips through HBM.

    qkv5 = qkv.reshape(B, 3, num_heads, CH, HW)                               # [q|k|v], head, c
    out = pallas_topk_attention(params["wmix"], params["temperature"], qkv5, topks)
    out = out.reshape(B, D, HW)                                               # 'b head c s -> b (head c) s'
    y = pallas_conv1x1(out, params["w_proj"], cast_bf16=MATMUL_BF16)          # (B, D, HW)
    return y.reshape(B, D, H, W)


def init_params(key, dim, num_heads):
    k1, k2, k3 = jax.random.split(key, 3)
    return {
        "w_qkv": 0.1 * jax.random.normal(k1, (3 * dim, dim), jnp.float32),    # 1x1 conv (out, in)
        "w_dw": 0.1 * jax.random.normal(k2, (3 * dim, 3, 3), jnp.float32),    # depthwise 3x3 (ch, kh, kw)
        "w_proj": 0.1 * jax.random.normal(k3, (dim, dim), jnp.float32),       # 1x1 conv (out, in)
        "temperature": jnp.ones((num_heads,), jnp.float32),                   # nn.Parameter(ones(heads,1,1))
        "wmix": jnp.full((4,), 0.2, jnp.float32),                             # attn1..attn4 = 0.2
    }


# ------------------------------ pure-JAX reference (for checking) ------------------------------
def reference_forward(x_nchw, params, num_heads, *, bf16_matmul=False):
    B, D, H, W = x_nchw.shape
    HW = H * W
    CH = D // num_heads
    hp = lax.Precision.HIGHEST

    def conv1x1(w, xf):
        if bf16_matmul:   # mirror the kernel's operand-precision policy (f32 accumulation)
            return jnp.einsum('oc,bcs->bos', w.astype(jnp.bfloat16), xf.astype(jnp.bfloat16),
                              preferred_element_type=jnp.float32)
        return jnp.einsum('oc,bcs->bos', w, xf, precision=hp)

    xf = x_nchw.reshape(B, D, HW)
    qkv = conv1x1(params["w_qkv"], xf).reshape(B, 3 * D, H, W)

    qkv_p = jnp.pad(qkv, ((0, 0), (0, 0), (1, 1), (1, 1)))
    wdw = params["w_dw"]
    acc = jnp.zeros_like(qkv)
    for a in range(3):
        for bb in range(3):
            acc = acc + qkv_p[:, :, a:a + H, bb:bb + W] * wdw[:, a, bb][None, :, None, None]

    qkv5 = acc.reshape(B, 3, num_heads, CH, HW)
    q, k, v = qkv5[:, 0], qkv5[:, 1], qkv5[:, 2]
    qn = q / jnp.maximum(jnp.sqrt(jnp.sum(q * q, -1, keepdims=True)), 1e-12)
    kn = k / jnp.maximum(jnp.sqrt(jnp.sum(k * k, -1, keepdims=True)), 1e-12)

    attn = jnp.einsum('bhcs,bhes->bhce', qn, kn, precision=hp)
    attn = attn * params["temperature"][None, :, None, None]

    rank = jnp.sum((attn[..., None, :] > attn[..., :, None]).astype(jnp.int32), axis=-1)
    topks = (int(CH / 2), int(CH * 2 / 3), int(CH * 3 / 4), int(CH * 4 / 5))
    out = jnp.zeros_like(v)
    for i, kk in enumerate(topks):
        masked = jnp.where(rank < kk, attn, -jnp.inf)
        p = jax.nn.softmax(masked, axis=-1)
        out = out + params["wmix"][i] * jnp.einsum('bhce,bhes->bhcs', p, v, precision=hp)

    out = out.reshape(B, D, HW)
    y = conv1x1(params["w_proj"], out)
    return y.reshape(B, D, H, W)


if __name__ == "__main__":
    B, DIM, H, W = 2, 32, 16, 16      # H*W = 256 (lane dense), 8 channels per head
    NUM_HEADS = 4

    key = jax.random.PRNGKey(0)
    kx, kp = jax.random.split(key)
    x = jax.random.normal(kx, (B, DIM, H, W), jnp.float32)     # NCHW, as in PyTorch
    params = init_params(kp, DIM, NUM_HEADS)

    fwd = jax.jit(functools.partial(attention_forward, num_heads=NUM_HEADS))
    y = jax.block_until_ready(fwd(x, params))
    assert y.shape == (B, DIM, H, W) and y.dtype == jnp.float32

    # Primary check: reference using the SAME operand-precision policy as the kernel (bf16
    # matmul operands, everything else f32) -> tight tolerance isolates kernel bugs from the
    # intentional bf16 quantization of the two projections.
    y_ref = jax.block_until_ready(jax.jit(functools.partial(
        reference_forward, num_heads=NUM_HEADS, bf16_matmul=MATMUL_BF16))(x, params))
    err = float(jnp.max(jnp.abs(y - y_ref)))
    assert err < 5e-3, f"kernel vs matched-precision reference: max abs err = {err}"

    # Secondary (loose) semantic check against the full-f32 reference: guards against gross
    # errors; residual differences come only from the intentional bf16 projection operands
    # (which can shift a few boundary top-k picks on near-tied scores).
    if MATMUL_BF16:
        y_f32 = jax.block_until_ready(jax.jit(functools.partial(
            reference_forward, num_heads=NUM_HEADS, bf16_matmul=False))(x, params))
        err32 = float(jnp.max(jnp.abs(y - y_f32)))
        assert err32 < 1e-1, f"kernel vs f32 reference: max abs err = {err32}"

    print("KERNEL_OK")
</pallas_src>

<mosaic_0001>
module attributes {stable_mosaic.version = 11 : i64} {
  func.func @_bmm_fullk_kernel(%arg0: i32, %arg1: i32, %arg2: i32, %arg3: memref<96x32xbf16, #tpu.memory_space<vmem>>, %arg4: memref<1x32x256xbf16, #tpu.memory_space<vmem>>, %arg5: memref<1x96x256xf32, #tpu.memory_space<vmem>>) attributes {dimension_semantics = [#tpu.dimension_semantics<parallel>, #tpu.dimension_semantics<parallel>, #tpu.dimension_semantics<parallel>], iteration_bounds = array<i64: 2, 1, 1>, scalar_prefetch = 0 : i64, scratch_operands = 0 : i64, tpu.core_type = #tpu.core_type<tc>, window_params = [{transform_indices = @transform_0, window_bounds = array<i64: 96, 32>}, {transform_indices = @transform_1, window_bounds = array<i64: 1, 32, 256>}, {transform_indices = @transform_2, window_bounds = array<i64: 1, 96, 256>}]} {
    %c0 = arith.constant 0 : index
    %c0_0 = arith.constant 0 : index
    %0 = vector.load %arg3[%c0, %c0_0] : memref<96x32xbf16, #tpu.memory_space<vmem>>, vector<96x32xbf16>
    %c0_1 = arith.constant 0 : index
    %c0_2 = arith.constant 0 : index
    %c0_3 = arith.constant 0 : index
    %1 = vector.load %arg4[%c0_1, %c0_2, %c0_3] : memref<1x32x256xbf16, #tpu.memory_space<vmem>>, vector<1x32x256xbf16>
    %2 = vector.shape_cast %1 : vector<1x32x256xbf16> to vector<32x256xbf16>
    %cst = arith.constant dense<0.000000e+00> : vector<96x256xf32>
    %3 = tpu.matmul %0, %2, %cst {dimension_numbers = #tpu.dot_dimension_numbers<[1], [0], [0], [1], [0, 0, 1, 1], [], []>} : vector<96x32xbf16>, vector<32x256xbf16>, vector<96x256xf32> -> vector<96x256xf32>
    %c0_4 = arith.constant 0 : index
    %c0_5 = arith.constant 0 : index
    %c0_6 = arith.constant 0 : index
    %4 = vector.load %arg5[%c0_4, %c0_5, %c0_6] : memref<1x96x256xf32, #tpu.memory_space<vmem>>, vector<1x96x256xf32>
    %5 = vector.shape_cast %4 : vector<1x96x256xf32> to vector<96x256xf32>
    %6 = vector.shape_cast %3 : vector<96x256xf32> to vector<1x96x256xf32>
    tpu.vector_store %arg5[%c0_4, %c0_5, %c0_6], %6 {strides = array<i32>} : memref<1x96x256xf32, #tpu.memory_space<vmem>>, vector<1x96x256xf32>,
    return
  }
  func.func @transform_0(%arg0: i32, %arg1: i32, %arg2: i32) -> (i32, i32) {
    %c0_i32 = arith.constant 0 : i32
    %c0_i32_0 = arith.constant 0 : i32
    return %arg1, %c0_i32 : i32, i32
  }
  func.func @transform_1(%arg0: i32, %arg1: i32, %arg2: i32) -> (i32, i32, i32) {
    %c0_i32 = arith.constant 0 : i32
    %c0_i32_0 = arith.constant 0 : i32
    return %arg0, %c0_i32, %arg2 : i32, i32, i32
  }
  func.func @transform_2(%arg0: i32, %arg1: i32, %arg2: i32) -> (i32, i32, i32) {
    %c0_i32 = arith.constant 0 : i32
    return %arg0, %arg1, %arg2 : i32, i32, i32
  }
}

module attributes {stable_mosaic.version = 11 : i64} {
  func.func @_attn_kernel(%arg0: i32, %arg1: i32, %arg2: memref<4xf32, #tpu.memory_space<smem>>, %arg3: memref<4xf32, #tpu.memory_space<smem>>, %arg4: memref<1x3x1x8x256xf32, #tpu.memory_space<vmem>>, %arg5: memref<1x1x8x256xf32, #tpu.memory_space<vmem>>) attributes {dimension_semantics = [#tpu.dimension_semantics<parallel>, #tpu.dimension_semantics<parallel>], iteration_bounds = array<i64: 2, 4>, scalar_prefetch = 0 : i64, scratch_operands = 0 : i64, tpu.core_type = #tpu.core_type<tc>, window_params = [{transform_indices = @transform_0, window_bounds = array<i64: 4>}, {transform_indices = @transform_1, window_bounds = array<i64: 4>}, {transform_indices = @transform_2, window_bounds = array<i64: 1, 3, 1, 8, 256>}, {transform_indices = @transform_3, window_bounds = array<i64: 1, 1, 8, 256>}]} {
    %c0 = arith.constant 0 : index
    %c0_0 = arith.constant 0 : index
    %c0_1 = arith.constant 0 : index
    %c0_2 = arith.constant 0 : index
    %c0_3 = arith.constant 0 : index
    %0 = vector.load %arg4[%c0, %c0_0, %c0_1, %c0_2, %c0_3] : memref<1x3x1x8x256xf32, #tpu.memory_space<vmem>>, vector<1x1x1x8x256xf32>
    %1 = vector.shape_cast %0 : vector<1x1x1x8x256xf32> to vector<8x256xf32>
    %c0_4 = arith.constant 0 : index
    %c1 = arith.constant 1 : index
    %c0_5 = arith.constant 0 : index
    %c0_6 = arith.constant 0 : index
    %c0_7 = arith.constant 0 : index
    %2 = vector.load %arg4[%c0_4, %c1, %c0_5, %c0_6, %c0_7] : memref<1x3x1x8x256xf32, #tpu.memory_space<vmem>>, vector<1x1x1x8x256xf32>
    %3 = vector.shape_cast %2 : vector<1x1x1x8x256xf32> to vector<8x256xf32>
    %c0_8 = arith.constant 0 : index
    %c2 = arith.constant 2 : index
    %c0_9 = arith.constant 0 : index
    %c0_10 = arith.constant 0 : index
    %c0_11 = arith.constant 0 : index
    %4 = vector.load %arg4[%c0_8, %c2, %c0_9, %c0_10, %c0_11] : memref<1x3x1x8x256xf32, #tpu.memory_space<vmem>>, vector<1x1x1x8x256xf32>
    %5 = vector.shape_cast %4 : vector<1x1x1x8x256xf32> to vector<8x256xf32>
    %6 = arith.mulf %1, %1 : vector<8x256xf32>
    %cst = arith.constant dense<0.000000e+00> : vector<8xf32>
    %7 = vector.multi_reduction <add>, %6, %cst [1] : vector<8x256xf32> to vector<8xf32>
    %8 = vector.shape_cast %7 : vector<8xf32> to vector<8x1xf32>
    %cst_12 = arith.constant 1.000000e-24 : f32
    %9 = vector.broadcast %cst_12 : f32 to vector<8x1xf32>
    %10 = arith.maximumf %8, %9 : vector<8x1xf32>
    %11 = math.rsqrt %10 : vector<8x1xf32>
    %12 = vector.broadcast %11 : vector<8x1xf32> to vector<8x256xf32>
    %13 = arith.mulf %1, %12 : vector<8x256xf32>
    %14 = arith.mulf %3, %3 : vector<8x256xf32>
    %cst_13 = arith.constant dense<0.000000e+00> : vector<8xf32>
    %15 = vector.multi_reduction <add>, %14, %cst_13 [1] : vector<8x256xf32> to vector<8xf32>
    %16 = vector.shape_cast %15 : vector<8xf32> to vector<8x1xf32>
    %cst_14 = arith.constant 1.000000e-24 : f32
    %17 = vector.broadcast %cst_14 : f32 to vector<8x1xf32>
    %18 = arith.maximumf %16, %17 : vector<8x1xf32>
    %19 = math.rsqrt %18 : vector<8x1xf32>
    %20 = vector.broadcast %19 : vector<8x1xf32> to vector<8x256xf32>
    %21 = arith.mulf %3, %20 : vector<8x256xf32>
    "tpu.trace_start"() <{level = 10 : i32, message = "cs,es->ce"}> : () -> ()
    %cst_15 = arith.constant dense<0.000000e+00> : vector<8x8xf32>
    %22 = tpu.matmul %13, %21, %cst_15 {dimension_numbers = #tpu.dot_dimension_numbers<[1], [1], [0], [0], [0, 0, 1, 0], [], []>} : vector<8x256xf32>, vector<8x256xf32>, vector<8x8xf32> -> vector<8x8xf32>
    "tpu.trace_stop"() : () -> ()
    %23 = arith.index_cast %arg1 : i32 to index
    %24 = memref.load %arg3[%23] : memref<4xf32, #tpu.memory_space<smem>>
    %25 = vector.broadcast %24 : f32 to vector<8x8xf32>
    %26 = arith.mulf %22, %25 : vector<8x8xf32>
    %27 = vector.shape_cast %26 : vector<8x8xf32> to vector<8x1x8xf32>
    %28 = vector.shape_cast %26 : vector<8x8xf32> to vector<8x8x1xf32>
    %29 = vector.broadcast %27 : vector<8x1x8xf32> to vector<8x8x8xf32>
    %30 = vector.broadcast %28 : vector<8x8x1xf32> to vector<8x8x8xf32>
    %31 = arith.cmpf ogt, %29, %30 : vector<8x8x8xf32>
    %32 = arith.extui %31 : vector<8x8x8xi1> to vector<8x8x8xi32>
    %33 = arith.sitofp %32 : vector<8x8x8xi32> to vector<8x8x8xf32>
    %cst_16 = arith.constant dense<0.000000e+00> : vector<8x8xf32>
    %34 = vector.multi_reduction <add>, %33, %cst_16 [2] : vector<8x8x8xf32> to vector<8x8xf32>
    %cst_17 = arith.constant dense<0xFF800000> : vector<8xf32>
    %35 = vector.multi_reduction <maximumf>, %26, %cst_17 [1] : vector<8x8xf32> to vector<8xf32>
    %36 = vector.shape_cast %35 : vector<8xf32> to vector<8x1xf32>
    %37 = vector.broadcast %36 : vector<8x1xf32> to vector<8x8xf32>
    %38 = arith.subf %26, %37 : vector<8x8xf32>
    %39 = math.exp %38 : vector<8x8xf32>
    %cst_18 = arith.constant 0.000000e+00 : f32
    %40 = vector.broadcast %cst_18 : f32 to vector<8x8xf32>
    %cst_19 = arith.constant 4.000000e+00 : f32
    %41 = vector.broadcast %cst_19 : f32 to vector<8x8xf32>
    %42 = arith.cmpf olt, %34, %41 : vector<8x8xf32>
    %cst_20 = arith.constant 0.000000e+00 : f32
    %43 = vector.broadcast %cst_20 : f32 to vector<8x8xf32>
    %44 = arith.select %42, %39, %43 : vector<8x8xi1>, vector<8x8xf32>
    %cst_21 = arith.constant dense<0.000000e+00> : vector<8xf32>
    %45 = vector.multi_reduction <add>, %44, %cst_21 [1] : vector<8x8xf32> to vector<8xf32>
    %46 = vector.shape_cast %45 : vector<8xf32> to vector<8x1xf32>
    %47 = tpu.reciprocal %46 {approx = true} : vector<8x1xf32> -> vector<8x1xf32>
    %c0_22 = arith.constant 0 : index
    %48 = memref.load %arg2[%c0_22] : memref<4xf32, #tpu.memory_space<smem>>
    %49 = vector.broadcast %48 : f32 to vector<8x8xf32>
    %50 = arith.mulf %49, %44 : vector<8x8xf32>
    %51 = vector.broadcast %47 : vector<8x1xf32> to vector<8x8xf32>
    %52 = arith.mulf %50, %51 : vector<8x8xf32>
    %53 = arith.addf %40, %52 : vector<8x8xf32>
    %cst_23 = arith.constant 5.000000e+00 : f32
    %54 = vector.broadcast %cst_23 : f32 to vector<8x8xf32>
    %55 = arith.cmpf olt, %34, %54 : vector<8x8xf32>
    %cst_24 = arith.constant 0.000000e+00 : f32
    %56 = vector.broadcast %cst_24 : f32 to vector<8x8xf32>
    %57 = arith.select %55, %39, %56 : vector<8x8xi1>, vector<8x8xf32>
    %cst_25 = arith.constant dense<0.000000e+00> : vector<8xf32>
    %58 = vector.multi_reduction <add>, %57, %cst_25 [1] : vector<8x8xf32> to vector<8xf32>
    %59 = vector.shape_cast %58 : vector<8xf32> to vector<8x1xf32>
    %60 = tpu.reciprocal %59 {approx = true} : vector<8x1xf32> -> vector<8x1xf32>
    %c1_26 = arith.constant 1 : index
    %61 = memref.load %arg2[%c1_26] : memref<4xf32, #tpu.memory_space<smem>>
    %62 = vector.broadcast %61 : f32 to vector<8x8xf32>
    %63 = arith.mulf %62, %57 : vector<8x8xf32>
    %64 = vector.broadcast %60 : vector<8x1xf32> to vector<8x8xf32>
    %65 = arith.mulf %63, %64 : vector<8x8xf32>
    %66 = arith.addf %53, %65 : vector<8x8xf32>
    %cst_27 = arith.constant 6.000000e+00 : f32
    %67 = vector.broadcast %cst_27 : f32 to vector<8x8xf32>
    %68 = arith.cmpf olt, %34, %67 : vector<8x8xf32>
    %cst_28 = arith.constant 0.000000e+00 : f32
    %69 = vector.broadcast %cst_28 : f32 to vector<8x8xf32>
    %70 = arith.select %68, %39, %69 : vector<8x8xi1>, vector<8x8xf32>
    %cst_29 = arith.constant dense<0.000000e+00> : vector<8xf32>
    %71 = vector.multi_reduction <add>, %70, %cst_29 [1] : vector<8x8xf32> to vector<8xf32>
    %72 = vector.shape_cast %71 : vector<8xf32> to vector<8x1xf32>
    %73 = tpu.reciprocal %72 {approx = true} : vector<8x1xf32> -> vector<8x1xf32>
    %c2_30 = arith.constant 2 : index
    %74 = memref.load %arg2[%c2_30] : memref<4xf32, #tpu.memory_space<smem>>
    %75 = vector.broadcast %74 : f32 to vector<8x8xf32>
    %76 = arith.mulf %75, %70 : vector<8x8xf32>
    %77 = vector.broadcast %73 : vector<8x1xf32> to vector<8x8xf32>
    %78 = arith.mulf %76, %77 : vector<8x8xf32>
    %79 = arith.addf %66, %78 : vector<8x8xf32>
    %cst_31 = arith.constant 6.000000e+00 : f32
    %80 = vector.broadcast %cst_31 : f32 to vector<8x8xf32>
    %81 = arith.cmpf olt, %34, %80 : vector<8x8xf32>
    %cst_32 = arith.constant 0.000000e+00 : f32
    %82 = vector.broadcast %cst_32 : f32 to vector<8x8xf32>
    %83 = arith.select %81, %39, %82 : vector<8x8xi1>, vector<8x8xf32>
    %cst_33 = arith.constant dense<0.000000e+00> : vector<8xf32>
    %84 = vector.multi_reduction <add>, %83, %cst_33 [1] : vector<8x8xf32> to vector<8xf32>
    %85 = vector.shape_cast %84 : vector<8xf32> to vector<8x1xf32>
    %86 = tpu.reciprocal %85 {approx = true} : vector<8x1xf32> -> vector<8x1xf32>
    %c3 = arith.constant 3 : index
    %87 = memref.load %arg2[%c3] : memref<4xf32, #tpu.memory_space<smem>>
    %88 = vector.broadcast %87 : f32 to vector<8x8xf32>
    %89 = arith.mulf %88, %83 : vector<8x8xf32>
    %90 = vector.broadcast %86 : vector<8x1xf32> to vector<8x8xf32>
    %91 = arith.mulf %89, %90 : vector<8x8xf32>
    %92 = arith.addf %79, %91 : vector<8x8xf32>
    %cst_34 = arith.constant dense<0.000000e+00> : vector<8x256xf32>
    %93 = tpu.matmul %92, %5, %cst_34 {dimension_numbers = #tpu.dot_dimension_numbers<[1], [0], [0], [1], [0, 0, 1, 1], [], []>} : vector<8x8xf32>, vector<8x256xf32>, vector<8x256xf32> -> vector<8x256xf32>
    %c0_35 = arith.constant 0 : index
    %c0_36 = arith.constant 0 : index
    %c0_37 = arith.constant 0 : index
    %c0_38 = arith.constant 0 : index
    %94 = vector.load %arg5[%c0_35, %c0_36, %c0_37, %c0_38] : memref<1x1x8x256xf32, #tpu.memory_space<vmem>>, vector<1x1x8x256xf32>
    %95 = vector.shape_cast %94 : vector<1x1x8x256xf32> to vector<8x256xf32>
    %96 = vector.shape_cast %93 : vector<8x256xf32> to vector<1x1x8x256xf32>
    tpu.vector_store %arg5[%c0_35, %c0_36, %c0_37, %c0_38], %96 {strides = array<i32>} : memref<1x1x8x256xf32, #tpu.memory_space<vmem>>, vector<1x1x8x256xf32>,
    return
  }
  func.func @transform_0(%arg0: i32, %arg1: i32) -> i32 {
    %c0_i32 = arith.constant 0 : i32
    %c0_i32_0 = arith.constant 0 : i32
    return %c0_i32 : i32
  }
  func.func @transform_1(%arg0: i32, %arg1: i32) -> i32 {
    %c0_i32 = arith.constant 0 : i32
    %c0_i32_0 = arith.constant 0 : i32
    return %c0_i32 : i32
  }
  func.func @transform_2(%arg0: i32, %arg1: i32) -> (i32, i32, i32, i32, i32) {
    %c0_i32 = arith.constant 0 : i32
    %c0_i32_0 = arith.constant 0 : i32
    %c0_i32_1 = arith.constant 0 : i32
    %c0_i32_2 = arith.constant 0 : i32
    return %arg0, %c0_i32, %arg1, %c0_i32_0, %c0_i32_1 : i32, i32, i32, i32, i32
  }
  func.func @transform_3(%arg0: i32, %arg1: i32) -> (i32, i32, i32, i32) {
    %c0_i32 = arith.constant 0 : i32
    %c0_i32_0 = arith.constant 0 : i32
    %c0_i32_1 = arith.constant 0 : i32
    return %arg0, %arg1, %c0_i32, %c0_i32_0 : i32, i32, i32, i32
  }
}

module attributes {stable_mosaic.version = 11 : i64} {
  func.func @_dwconv_kernel(%arg0: i32, %arg1: i32, %arg2: memref<1x96x256xf32, #tpu.memory_space<vmem>>, %arg3: memref<96x9xf32, #tpu.memory_space<vmem>>, %arg4: memref<2x256xf32, #tpu.memory_space<vmem>>, %arg5: memref<1x96x256xf32, #tpu.memory_space<vmem>>, %arg6: memref<96x512xf32, #tpu.memory_space<vmem>>) attributes {dimension_semantics = [#tpu.dimension_semantics<parallel>, #tpu.dimension_semantics<parallel>], iteration_bounds = array<i64: 2, 1>, scalar_prefetch = 0 : i64, scratch_operands = 1 : i64, tpu.core_type = #tpu.core_type<tc>, window_params = [{transform_indices = @transform_0, window_bounds = array<i64: 1, 96, 256>}, {transform_indices = @transform_1, window_bounds = array<i64: 96, 9>}, {pipeline_mode = #tpu.pipeline_mode<synchronous>, transform_indices = @transform_2, window_bounds = array<i64: 2, 256>}, {transform_indices = @transform_3, window_bounds = array<i64: 1, 96, 256>}]} {
    %cst = arith.constant 0.000000e+00 : f32
    %0 = vector.broadcast %cst : f32 to vector<96x128xf32>
    %c0 = arith.constant 0 : index
    %c0_0 = arith.constant 0 : index
    %1 = vector.load %arg6[%c0, %c0_0] : memref<96x512xf32, #tpu.memory_space<vmem>>, vector<96x128xf32>
    tpu.vector_store %arg6[%c0, %c0_0], %0 {strides = array<i32>} : memref<96x512xf32, #tpu.memory_space<vmem>>, vector<96x128xf32>,
    %cst_1 = arith.constant 0.000000e+00 : f32
    %2 = vector.broadcast %cst_1 : f32 to vector<96x128xf32>
    %c0_2 = arith.constant 0 : index
    %c384 = arith.constant 384 : index
    %3 = vector.load %arg6[%c0_2, %c384] : memref<96x512xf32, #tpu.memory_space<vmem>>, vector<96x128xf32>
    tpu.vector_store %arg6[%c0_2, %c384], %2 {strides = array<i32>} : memref<96x512xf32, #tpu.memory_space<vmem>>, vector<96x128xf32>,
    %c0_3 = arith.constant 0 : index
    %c0_4 = arith.constant 0 : index
    %c0_5 = arith.constant 0 : index
    %4 = vector.load %arg2[%c0_3, %c0_4, %c0_5] : memref<1x96x256xf32, #tpu.memory_space<vmem>>, vector<1x96x256xf32>
    %5 = vector.shape_cast %4 : vector<1x96x256xf32> to vector<96x256xf32>
    %c0_6 = arith.constant 0 : index
    %c128 = arith.constant 128 : index
    %6 = vector.load %arg6[%c0_6, %c128] : memref<96x512xf32, #tpu.memory_space<vmem>>, vector<96x256xf32>
    tpu.vector_store %arg6[%c0_6, %c128], %5 {strides = array<i32>} : memref<96x512xf32, #tpu.memory_space<vmem>>, vector<96x256xf32>,
    %c0_7 = arith.constant 0 : index
    %c0_8 = arith.constant 0 : index
    %7 = vector.load %arg3[%c0_7, %c0_8] : memref<96x9xf32, #tpu.memory_space<vmem>>, vector<96x9xf32>
    %c0_9 = arith.constant 0 : index
    %c0_10 = arith.constant 0 : index
    %8 = vector.load %arg4[%c0_9, %c0_10] : memref<2x256xf32, #tpu.memory_space<vmem>>, vector<1x256xf32>
    %c1 = arith.constant 1 : index
    %c0_11 = arith.constant 0 : index
    %9 = vector.load %arg4[%c1, %c0_11] : memref<2x256xf32, #tpu.memory_space<vmem>>, vector<1x256xf32>
    %c0_12 = arith.constant 0 : index
    %c111 = arith.constant 111 : index
    %10 = vector.load %arg6[%c0_12, %c111] : memref<96x512xf32, #tpu.memory_space<vmem>>, vector<96x256xf32>
    %11 = vector.extract_strided_slice %7 {offsets = [0, 0], sizes = [96, 1], strides = [1, 1]} : vector<96x9xf32> to vector<96x1xf32>
    %12 = vector.broadcast %11 : vector<96x1xf32> to vector<96x256xf32>
    %13 = arith.mulf %10, %12 : vector<96x256xf32>
    %c0_13 = arith.constant 0 : index
    %c127 = arith.constant 127 : index
    %14 = vector.load %arg6[%c0_13, %c127] : memref<96x512xf32, #tpu.memory_space<vmem>>, vector<96x256xf32>
    %15 = vector.extract_strided_slice %7 {offsets = [0, 3], sizes = [96, 1], strides = [1, 1]} : vector<96x9xf32> to vector<96x1xf32>
    %16 = vector.broadcast %15 : vector<96x1xf32> to vector<96x256xf32>
    %17 = arith.mulf %14, %16 : vector<96x256xf32>
    %18 = arith.addf %13, %17 : vector<96x256xf32>
    %c0_14 = arith.constant 0 : index
    %c143 = arith.constant 143 : index
    %19 = vector.load %arg6[%c0_14, %c143] : memref<96x512xf32, #tpu.memory_space<vmem>>, vector<96x256xf32>
    %20 = vector.extract_strided_slice %7 {offsets = [0, 6], sizes = [96, 1], strides = [1, 1]} : vector<96x9xf32> to vector<96x1xf32>
    %21 = vector.broadcast %20 : vector<96x1xf32> to vector<96x256xf32>
    %22 = arith.mulf %19, %21 : vector<96x256xf32>
    %23 = arith.addf %18, %22 : vector<96x256xf32>
    %c0_15 = arith.constant 0 : index
    %c112 = arith.constant 112 : index
    %24 = vector.load %arg6[%c0_15, %c112] : memref<96x512xf32, #tpu.memory_space<vmem>>, vector<96x256xf32>
    %25 = vector.extract_strided_slice %7 {offsets = [0, 1], sizes = [96, 1], strides = [1, 1]} : vector<96x9xf32> to vector<96x1xf32>
    %26 = vector.broadcast %25 : vector<96x1xf32> to vector<96x256xf32>
    %27 = arith.mulf %24, %26 : vector<96x256xf32>
    %c0_16 = arith.constant 0 : index
    %c128_17 = arith.constant 128 : index
    %28 = vector.load %arg6[%c0_16, %c128_17] : memref<96x512xf32, #tpu.memory_space<vmem>>, vector<96x256xf32>
    %29 = vector.extract_strided_slice %7 {offsets = [0, 4], sizes = [96, 1], strides = [1, 1]} : vector<96x9xf32> to vector<96x1xf32>
    %30 = vector.broadcast %29 : vector<96x1xf32> to vector<96x256xf32>
    %31 = arith.mulf %28, %30 : vector<96x256xf32>
    %32 = arith.addf %27, %31 : vector<96x256xf32>
    %c0_18 = arith.constant 0 : index
    %c144 = arith.constant 144 : index
    %33 = vector.load %arg6[%c0_18, %c144] : memref<96x512xf32, #tpu.memory_space<vmem>>, vector<96x256xf32>
    %34 = vector.extract_strided_slice %7 {offsets = [0, 7], sizes = [96, 1], strides = [1, 1]} : vector<96x9xf32> to vector<96x1xf32>
    %35 = vector.broadcast %34 : vector<96x1xf32> to vector<96x256xf32>
    %36 = arith.mulf %33, %35 : vector<96x256xf32>
    %37 = arith.addf %32, %36 : vector<96x256xf32>
    %c0_19 = arith.constant 0 : index
    %c113 = arith.constant 113 : index
    %38 = vector.load %arg6[%c0_19, %c113] : memref<96x512xf32, #tpu.memory_space<vmem>>, vector<96x256xf32>
    %39 = vector.extract_strided_slice %7 {offsets = [0, 2], sizes = [96, 1], strides = [1, 1]} : vector<96x9xf32> to vector<96x1xf32>
    %40 = vector.broadcast %39 : vector<96x1xf32> to vector<96x256xf32>
    %41 = arith.mulf %38, %40 : vector<96x256xf32>
    %c0_20 = arith.constant 0 : index
    %c129 = arith.constant 129 : index
    %42 = vector.load %arg6[%c0_20, %c129] : memref<96x512xf32, #tpu.memory_space<vmem>>, vector<96x256xf32>
    %43 = vector.extract_strided_slice %7 {offsets = [0, 5], sizes = [96, 1], strides = [1, 1]} : vector<96x9xf32> to vector<96x1xf32>
    %44 = vector.broadcast %43 : vector<96x1xf32> to vector<96x256xf32>
    %45 = arith.mulf %42, %44 : vector<96x256xf32>
    %46 = arith.addf %41, %45 : vector<96x256xf32>
    %c0_21 = arith.constant 0 : index
    %c145 = arith.constant 145 : index
    %47 = vector.load %arg6[%c0_21, %c145] : memref<96x512xf32, #tpu.memory_space<vmem>>, vector<96x256xf32>
    %48 = vector.extract_strided_slice %7 {offsets = [0, 8], sizes = [96, 1], strides = [1, 1]} : vector<96x9xf32> to vector<96x1xf32>
    %49 = vector.broadcast %48 : vector<96x1xf32> to vector<96x256xf32>
    %50 = arith.mulf %47, %49 : vector<96x256xf32>
    %51 = arith.addf %46, %50 : vector<96x256xf32>
    %52 = vector.broadcast %8 : vector<1x256xf32> to vector<96x256xf32>
    %53 = arith.mulf %23, %52 : vector<96x256xf32>
    %54 = arith.addf %53, %37 : vector<96x256xf32>
    %55 = vector.broadcast %9 : vector<1x256xf32> to vector<96x256xf32>
    %56 = arith.mulf %51, %55 : vector<96x256xf32>
    %57 = arith.addf %54, %56 : vector<96x256xf32>
    %c0_22 = arith.constant 0 : index
    %c0_23 = arith.constant 0 : index
    %c0_24 = arith.constant 0 : index
    %58 = vector.load %arg5[%c0_22, %c0_23, %c0_24] : memref<1x96x256xf32, #tpu.memory_space<vmem>>, vector<1x96x256xf32>
    %59 = vector.shape_cast %58 : vector<1x96x256xf32> to vector<96x256xf32>
    %60 = vector.shape_cast %57 : vector<96x256xf32> to vector<1x96x256xf32>
    tpu.vector_store %arg5[%c0_22, %c0_23, %c0_24], %60 {strides = array<i32>} : memref<1x96x256xf32, #tpu.memory_space<vmem>>, vector<1x96x256xf32>,
    return
  }
  func.func @transform_0(%arg0: i32, %arg1: i32) -> (i32, i32, i32) {
    %c0_i32 = arith.constant 0 : i32
    %c0_i32_0 = arith.constant 0 : i32
    return %arg0, %arg1, %c0_i32 : i32, i32, i32
  }
  func.func @transform_1(%arg0: i32, %arg1: i32) -> (i32, i32) {
    %c0_i32 = arith.constant 0 : i32
    %c0_i32_0 = arith.constant 0 : i32
    return %arg1, %c0_i32 : i32, i32
  }
  func.func @transform_2(%arg0: i32, %arg1: i32) -> (i32, i32) {
    %c0_i32 = arith.constant 0 : i32
    %c0_i32_0 = arith.constant 0 : i32
    %c0_i32_1 = arith.constant 0 : i32
    return %c0_i32, %c0_i32_0 : i32, i32
  }
  func.func @transform_3(%arg0: i32, %arg1: i32) -> (i32, i32, i32) {
    %c0_i32 = arith.constant 0 : i32
    %c0_i32_0 = arith.constant 0 : i32
    return %arg0, %arg1, %c0_i32 : i32, i32, i32
  }
}

module attributes {stable_mosaic.version = 11 : i64} {
  func.func @_bmm_fullk_kernel(%arg0: i32, %arg1: i32, %arg2: i32, %arg3: memref<32x32xbf16, #tpu.memory_space<vmem>>, %arg4: memref<1x32x256xbf16, #tpu.memory_space<vmem>>, %arg5: memref<1x32x256xf32, #tpu.memory_space<vmem>>) attributes {dimension_semantics = [#tpu.dimension_semantics<parallel>, #tpu.dimension_semantics<parallel>, #tpu.dimension_semantics<parallel>], iteration_bounds = array<i64: 2, 1, 1>, scalar_prefetch = 0 : i64, scratch_operands = 0 : i64, tpu.core_type = #tpu.core_type<tc>, window_params = [{transform_indices = @transform_0, window_bounds = array<i64: 32, 32>}, {transform_indices = @transform_1, window_bounds = array<i64: 1, 32, 256>}, {transform_indices = @transform_2, window_bounds = array<i64: 1, 32, 256>}]} {
    %c0 = arith.constant 0 : index
    %c0_0 = arith.constant 0 : index
    %0 = vector.load %arg3[%c0, %c0_0] : memref<32x32xbf16, #tpu.memory_space<vmem>>, vector<32x32xbf16>
    %c0_1 = arith.constant 0 : index
    %c0_2 = arith.constant 0 : index
    %c0_3 = arith.constant 0 : index
    %1 = vector.load %arg4[%c0_1, %c0_2, %c0_3] : memref<1x32x256xbf16, #tpu.memory_space<vmem>>, vector<1x32x256xbf16>
    %2 = vector.shape_cast %1 : vector<1x32x256xbf16> to vector<32x256xbf16>
    %cst = arith.constant dense<0.000000e+00> : vector<32x256xf32>
    %3 = tpu.matmul %0, %2, %cst {dimension_numbers = #tpu.dot_dimension_numbers<[1], [0], [0], [1], [0, 0, 1, 1], [], []>} : vector<32x32xbf16>, vector<32x256xbf16>, vector<32x256xf32> -> vector<32x256xf32>
    %c0_4 = arith.constant 0 : index
    %c0_5 = arith.constant 0 : index
    %c0_6 = arith.constant 0 : index
    %4 = vector.load %arg5[%c0_4, %c0_5, %c0_6] : memref<1x32x256xf32, #tpu.memory_space<vmem>>, vector<1x32x256xf32>
    %5 = vector.shape_cast %4 : vector<1x32x256xf32> to vector<32x256xf32>
    %6 = vector.shape_cast %3 : vector<32x256xf32> to vector<1x32x256xf32>
    tpu.vector_store %arg5[%c0_4, %c0_5, %c0_6], %6 {strides = array<i32>} : memref<1x32x256xf32, #tpu.memory_space<vmem>>, vector<1x32x256xf32>,
    return
  }
  func.func @transform_0(%arg0: i32, %arg1: i32, %arg2: i32) -> (i32, i32) {
    %c0_i32 = arith.constant 0 : i32
    %c0_i32_0 = arith.constant 0 : i32
    return %arg1, %c0_i32 : i32, i32
  }
  func.func @transform_1(%arg0: i32, %arg1: i32, %arg2: i32) -> (i32, i32, i32) {
    %c0_i32 = arith.constant 0 : i32
    %c0_i32_0 = arith.constant 0 : i32
    return %arg0, %c0_i32, %arg2 : i32, i32, i32
  }
  func.func @transform_2(%arg0: i32, %arg1: i32, %arg2: i32) -> (i32, i32, i32) {
    %c0_i32 = arith.constant 0 : i32
    return %arg0, %arg1, %arg2 : i32, i32, i32
  }
}

</mosaic_0001>

<bundles_post_ra>
// kernel: attention_forward.4
= control target key start
LH: loop header
LB: loop body
LE: loop exit
PB: predicated region body
PF: predicated region fallthrough
CT: control target
= control target key end

     0   :  { %s679_s9 = smov 0   ;;  %s681_s10 = smov 0   ;;  %s772_s0 = inlined_call_operand.vmem [shape: bf16[96,32], index: 0, kind: input, shape index: {}]   ;;  %s773_s1 = inlined_call_operand.vmem [shape: bf16[2,32,256], index: 1, kind: input, shape index: {}]   ;;  %s774_s2 = inlined_call_operand.vmem [shape: f32[2,96,256], index: 2, kind: output, shape index: {}]  }
   0x1   :  { %s683_s11 = smov 0  }
   0x2 LB: > { %s31_s12 = sadd.s32 1, %s658_s10  ;;  %p542_p0 = scmp.ge.s32.totalorder %s662_s11, 1  ;;  %s662_s11 = sphi %s683_s11, %s12_s11   ;;  %s658_s10 = sphi %s681_s10, %s776_s10   ;;  %s654_s9 = sphi %s679_s9, %s775_s9  }
   0x3   : > { %p33_p1 = scmp.ge.s32.totalorder %s31_s12, 2  ;;  %p153_p2 = scmp.lt.s32.totalorder %s662_s11, 3 }
   0x5   : > { %s778_s12 = smov (%p33_p1, %s31_s12), 0  ;;  %p154_p3 = pnand %p542_p0, %p153_p2 }
   0x6   : > { %p200_p4 = scmp.lt.s32.totalorder (!%p154_p3), %s654_s9, 1 }
   0x7   : > { %157 = sbr.rel (%p154_p3) target bundleno = 199 (0xc7), region = 28 }
   0xc   : > { %s780_s9 = smov (!%p200_p4, %s654_s9), 1  ;;  %v601_v12 = vld [vmem:[%s772_s0] sm:$0xff]  ;;  %v604_v13 = vld [vmem:[%s772_s0 + $0x18] sm:$0xff]  ;;  %vm292_vm0 = vcmask 261120   ;;  %v602_v14 = vld [vmem:[%s772_s0 + $0x8] sm:$0xff] }
   0xd   : > { %s600_s13 = sshll.u32 %s780_s9, 5  ;;  %v605_v15 = vld [vmem:[%s772_s0 + $0x20] sm:$0xff]  ;;  %v603_v16 = vld [vmem:[%s772_s0 + $0x10] sm:$0xff]  ;;  %v606_v17 = vld [vmem:[%s772_s0 + $0x28] sm:$0xff]  ;;  %s615_s29 = smul.u32 192, %s780_s9 }
   0xe   : > { %s207_s16 = scalar_lea.vmem %s773_s1, %s600_s13 }
   0xf   : > { %v580_v0 = vld [vmem:[%s207_s16 + $0x10] sm:$0xf]  ;;  %v610_v1 = vld [vmem:[%s207_s16 + $0x14] sm:$0xf0]  ;;  %v609_v2 = vld [vmem:[%s207_s16 + $0x14] sm:$0xf]  ;;  %s737_s4 = scalar_lea.vmem %s774_s2, %s615_s29 }
  0x10   : > { %v581_v3 = vor.u32 %v610_v1, %v580_v0  ;;  %v582_v4 = vld [vmem:[%s207_s16 + $0x18] sm:$0xf0]  ;;  %v572_v5 = vld [vmem:[%s207_s16] sm:$0xf]  ;;  %v608_v6 = vld [vmem:[%s207_s16 + $0x4] sm:$0xf0] }
  0x11   : > { %v585_v7 = vor.u32 %v609_v2, %v582_v4  ;;  %v607_v8 = vld [vmem:[%s207_s16 + $0x4] sm:$0xf]  ;;  %v574_v9 = vld [vmem:[%s207_s16 + $0x8] sm:$0xf0]  ;;  %v573_v10 = vor.u32 %v608_v6, %v572_v5 }
  0x12   : > { %317 = vmatpush.bf16.msra.mxu0 %v581_v3  ;;  %611 = vmatpush.bf16.msra.mxu2 %v581_v3  ;;  %v577_v11 = vor.u32 %v607_v8, %v574_v9 }
  0x13   : > { %356 = vmatpush.bf16.msra.mxu1 %v585_v7  ;;  %613 = vmatpush.bf16.msra.mxu3 %v585_v7 }
  0x16   : > { %318 = vmatpush.bf16.msra.mxu0 %v573_v10  ;;  %612 = vmatpush.bf16.msra.mxu2 %v573_v10 }
  0x17   : > { %357 = vmatpush.bf16.msra.mxu1 %v577_v11  ;;  %614 = vmatpush.bf16.msra.mxu3 %v577_v11 }
  0x19   : > { %586 = vmatmul.msk.bf16.vlgmr.msra.gmra.mxu0 %vm292_vm0, %v601_v12  ;;  %589 = vmatmul.msk.bf16.vlgmr.msra.gmra.mxu2 %vm292_vm0, %v604_v13 }
  0x1a   : > { %592 = vmatmul.msk.bf16.vlgmr.msra.gmra.mxu1 %vm292_vm0, %v601_v12  ;;  %595 = vmatmul.msk.bf16.vlgmr.msra.gmra.mxu3 %vm292_vm0, %v604_v13 }
  0x29   : > { %587 = vmatmul.msk.bf16.gmra.mxu0 %vm292_vm0, %v602_v14  ;;  %590 = vmatmul.msk.bf16.gmra.mxu2 %vm292_vm0, %v605_v15 }
  0x2a   : > { %593 = vmatmul.msk.bf16.gmra.mxu1 %vm292_vm0, %v602_v14  ;;  %596 = vmatmul.msk.bf16.gmra.mxu3 %vm292_vm0, %v605_v15 }
  0x39   : > { %588 = vmatmul.msk.bf16.gmra.mxu0 %vm292_vm0, %v603_v16  ;;  %591 = vmatmul.msk.bf16.gmra.mxu2 %vm292_vm0, %v606_v17 }
  0x3a   : > { %594 = vmatmul.msk.bf16.gmra.mxu1 %vm292_vm0, %v603_v16  ;;  %597 = vmatmul.msk.bf16.gmra.mxu3 %vm292_vm0, %v606_v17 }
  0x96   : > { %v320_v18 = vpop.f32.mrf.mxu0 }
  0x97   : > { %389 = vst [vmem:[%s737_s4] sm:$0xff] %v320_v18  ;;  %v359_v19 = vpop.f32.mrf.mxu1 }
  0x98   : > { %390 = vst [vmem:[%s737_s4 + $0x8] sm:$0xff] %v359_v19 }
  0x9c   : > { %v335_v20 = vpop.f32.mrf.mxu2 }
  0x9d   : > { %401 = vst [vmem:[%s737_s4 + $0x60] sm:$0xff] %v335_v20  ;;  %v374_v21 = vpop.f32.mrf.mxu3 }
  0x9e   : > { %402 = vst [vmem:[%s737_s4 + $0x68] sm:$0xff] %v374_v21  ;;  %v322_v22 = vpop.f32.mrf.mxu0 }
  0x9f   : > { %391 = vst [vmem:[%s737_s4 + $0x10] sm:$0xff] %v322_v22  ;;  %v361_v23 = vpop.f32.mrf.mxu1 }
  0xa0   : > { %392 = vst [vmem:[%s737_s4 + $0x18] sm:$0xff] %v361_v23 }
  0xa4   : > { %v337_v24 = vpop.f32.mrf.mxu2 }
  0xa5   : > { %403 = vst [vmem:[%s737_s4 + $0x70] sm:$0xff] %v337_v24  ;;  %v376_v25 = vpop.f32.mrf.mxu3 }
  0xa6   : > { %404 = vst [vmem:[%s737_s4 + $0x78] sm:$0xff] %v376_v25  ;;  %v325_v26 = vpop.f32.mrf.mxu0 }
  0xa7   : > { %393 = vst [vmem:[%s737_s4 + $0x20] sm:$0xff] %v325_v26  ;;  %v364_v27 = vpop.f32.mrf.mxu1 }
  0xa8   : > { %394 = vst [vmem:[%s737_s4 + $0x28] sm:$0xff] %v364_v27 }
  0xac   : > { %v340_v28 = vpop.f32.mrf.mxu2 }
  0xad   : > { %405 = vst [vmem:[%s737_s4 + $0x80] sm:$0xff] %v340_v28  ;;  %v379_v29 = vpop.f32.mrf.mxu3 }
  0xae   : > { %406 = vst [vmem:[%s737_s4 + $0x88] sm:$0xff] %v379_v29  ;;  %v327_v30 = vpop.f32.mrf.mxu0 }
  0xaf   : > { %395 = vst [vmem:[%s737_s4 + $0x30] sm:$0xff] %v327_v30  ;;  %v366_v31 = vpop.f32.mrf.mxu1 }
  0xb0   : > { %396 = vst [vmem:[%s737_s4 + $0x38] sm:$0xff] %v366_v31 }
  0xb4   : > { %v342_v32 = vpop.f32.mrf.mxu2 }
  0xb5   : > { %407 = vst [vmem:[%s737_s4 + $0x90] sm:$0xff] %v342_v32  ;;  %v381_v33 = vpop.f32.mrf.mxu3 }
  0xb6   : > { %408 = vst [vmem:[%s737_s4 + $0x98] sm:$0xff] %v381_v33  ;;  %v330_v34 = vpop.f32.mrf.mxu0 }
  0xb7   : > { %397 = vst [vmem:[%s737_s4 + $0x40] sm:$0xff] %v330_v34  ;;  %v369_v35 = vpop.f32.mrf.mxu1 }
  0xb8   : > { %398 = vst [vmem:[%s737_s4 + $0x48] sm:$0xff] %v369_v35 }
  0xbc   : > { %v345_v36 = vpop.f32.mrf.mxu2 }
  0xbd   : > { %409 = vst [vmem:[%s737_s4 + $0xa0] sm:$0xff] %v345_v36  ;;  %v384_v37 = vpop.f32.mrf.mxu3 }
  0xbe   : > { %410 = vst [vmem:[%s737_s4 + $0xa8] sm:$0xff] %v384_v37  ;;  %v332_v38 = vpop.f32.mrf.mxu0 }
  0xbf   : > { %399 = vst [vmem:[%s737_s4 + $0x50] sm:$0xff] %v332_v38  ;;  %v371_v39 = vpop.f32.mrf.mxu1 }
  0xc0   : > { %400 = vst [vmem:[%s737_s4 + $0x58] sm:$0xff] %v371_v39 }
  0xc4   : > { %v347_v40 = vpop.f32.mrf.mxu2 }
  0xc5   : > { %411 = vst [vmem:[%s737_s4 + $0xb0] sm:$0xff] %v347_v40  ;;  %v386_v41 = vpop.f32.mrf.mxu3 }
  0xc6   : > { %412 = vst [vmem:[%s737_s4 + $0xb8] sm:$0xff] %v386_v41 }
  0xc7 PF: > { %s12_s11 = sadd.s32 1, %s662_s11   ;;  %s775_s9 = smov %s658_s10 }
  0xc8   : > { %p9_p5 = scmp.ge.s32.totalorder %s12_s11, 4   ;;  %s776_s10 = smov %s778_s12 }
  0xca   :  { %11 = sbr.rel (!%p9_p5) target bundleno = 2 (0x2), region = 61 }

// kernel: attention_forward.7
= control target key start
LH: loop header
LB: loop body
LE: loop exit
PB: predicated region body
PF: predicated region fallthrough
CT: control target
= control target key end

     0   :  { %s556_s9 = smov 0   ;;  %s558_s10 = smov 0   ;;  %s599_s0 = inlined_call_operand.vmem [shape: bf16[32,32], index: 0, kind: input, shape index: {}]   ;;  %s600_s1 = inlined_call_operand.vmem [shape: bf16[2,32,256], index: 1, kind: input, shape index: {}]   ;;  %s601_s2 = inlined_call_operand.vmem [shape: f32[2,32,256], index: 2, kind: output, shape index: {}]  }
   0x1   :  { %s560_s11 = smov 0  }
   0x2 LB: > { %s31_s12 = sadd.s32 1, %s535_s10  ;;  %p446_p0 = scmp.ge.s32.totalorder %s539_s11, 1  ;;  %s539_s11 = sphi %s560_s11, %s12_s11   ;;  %s535_s10 = sphi %s558_s10, %s603_s10   ;;  %s531_s9 = sphi %s556_s9, %s602_s9  }
   0x3   : > { %p33_p1 = scmp.ge.s32.totalorder %s31_s12, 2  ;;  %p153_p2 = scmp.lt.s32.totalorder %s539_s11, 3 }
   0x5   : > { %s605_s12 = smov (%p33_p1, %s31_s12), 0  ;;  %p154_p3 = pnand %p446_p0, %p153_p2 }
   0x6   : > { %p200_p4 = scmp.lt.s32.totalorder (!%p154_p3), %s531_s9, 1 }
   0x7   : > { %157 = sbr.rel (%p154_p3) target bundleno = 167 (0xa7), region = 28 }
   0xc   : > { %s607_s9 = smov (!%p200_p4, %s531_s9), 1  ;;  %v483_v12 = vld [vmem:[%s599_s0] sm:$0xff]  ;;  %v484_v13 = vld [vmem:[%s599_s0 + $0x8] sm:$0xff]  ;;  %vm264_vm0 = vcmask 261120  }
   0xd   : > { %s481_s13 = sshll.u32 %s607_s9, 5  ;;  %s482_s21 = sshll.u32 %s607_s9, 6 }
   0xe   : > { %s207_s16 = scalar_lea.vmem %s600_s1, %s481_s13  ;;  %s222_s24 = scalar_lea.vmem %s601_s2, %s482_s21 }
   0xf   : > { %v469_v0 = vld [vmem:[%s207_s16 + $0x10] sm:$0xf]  ;;  %v488_v1 = vld [vmem:[%s207_s16 + $0x14] sm:$0xf0]  ;;  %v487_v2 = vld [vmem:[%s207_s16 + $0x14] sm:$0xf] }
  0x10   : > { %v470_v3 = vor.u32 %v488_v1, %v469_v0  ;;  %v471_v4 = vld [vmem:[%s207_s16 + $0x18] sm:$0xf0]  ;;  %v461_v5 = vld [vmem:[%s207_s16] sm:$0xf]  ;;  %v486_v6 = vld [vmem:[%s207_s16 + $0x4] sm:$0xf0] }
  0x11   : > { %v474_v7 = vor.u32 %v487_v2, %v471_v4  ;;  %v485_v8 = vld [vmem:[%s207_s16 + $0x4] sm:$0xf]  ;;  %v463_v9 = vld [vmem:[%s207_s16 + $0x8] sm:$0xf0]  ;;  %v462_v10 = vor.u32 %v486_v6, %v461_v5 }
  0x12   : > { %277 = vmatpush.bf16.msra.mxu0 %v470_v3  ;;  %489 = vmatpush.bf16.msra.mxu2 %v470_v3  ;;  %v466_v11 = vor.u32 %v485_v8, %v463_v9 }
  0x13   : > { %296 = vmatpush.bf16.msra.mxu1 %v474_v7  ;;  %491 = vmatpush.bf16.msra.mxu3 %v474_v7 }
  0x16   : > { %278 = vmatpush.bf16.msra.mxu0 %v462_v10  ;;  %490 = vmatpush.bf16.msra.mxu2 %v462_v10 }
  0x17   : > { %297 = vmatpush.bf16.msra.mxu1 %v466_v11  ;;  %492 = vmatpush.bf16.msra.mxu3 %v466_v11 }
  0x19   : > { %475 = vmatmul.msk.bf16.vlgmr.msra.gmra.mxu0 %vm264_vm0, %v483_v12  ;;  %476 = vmatmul.msk.bf16.vlgmr.msra.gmra.mxu2 %vm264_vm0, %v484_v13 }
  0x1a   : > { %477 = vmatmul.msk.bf16.vlgmr.msra.gmra.mxu1 %vm264_vm0, %v483_v12  ;;  %478 = vmatmul.msk.bf16.vlgmr.msra.gmra.mxu3 %vm264_vm0, %v484_v13 }
  0x96   : > { %v280_v14 = vpop.f32.mrf.mxu0 }
  0x97   : > { %309 = vst [vmem:[%s222_s24] sm:$0xff] %v280_v14  ;;  %v299_v15 = vpop.f32.mrf.mxu1 }
  0x98   : > { %310 = vst [vmem:[%s222_s24 + $0x8] sm:$0xff] %v299_v15 }
  0x9c   : > { %v285_v16 = vpop.f32.mrf.mxu2 }
  0x9d   : > { %313 = vst [vmem:[%s222_s24 + $0x20] sm:$0xff] %v285_v16  ;;  %v304_v17 = vpop.f32.mrf.mxu3 }
  0x9e   : > { %314 = vst [vmem:[%s222_s24 + $0x28] sm:$0xff] %v304_v17  ;;  %v282_v18 = vpop.f32.mrf.mxu0 }
  0x9f   : > { %311 = vst [vmem:[%s222_s24 + $0x10] sm:$0xff] %v282_v18  ;;  %v301_v19 = vpop.f32.mrf.mxu1 }
  0xa0   : > { %312 = vst [vmem:[%s222_s24 + $0x18] sm:$0xff] %v301_v19 }
  0xa4   : > { %v287_v20 = vpop.f32.mrf.mxu2 }
  0xa5   : > { %315 = vst [vmem:[%s222_s24 + $0x30] sm:$0xff] %v287_v20  ;;  %v306_v21 = vpop.f32.mrf.mxu3 }
  0xa6   : > { %316 = vst [vmem:[%s222_s24 + $0x38] sm:$0xff] %v306_v21 }
  0xa7 PF: > { %s12_s11 = sadd.s32 1, %s539_s11   ;;  %s602_s9 = smov %s535_s10 }
  0xa8   : > { %p9_p5 = scmp.ge.s32.totalorder %s12_s11, 4   ;;  %s603_s10 = smov %s605_s12 }
  0xaa   :  { %11 = sbr.rel (!%p9_p5) target bundleno = 2 (0x2), region = 61 }

// kernel: attention_forward.6
= control target key start
LH: loop header
LB: loop body
LE: loop exit
PB: predicated region body
PF: predicated region fallthrough
CT: control target
= control target key end

     0   :  { %8 = vsyncpa [#allocation3], 0  ;;  %s1723_s0 = inlined_call_operand.vmem [shape: f32[4], index: 0, kind: input, shape index: {}]   ;;  %s1724_s1 = inlined_call_operand.vmem [shape: f32[4], index: 1, kind: input, shape index: {}]   ;;  %s1725_s2 = inlined_call_operand.vmem [shape: f32[2,3,4,8,256], index: 2, kind: input, shape index: {}]   ;;  %s1726_s3 = inlined_call_operand.vmem [shape: f32[2,4,8,256], index: 3, kind: output, shape index: {}]  }
   0x1   :  { %9 = vsyncpa [#allocation5], 0  ;;  %s1369_s12 = smov 0   ;;  %s1371_s13 = smov 0  }
   0x2   :  { %s1373_s14 = smov 0   ;;  %s1375_s15 = smov 0  }
   0x3   :  { %s1377_s16 = smov 0   ;;  %s1379_s17 = smov 0  }
   0x4   :  { %s1381_s18 = smov 0  }
   0x5 LB: > { %s1118_s19 = sadd.s32 4294967295, %s1343_s18   ;;  %s24_s20 = sadd.s32 1, %s1335_s16  ;;  %s1343_s18 = sphi %s1381_s18, %s15_s18   ;;  %s1339_s17 = sphi %s1379_s17, %s1735_s17   ;;  %s1335_s16 = sphi %s1377_s16, %s1734_s16   ;;  %s1331_s15 = sphi %s1375_s15, %s1733_s15   ;;  %s1327_s14 = sphi %s1373_s14, %s1732_s14   ;;  %s1323_s13 = sphi %s1371_s13, %s1731_s13   ;;  %s1319_s12 = sphi %s1369_s12, %s1730_s12  }
   0x6   : > { %p25_p0 = scmp.ge.s32.totalorder %s24_s20, 4  ;;  %s27_s21 = sadd.s32 1, %s1339_s17 }
   0x7   : > { %s78_s22 = sadd.s32 1, %s1323_s13  ;;  %p85_p1 = scmp.ne.s32.totalorder %s1323_s13, %s1319_s12 }
   0x8   : > { %s1737_s20 = smov (%p25_p0, %s24_s20), 0  ;;  %s1739_s21 = smov (!%p25_p0, %s27_s21), %s1339_s17 }
   0x9   : > { %s74_s23 = ssub.s32 %s1335_s16, %s1737_s20  ;;  %p86_p2 = scmp.eq.s32.totalorder %s1343_s18, 0 }
   0xa   : > { %p29_p3 = scmp.ge.s32.totalorder %s1739_s21, 2  ;;  %p1120_p4 = scmp.ge.s32.totalorder %s1343_s18, 1 }
   0xb   : > { %p1417_p5 = por %p86_p2, %p85_p1  ;;  %p130_p6 = scmp.lt.s32.totalorder %s1343_s18, 9 }
   0xc   : > { %s1741_s21 = smov (%p29_p3, %s1739_s21), 0  ;;  %p1430_p8 = scmp.eq.s32.totalorder %s1118_s19, 0 }
   0xd   : > { %p1424_p7 = pnand %p1120_p4, %p130_p6  ;;  %s73_s26 = ssub.s32 %s1339_s17, %s1741_s21 }
   0xe   : > { %s75_s28 = sor.u32 %s74_s23, %s73_s26  ;;  %s142_s4 = sshll.u32 %s1723_s0, 4  ;;  %s143_s4 = int_to_ptr.vmem [resolvable:$true] %s142_s4 }
   0xf   : > { %p1162_p9 = pneg %p1424_p7  ;;  %p76_p10 = scmp.eq.s32.totalorder %s75_s28, 0 }
  0x10   : > { %s1345_s6 = smov [#allocation2]   ;;  %s152_s9 = sshll.u32 %s1724_s1, 4  ;;  %s153_s9 = int_to_ptr.vmem [resolvable:$true] %s152_s9 }
  0x11   : > { %p1163_p11 = pnand %p1430_p8, %p1162_p9  ;;  %s1346_s10 = smov [#allocation4]  }
  0x12   : > { %s1442_s5 = scalar_select %p76_p10, %s1323_s13, %s78_s22  }
  0x13   : > { %1165 = dma.vmem_to_smem (!%p1163_p11), %s143_s4, 16, %s1345_s6, [#allocation3]  }
  0x14   : > { %1168 = dma.vmem_to_smem (!%p1163_p11), %s153_s9, 16, %s1346_s10, [#allocation5]  }
  0x15   : > { %p1123_p12 = scmp.ge.s32.totalorder %s1343_s18, 8 }
  0x17   : > { %159 = sbr.rel (%p1123_p12) target bundleno = 42 (0x2a), region = 24 }
  0x1c   : > { %162 = sbr.rel (!%p1417_p5) target bundleno = 42 (0x2a), region = 28  ;;  %s164_s11 = sand.u32 (%p1417_p5), 1, %s1323_s13  }
  0x1d   : > { %s1151_s19 = smul.u32 (%p1417_p5), 48, %s164_s11  ;;  %s1124_s22 = sshll.u32 (%p1417_p5), %s1335_s16, 1 }
  0x1e   : > { %s1152_s23 = smul.u32 (%p1417_p5), 24, %s1339_s17 }
  0x1f   : > { %s166_s6 = scalar_lea.vmem (%p1417_p5), [#allocation6], %s1151_s19 }
  0x20   : > { %s169_s26 = sadd.s32 (%p1417_p5), %s1152_s23, %s1124_s22 }
  0x21   : > { %s1125_s28 = sshll.u32 %s169_s26, 3 }
  0x22   : > { %s171_s4 = scalar_lea.vmem %s1725_s2, %s1125_s28 }
  0x23   : > { %v184_v0 = vld [vmem:[%s171_s4] sm:$0xff]  ;;  %v186_v1 = vld [vmem:[%s171_s4 + $0x8] sm:$0xff] }
  0x24   : > { %v188_v2 = vld [vmem:[%s171_s4 + $0x40] sm:$0xff]  ;;  %185 = vst [vmem:[%s166_s6] sm:$0xff] %v184_v0  ;;  %v190_v3 = vld [vmem:[%s171_s4 + $0x48] sm:$0xff] }
  0x25   : > { %187 = vst [vmem:[%s166_s6 + $0x8] sm:$0xff] %v186_v1  ;;  %v192_v4 = vld [vmem:[%s171_s4 + $0x80] sm:$0xff]  ;;  %v194_v5 = vld [vmem:[%s171_s4 + $0x88] sm:$0xff] }
  0x26   : > { %189 = vst [vmem:[%s166_s6 + $0x10] sm:$0xff] %v188_v2 }
  0x27   : > { %191 = vst [vmem:[%s166_s6 + $0x18] sm:$0xff] %v190_v3 }
  0x28   : > { %193 = vst [vmem:[%s166_s6 + $0x20] sm:$0xff] %v192_v4 }
  0x29   : > { %195 = vst [vmem:[%s166_s6 + $0x28] sm:$0xff] %v194_v5 }
  0x2a PF: > { %204 = sbr.rel (%p1424_p7) target bundleno = 1190 (0x4a6), region = 51 }
  0x2f   : > { %1310 = dma.done.wait (%p1430_p8), [#allocation3], 16  }
  0x30   : > { %1312 = vsyncadd (%p1430_p8), [#allocation3], 4294967280 }
  0x31   : > { %1314 = dma.done.wait (%p1430_p8), [#allocation5], 16  }
  0x32   : > { %1316 = vsyncadd (%p1430_p8), [#allocation5], 4294967280  ;;  %s217_s24 = sand.u32 1, %s1319_s12  }
  0x33   : > { %s1153_s7 = smul.u32 48, %s217_s24 }
  0x35   : > { %s1467_s8 = scalar_lea.vmem [#allocation6], %s1153_s7 }
  0x36   : > { %223 = sfence }
  0x37   : > { %v1132_v6 = vld [vmem:[%s1467_s8 + $0x10] sm:$0xff]  ;;  %v1133_v7 = vld [vmem:[%s1467_s8 + $0x18] sm:$0xff]  ;;  %v254_v10 = vld [vmem:[%s1467_s8] sm:$0xff]  ;;  %v350_v16 = vlaneseq  ;;  %s338_s12 = sld [smem:[#allocation4 + %s1327_s14]]  ;;  %vm445_vm6 = vcmask 64512   ;;  %v1347_v57 = vmov 0.0  }
  0x38   : > { %v280_v8 = vmul.f32 %v1132_v6, %v1132_v6  ;;  %v281_v9 = vmul.f32 %v1133_v7, %v1133_v7  ;;  %v255_v11 = vld [vmem:[%s1467_s8 + $0x8] sm:$0xff]  ;;  %v262_v13 = vmul.f32 %v254_v10, %v254_v10  ;;  %s618_s25 = sld [smem:[#allocation2]]  ;;  %p245_p13 = scmp.lt.s32.totalorder %s1331_s15, 1 }
  0x39   : > { %v263_v14 = vmul.f32 %v255_v11, %v255_v11  ;;  %v351_v19 = vshrl.u32 %v350_v16, 7  ;;  %s1144_s27 = sld [smem:[#allocation2 + $0x1]]  ;;  %p247_p0 = scmp.lt.s32.totalorder %s1327_s14, 3 }
  0x3a   : > { %v282_v12 = vadd.f32 %v281_v9, %v280_v8  ;;  %s1145_s9 = sld [smem:[#allocation2 + $0x2]]  ;;  %s1743_s15 = smov (!%p245_p13, %s1331_s15), 1 }
  0x3b   : > { %v264_v15 = vadd.f32 %v263_v14, %v262_v13  ;;  %1234 = vset.pattern.permute.xlu2 %v351_v19  ;;  %1233 = vset.pattern.permute.xlu1 %v351_v19  ;;  %s1146_s10 = sld [smem:[#allocation2 + $0x3]]  ;;  %s1745_s14 = smov (!%p247_p0, %s1327_s14), 3 }
  0x3c   : > { %283 = vadd.xlane.f32.xlu0 %v282_v12  ;;  %s1129_s11 = sshll.u32 %s1745_s14, 1  ;;  %s1130_s19 = sshll.u32 %s1743_s15, 3 }
  0x3d   : > { %1235 = vset.pattern.permute.xlu0 %v351_v19  ;;  %v339_v42 = vstv %s338_s12  ;;  %s251_s22 = sadd.s32 %s1130_s19, %s1129_s11 }
  0x3e   : > { %s1131_s23 = sshll.u32 %s251_s22, 3 }
  0x3f   : > { %s253_s29 = scalar_lea.vmem %s1726_s3, %s1131_s23 }
  0x44   : > { %265 = vadd.xlane.f32.xlu0 %v264_v15 }
  0xaf   : > { %v284_v17 = vpop.xlane.xlu0 %283 }
  0xb0   : > { %v285_v18 = vmax.f32 %v284_v17, 1e-24 }
  0xb2   : > { %1239 = vrsqrt.f32 %v285_v18  ;;  %vm292_vm1 = vweird.f32 %v285_v18 }
  0xb7   : > { %v266_v20 = vpop.xlane.xlu0 %265 }
  0xb8   : > { %v1240_v21 = vpop.eup %1239  ;;  %v267_v22 = vmax.f32 %v266_v20, 1e-24 }
  0xb9   : > { %v287_v23 = vmul.f32 %v1240_v21, %v285_v18  ;;  %vm293_vm0 = vweird.f32 %v1240_v21 }
  0xba   : > { %1241 = vrsqrt.f32 %v267_v22  ;;  %vm294_vm2 = vmor %vm292_vm1, %vm293_vm0  ;;  %vm274_vm4 = vweird.f32 %v267_v22 }
  0xbb   : > { %v288_v24 = vmul.f32 %v1240_v21, %v287_v23 }
  0xbd   : > { %v289_v25 = vmul.f32 0.5, %v288_v24 }
  0xbf   : > { %v290_v26 = vsub.f32 1.5, %v289_v25 }
  0xc0   : > { %v1242_v27 = vpop.eup %1241 }
  0xc1   : > { %v269_v28 = vmul.f32 %v1242_v27, %v267_v22  ;;  %v291_v29 = vmul.f32 %v1240_v21, %v290_v26  ;;  %vm275_vm3 = vweird.f32 %v1242_v27 }
  0xc2   : > { %vm276_vm5 = vmor %vm274_vm4, %vm275_vm3 }
  0xc3   : > { %v270_v30 = vmul.f32 %v1242_v27, %v269_v28  ;;  %v295_v31 = vsel %vm294_vm2, %v1240_v21, %v291_v29 }
  0xc4   : > { %v296_v32 = vmul.f32 %v1132_v6, %v295_v31  ;;  %v297_v33 = vmul.f32 %v1133_v7, %v295_v31 }
  0xc5   : > { %v271_v34 = vmul.f32 0.5, %v270_v30 }
  0xc6   : > { %313 = vmatpush.xpose.msra.mxu0 %v296_v32  ;;  %333 = vmatpush.xpose.msra.mxu1 %v297_v33 }
  0xc7   : > { %v272_v35 = vsub.f32 1.5, %v271_v34 }
  0xc9   : > { %v273_v36 = vmul.f32 %v1242_v27, %v272_v35 }
  0xcb   : > { %v277_v37 = vsel %vm276_vm5, %v1242_v27, %v273_v36 }
  0xcc   : > { %v278_v38 = vmul.f32 %v277_v37, %v254_v10  ;;  %v279_v39 = vmul.f32 %v277_v37, %v255_v11 }
  0xce   : > { %314 = vmatmul.f32.vlgmr.msra.gmra.mxu0 %v278_v38  ;;  %334 = vmatmul.f32.vlgmr.msra.gmra.mxu1 %v279_v39 }
 0x14b   : > { %v315_v40 = vpop.f32.mrf.mxu0  ;;  %v335_v41 = vpop.f32.mrf.mxu1 }
 0x14c   : > { %v336_v43 = vadd.f32 %v335_v41, %v315_v40 }
 0x14e   : > { %v1475_v44 = vmul.f32 %v339_v42, %v336_v43  ;;  %v1348_v42 = vmov 0  }
 0x150   : > { %v470_v45 = vsel %vm445_vm6, %v1475_v44, -inf  ;;  %v363_v46 = vperm.slane %v1475_v44, 2  ;;  %v349_v47 = vperm.slane %v1475_v44, 0  ;;  %v370_v48 = vperm.slane %v1475_v44, 3 }
 0x151   : > { %471 = vmax.xlane.f32.xlu0 %v470_v45  ;;  %v356_v49 = vperm.slane %v1475_v44, 1  ;;  %v384_v50 = vperm.slane %v1475_v44, 5  ;;  %v377_v51 = vperm.slane %v1475_v44, 4  ;;  %v391_v52 = vperm.slane %v1475_v44, 6 }
 0x152   : > { %368 = vperm.xlu2 %1234, %v363_v46   ;;  %354 = vperm.xlu1 %1233, %v349_v47   ;;  %v398_v53 = vperm.slane %v1475_v44, 7  ;;  %v343_v54 = vrot.slane %v1475_v44, 2  ;;  %v346_v61 = vrot.slane %v1475_v44, 5  ;;  %v344_v2 = vrot.slane %v1475_v44, 3 }
 0x153   : > { %v342_v7 = vrot.slane %v1475_v44, 1  ;;  %v345_v15 = vrot.slane %v1475_v44, 4  ;;  %v347_v17 = vrot.slane %v1475_v44, 6  ;;  %v348_v25 = vrot.slane %v1475_v44, 7 }
 0x154   : > { %v407_v55 = vperm.slane %v343_v54, 0  ;;  %v410_v62 = vperm.slane %v346_v61, 0  ;;  %v408_v5 = vperm.slane %v344_v2, 0 }
 0x155   : > { %v406_v8 = vperm.slane %v342_v7, 0  ;;  %v409_v18 = vperm.slane %v345_v15, 0  ;;  %v411_v21 = vperm.slane %v347_v17, 0  ;;  %v412_v29 = vperm.slane %v348_v25, 0 }
 0x15a   : > { %375 = vperm.xlu2 %1234, %v370_v48   ;;  %361 = vperm.xlu1 %1233, %v356_v49  }
 0x162   : > { %389 = vperm.xlu2 %1234, %v384_v50   ;;  %382 = vperm.xlu1 %1233, %v377_v51  }
 0x165   : > { %396 = vperm.xlu0 %1235, %v391_v52  }
 0x16a   : > { %403 = vperm.xlu1 %1233, %v398_v53  }
 0x1ac   : > { %v369_v56 = vpop.permute.xlu2 %368 }
 0x1ad   : > { %vm423_vm7 = vcmp.gt.f32.partialorder %v407_v55, %v369_v56 }
 0x1ae   : > { %v1138_v58 = vsel %vm423_vm7, 1.0, %v1347_v57 }
 0x1af   : > { %v452_v59 = vsel %vm445_vm6, %v1138_v58, 0.0 }
 0x1b0   : > { %453 = vadd.xlane.f32.xlu0 %v452_v59 }
 0x1b4   : > { %v376_v60 = vpop.permute.xlu2 %375 }
 0x1b5   : > { %vm424_vm10 = vcmp.gt.f32.partialorder %v408_v5, %v376_v60 }
 0x1b6   : > { %v1139_v10 = vsel %vm424_vm10, 1.0, %v1347_v57 }
 0x1b7   : > { %v455_v13 = vsel %vm445_vm6, %v1139_v10, 0.0 }
 0x1bc   : > { %v390_v63 = vpop.permute.xlu2 %389 }
 0x1bd   : > { %vm426_vm8 = vcmp.gt.f32.partialorder %v410_v62, %v390_v63 }
 0x1be   : > { %v1141_v0 = vsel %vm426_vm8, 1.0, %v1347_v57 }
 0x1bf   : > { %v461_v1 = vsel %vm445_vm6, %v1141_v0, 0.0 }
 0x1c0   : > { %462 = vadd.xlane.f32.xlu0 %v461_v1 }
 0x1c4   : > { %v355_v3 = vpop.permute.xlu1 %354  ;;  %v472_v12 = vpop.xlane.xlu0 %471 }
 0x1c5   : > { %vm421_vm9 = vcmp.gt.f32.partialorder %v349_v47, %v355_v3  ;;  %v473_v20 = vsub.f32 %v1475_v44, %v472_v12 }
 0x1c6   : > { %v1136_v4 = vsel %vm421_vm9, 1.0, %v1347_v57 }
 0x1c7   : > { %v446_v6 = vsel %vm445_vm6, %v1136_v4, 0.0  ;;  %v474_v27 = vmul.f32 1.442695, %v473_v20 }
 0x1c8   : > { %447 = vadd.xlane.f32.xlu2 %v446_v6 }
 0x1c9   : > { %1243 = vpow2.f32 %v474_v27 }
 0x1cc   : > { %v362_v9 = vpop.permute.xlu1 %361 }
 0x1cd   : > { %vm422_vm11 = vcmp.gt.f32.partialorder %v406_v8, %v362_v9 }
 0x1ce   : > { %v1137_v11 = vsel %vm422_vm11, 1.0, %v1347_v57 }
 0x1cf   : > { %v449_v14 = vsel %vm445_vm6, %v1137_v11, 0.0  ;;  %v1244_v33 = vpop.eup %1243 }
 0x1d0   : > { %456 = vadd.xlane.f32.xlu2 %v455_v13  ;;  %450 = vadd.xlane.f32.xlu1 %v449_v14  ;;  %v492_v34 = vperm.slane %v1244_v33, 1  ;;  %v485_v35 = vperm.slane %v1244_v33, 0  ;;  %v499_v36 = vperm.slane %v1244_v33, 2  ;;  %v527_v37 = vperm.slane %v1244_v33, 6 }
 0x1d1   : > { %v506_v38 = vperm.slane %v1244_v33, 3  ;;  %v513_v39 = vperm.slane %v1244_v33, 4  ;;  %v520_v40 = vperm.slane %v1244_v33, 5  ;;  %v534_v41 = vperm.slane %v1244_v33, 7 }
 0x1d4   : > { %v383_v19 = vpop.permute.xlu1 %382 }
 0x1d5   : > { %vm425_vm12 = vcmp.gt.f32.partialorder %v409_v18, %v383_v19 }
 0x1d6   : > { %v1140_v22 = vsel %vm425_vm12, 1.0, %v1347_v57 }
 0x1d7   : > { %v397_v23 = vpop.permute.xlu0 %396  ;;  %v458_v24 = vsel %vm445_vm6, %v1140_v22, 0.0 }
 0x1d8   : > { %vm427_vm13 = vcmp.gt.f32.partialorder %v411_v21, %v397_v23  ;;  %459 = vadd.xlane.f32.xlu2 %v458_v24 }
 0x1d9   : > { %v1142_v26 = vsel %vm427_vm13, 1.0, %v1347_v57 }
 0x1da   : > { %v464_v28 = vsel %vm445_vm6, %v1142_v26, 0.0 }
 0x1db   : > { %465 = vadd.xlane.f32.xlu0 %v464_v28  ;;  %v1593_v28 = vand.u32 127, %v350_v16 }
 0x1dc   : > { %v404_v30 = vpop.permute.xlu1 %403 }
 0x1dd   : > { %vm428_vm14 = vcmp.gt.f32.partialorder %v412_v29, %v404_v30 }
 0x1de   : > { %v1143_v31 = vsel %vm428_vm14, 1.0, %v1347_v57 }
 0x1df   : > { %v467_v32 = vsel %vm445_vm6, %v1143_v31, 0.0 }
 0x1e3   : > { %468 = vadd.xlane.f32.xlu0 %v467_v32 }
 0x1e9   : > { %497 = vperm.xlu1 %1233, %v492_v34  }
 0x1f0   : > { %490 = vperm.xlu2 %1234, %v485_v35  }
 0x1f1   : > { %504 = vperm.xlu1 %1233, %v499_v36  }
 0x1f7   : > { %532 = vperm.xlu0 %1235, %v527_v37  }
 0x1f8   : > { %1236 = vset.pattern.permute.xlu2 %v1348_v42 }
 0x1f9   : > { %511 = vperm.xlu1 %1233, %v506_v38  }
 0x1ff   : > { %1238 = vset.pattern.permute.xlu0 %v1348_v42 }
 0x201   : > { %518 = vperm.xlu1 %1233, %v513_v39  }
 0x209   : > { %525 = vperm.xlu1 %1233, %v520_v40  }
 0x211   : > { %539 = vperm.xlu1 %1233, %v534_v41  }
 0x219   : > { %1237 = vset.pattern.permute.xlu1 %v1348_v42 }
 0x223   : > { %v454_v52 = vpop.xlane.xlu0 %453 }
 0x224   : > { %vm663_vm3 = vcmp.lt.f32.partialorder %v454_v52, 5.0  ;;  %vm478_vm5 = vcmp.lt.f32.partialorder %v454_v52, 4.0  ;;  %vm774_vm14 = vcmp.lt.f32.partialorder %v454_v52, 6.0 }
 0x233   : > { %v1522_v56 = vpop.xlane.xlu0 %462 }
 0x234   : > { %vm666_vm12 = vcmp.lt.f32.partialorder %v1522_v56, 5.0  ;;  %vm481_vm13 = vcmp.lt.f32.partialorder %v1522_v56, 4.0 }
 0x23b   : > { %v448_v43 = vpop.xlane.xlu2 %447 }
 0x23c   : > { %vm476_vm15 = vcmp.lt.f32.partialorder %v448_v43, 4.0  ;;  %vm661_vm2 = vcmp.lt.f32.partialorder %v448_v43, 5.0  ;;  %vm772_vm4 = vcmp.lt.f32.partialorder %v448_v43, 6.0 }
 0x243   : > { %v1503_v44 = vpop.xlane.xlu2 %456  ;;  %v451_v46 = vpop.xlane.xlu1 %450 }
 0x244   : > { %vm662_vm0 = vcmp.lt.f32.partialorder %v451_v46, 5.0  ;;  %vm477_vm1 = vcmp.lt.f32.partialorder %v451_v46, 4.0  ;;  %vm664_vm7 = vcmp.lt.f32.partialorder %v1503_v44, 5.0  ;;  %vm479_vm8 = vcmp.lt.f32.partialorder %v1503_v44, 4.0 }
 0x245   : > { %vm773_vm11 = vcmp.lt.f32.partialorder %v451_v46, 6.0 }
 0x24b   : > { %v1505_v45 = vpop.xlane.xlu2 %459 }
 0x24c   : > { %vm665_vm9 = vcmp.lt.f32.partialorder %v1505_v45, 5.0  ;;  %vm480_vm10 = vcmp.lt.f32.partialorder %v1505_v45, 4.0 }
 0x24e   : > { %v466_v61 = vpop.xlane.xlu0 %465 }
 0x253   : > { %v491_v47 = vpop.permute.xlu2 %490 }
 0x254   : > { %v1507_v48 = vsel %vm476_vm15, %v491_v47, 0.0  ;;  %v1516_v54 = vsel %vm661_vm2, %v491_v47, 0.0  ;;  %v1525_v58 = vsel %vm772_vm4, %v491_v47, 0.0  ;;  %vm667_vm15 = vcmp.lt.f32.partialorder %v466_v61, 5.0 }
 0x255   : > { %566 = vperm.xlu2 %1236, %v1507_v48   ;;  %vm776_vm4 = vcmp.lt.f32.partialorder %v1505_v45, 6.0 }
 0x256   : > { %v469_v2 = vpop.xlane.xlu0 %468 }
 0x257   : > { %vm668_vm2 = vcmp.lt.f32.partialorder %v469_v2, 5.0 }
 0x25b   : > { %v498_v49 = vpop.permute.xlu1 %497 }
 0x25c   : > { %v1510_v50 = vsel %vm662_vm0, %v498_v49, 0.0  ;;  %v1512_v51 = vsel %vm477_vm1, %v498_v49, 0.0  ;;  %v1548_v4 = vsel %vm773_vm11, %v498_v49, 0.0  ;;  %vm482_vm0 = vcmp.lt.f32.partialorder %v466_v61, 4.0 }
 0x25d   : > { %689 = vperm.xlu0 %1238, %v1510_v50   ;;  %569 = vperm.xlu1 %1237, %v1512_v51   ;;  %vm775_vm1 = vcmp.lt.f32.partialorder %v1503_v44, 6.0  ;;  %vm603_vm11 = vcmask 1043459  }
 0x263   : > { %v505_v53 = vpop.permute.xlu1 %504 }
 0x264   : > { %v1518_v55 = vsel %vm663_vm3, %v505_v53, 0.0  ;;  %v1527_v59 = vsel %vm478_vm5, %v505_v53, 0.0  ;;  %v1557_v8 = vsel %vm774_vm14, %v505_v53, 0.0  ;;  %vm483_vm3 = vcmp.lt.f32.partialorder %v469_v2, 4.0 }
 0x265   : > { %686 = vperm.xlu1 %1237, %v1516_v54   ;;  %692 = vperm.xlu2 %1236, %v1518_v55   ;;  %vm779_vm5 = vcmp.lt.f32.partialorder %v469_v2, 6.0  ;;  %vm609_vm14 = vcmask 1046534  }
 0x269   : > { %v533_v7 = vpop.permute.xlu0 %532 }
 0x26a   : > { %v1559_v9 = vsel %vm667_vm15, %v533_v7, 0.0  ;;  %v1563_v10 = vsel %vm482_vm0, %v533_v7, 0.0  ;;  %vm611_vm15 = vcmask 1047559  }
 0x26b   : > { %v512_v57 = vpop.permute.xlu1 %511 }
 0x26c   : > { %v1529_v60 = vsel %vm664_vm7, %v512_v57, 0.0  ;;  %v1537_v63 = vsel %vm479_vm8, %v512_v57, 0.0  ;;  %v1567_v12 = vsel %vm775_vm1, %v512_v57, 0.0  ;;  %vm778_vm7 = vcmp.lt.f32.partialorder %v466_v61, 6.0 }
 0x26d   : > { %797 = vperm.xlu2 %1236, %v1525_v58   ;;  %572 = vperm.xlu1 %1237, %v1527_v59   ;;  %v1583_v18 = vsel %vm778_vm7, %v533_v7, 0.0  ;;  %vm777_vm8 = vcmp.lt.f32.partialorder %v1522_v56, 6.0 }
 0x26e   : > { %695 = vperm.xlu0 %1238, %v1529_v60  }
 0x273   : > { %v519_v62 = vpop.permute.xlu1 %518 }
 0x274   : > { %v1539_v0 = vsel %vm665_vm9, %v519_v62, 0.0  ;;  %v1541_v1 = vsel %vm480_vm10, %v519_v62, 0.0  ;;  %v1577_v15 = vsel %vm776_vm4, %v519_v62, 0.0  ;;  %vm599_vm9 = vcmask 1041409  }
 0x275   : > { %575 = vperm.xlu1 %1237, %v1537_v63   ;;  %698 = vperm.xlu2 %1236, %v1539_v0   ;;  %vm601_vm10 = vcmask 1042434  }
 0x276   : > { %578 = vperm.xlu0 %1238, %v1541_v1  }
 0x27b   : > { %v526_v3 = vpop.permute.xlu1 %525 }
 0x27c   : > { %v1550_v5 = vsel %vm666_vm12, %v526_v3, 0.0  ;;  %v1552_v6 = vsel %vm481_vm13, %v526_v3, 0.0  ;;  %v1587_v19 = vsel %vm777_vm8, %v526_v3, 0.0  ;;  %vm605_vm12 = vcmask 1044484  }
 0x27d   : > { %800 = vperm.xlu1 %1237, %v1548_v4   ;;  %701 = vperm.xlu2 %1236, %v1550_v5   ;;  %vm607_vm13 = vcmask 1045509  }
 0x27e   : > { %581 = vperm.xlu0 %1238, %v1552_v6  }
 0x283   : > { %v540_v11 = vpop.permute.xlu1 %539 }
 0x284   : > { %v1569_v13 = vsel %vm668_vm2, %v540_v11, 0.0  ;;  %v1573_v14 = vsel %vm483_vm3, %v540_v11, 0.0  ;;  %v1579_v17 = vsel %vm779_vm5, %v540_v11, 0.0 }
 0x285   : > { %803 = vperm.xlu1 %1237, %v1557_v8   ;;  %704 = vperm.xlu2 %1236, %v1559_v9  }
 0x286   : > { %584 = vperm.xlu0 %1238, %v1563_v10  }
 0x28d   : > { %806 = vperm.xlu1 %1237, %v1567_v12   ;;  %707 = vperm.xlu2 %1236, %v1569_v13  }
 0x28e   : > { %587 = vperm.xlu0 %1238, %v1573_v14  }
 0x295   : > { %809 = vperm.xlu1 %1237, %v1577_v15   ;;  %818 = vperm.xlu2 %1236, %v1579_v17  }
 0x296   : > { %815 = vperm.xlu0 %1238, %v1583_v18  }
 0x29d   : > { %812 = vperm.xlu1 %1237, %v1587_v19  }
 0x2af   : > { %v567_v20 = vpop.permute.xlu2 %566 }
 0x2b0   : > { %v591_v3 = vperm.slane %v567_v20, %v1593_v28 }
 0x2bf   : > { %v693_v21 = vpop.permute.xlu2 %692 }
 0x2c0   : > { %v711_v33 = vperm.slane %v693_v21, %v1593_v28 }
 0x2c7   : > { %v1590_v22 = vpop.permute.xlu2 %797 }
 0x2cf   : > { %v699_v23 = vpop.permute.xlu2 %698  ;;  %v570_v24 = vpop.permute.xlu1 %569 }
 0x2d0   : > { %v690_v26 = vpop.permute.xlu0 %689  ;;  %v713_v16 = vperm.slane %v699_v23, %v1593_v28  ;;  %v592_v57 = vperm.slane %v570_v24, %v1593_v28 }
 0x2d1   : > { %v710_v30 = vperm.slane %v690_v26, %v1593_v28 }
 0x2d2   : > { %v600_v11 = vsel %vm599_vm9, %v592_v57, %v591_v3 }
 0x2d7   : > { %v702_v25 = vpop.permute.xlu2 %701  ;;  %v687_v27 = vpop.permute.xlu1 %686 }
 0x2d8   : > { %v709_v29 = vperm.slane %v687_v27, %v1593_v28  ;;  %v714_v39 = vperm.slane %v702_v25, %v1593_v28 }
 0x2da   : > { %v717_v31 = vsel %vm599_vm9, %v710_v30, %v709_v29 }
 0x2db   : > { %v718_v37 = vsel %vm601_vm10, %v711_v33, %v717_v31 }
 0x2df   : > { %v705_v32 = vpop.permute.xlu2 %704  ;;  %v573_v35 = vpop.permute.xlu1 %572 }
 0x2e0   : > { %v696_v34 = vpop.permute.xlu0 %695  ;;  %v715_v42 = vperm.slane %v705_v32, %v1593_v28  ;;  %v593_v61 = vperm.slane %v573_v35, %v1593_v28 }
 0x2e1   : > { %v712_v36 = vperm.slane %v696_v34, %v1593_v28 }
 0x2e2   : > { %v602_v21 = vsel %vm601_vm10, %v593_v61, %v600_v11 }
 0x2e3   : > { %v719_v38 = vsel %vm603_vm11, %v712_v36, %v718_v37  ;;  %v820_v37 = vperm.slane %v1590_v22, %v1593_v28 }
 0x2e4   : > { %v720_v40 = vsel %vm605_vm12, %v713_v16, %v719_v38 }
 0x2e5   : > { %v721_v41 = vsel %vm607_vm13, %v714_v39, %v720_v40 }
 0x2e6   : > { %v722_v47 = vsel %vm609_vm14, %v715_v42, %v721_v41 }
 0x2e7   : > { %v708_v43 = vpop.permute.xlu2 %707  ;;  %v576_v46 = vpop.permute.xlu1 %575 }
 0x2e8   : > { %v579_v44 = vpop.permute.xlu0 %578  ;;  %v716_v45 = vperm.slane %v708_v43, %v1593_v28  ;;  %v594_v7 = vperm.slane %v576_v46, %v1593_v28 }
 0x2e9   : > { %v595_v23 = vperm.slane %v579_v44, %v1593_v28 }
 0x2ea   : > { %v723_v49 = vsel %vm611_vm15, %v716_v45, %v722_v47  ;;  %v604_v25 = vsel %vm603_vm11, %v594_v7, %v602_v21 }
 0x2eb   : > { %v725_v52 = vsel %vm445_vm6, %v723_v49, 0.0  ;;  %v606_v27 = vsel %vm605_vm12, %v595_v23, %v604_v25 }
 0x2ec   : > { %726 = vadd.xlane.f32.xlu0 %v725_v52 }
 0x2ef   : > { %v801_v56 = vpop.permute.xlu1 %800  ;;  %v819_v42 = vpop.permute.xlu2 %818 }
 0x2f0   : > { %v582_v53 = vpop.permute.xlu0 %581  ;;  %v821_v36 = vperm.slane %v801_v56, %v1593_v28  ;;  %v827_v22 = vperm.slane %v819_v42, %v1593_v28 }
 0x2f1   : > { %v596_v26 = vperm.slane %v582_v53, %v1593_v28 }
 0x2f2   : > { %v828_v40 = vsel %vm599_vm9, %v821_v36, %v820_v37 }
 0x2f3   : > { %v608_v20 = vsel %vm607_vm13, %v596_v26, %v606_v27 }
 0x2f7   : > { %v804_v2 = vpop.permute.xlu1 %803 }
 0x2f8   : > { %v585_v62 = vpop.permute.xlu0 %584  ;;  %v822_v16 = vperm.slane %v804_v2, %v1593_v28  ;;  %v730_v2 = vstv %s1144_s27 }
 0x2f9   : > { %v597_v24 = vperm.slane %v585_v62, %v1593_v28  ;;  %v619_v62 = vstv %s618_s25  ;;  %v732_v11 = vmul.f32 %v730_v2, %v1510_v50  ;;  %v731_v23 = vmul.f32 %v730_v2, %v1516_v54 }
 0x2fa   : > { %v829_v43 = vsel %vm601_vm10, %v822_v16, %v828_v40  ;;  %v620_v7 = vmul.f32 %v619_v62, %v1507_v48  ;;  %v621_v21 = vmul.f32 %v619_v62, %v1512_v51  ;;  %v733_v25 = vmul.f32 %v730_v2, %v1518_v55 }
 0x2fb   : > { %v610_v32 = vsel %vm609_vm14, %v597_v24, %v608_v20  ;;  %v622_v24 = vmul.f32 %v619_v62, %v1527_v59  ;;  %v737_v27 = vmul.f32 %v730_v2, %v1559_v9  ;;  %v734_v54 = vmul.f32 %v730_v2, %v1529_v60 }
 0x2fc   : > { %v623_v55 = vmul.f32 %v619_v62, %v1537_v63  ;;  %v736_v59 = vmul.f32 %v730_v2, %v1550_v5  ;;  %v624_v9 = vmul.f32 %v619_v62, %v1541_v1  ;;  %v627_v36 = vmul.f32 %v619_v62, %v1573_v14 }
 0x2ff   : > { %v807_v30 = vpop.permute.xlu1 %806 }
 0x300   : > { %v588_v29 = vpop.permute.xlu0 %587  ;;  %v823_v38 = vperm.slane %v807_v30, %v1593_v28 }
 0x301   : > { %v598_v31 = vperm.slane %v588_v29, %v1593_v28  ;;  %v626_v29 = vmul.f32 %v619_v62, %v1563_v10  ;;  %v625_v10 = vmul.f32 %v619_v62, %v1552_v6 }
 0x302   : > { %v830_v45 = vsel %vm603_vm11, %v823_v38, %v829_v43 }
 0x303   : > { %v612_v33 = vsel %vm611_vm15, %v598_v31, %v610_v32 }
 0x304   : > { %v614_v34 = vsel %vm445_vm6, %v612_v33, 0.0 }
 0x305   : > { %615 = vadd.xlane.f32.xlu1 %v614_v34  ;;  %v735_v34 = vmul.f32 %v730_v2, %v1539_v0 }
 0x307   : > { %v810_v35 = vpop.permute.xlu1 %809 }
 0x308   : > { %v824_v39 = vperm.slane %v810_v35, %v1593_v28  ;;  %v816_v41 = vpop.permute.xlu0 %815  ;;  %v738_v35 = vmul.f32 %v730_v2, %v1569_v13 }
 0x309   : > { %v826_v47 = vperm.slane %v816_v41, %v1593_v28 }
 0x30a   : > { %v831_v49 = vsel %vm605_vm12, %v824_v39, %v830_v45 }
 0x30f   : > { %v813_v44 = vpop.permute.xlu1 %812 }
 0x310   : > { %v825_v46 = vperm.slane %v813_v44, %v1593_v28 }
 0x312   : > { %v832_v52 = vsel %vm607_vm13, %v825_v46, %v831_v49 }
 0x313   : > { %v833_v53 = vsel %vm609_vm14, %v826_v47, %v832_v52 }
 0x314   : > { %v834_v56 = vsel %vm611_vm15, %v827_v22, %v833_v53 }
 0x315   : > { %v836_v57 = vsel %vm445_vm6, %v834_v56, 0.0 }
 0x316   : > { %837 = vadd.xlane.f32.xlu2 %v836_v57 }
 0x35f   : > { %v727_v61 = vpop.xlane.xlu0 %726 }
 0x360   : > { %1245 = vrcp.f32 %v727_v61 }
 0x366   : > { %v1246_v3 = vpop.eup %1245 }
 0x367   : > { %v742_v30 = vperm.slane %v1246_v3, 2  ;;  %v741_v20 = vperm.slane %v1246_v3, 1  ;;  %v740_v31 = vperm.slane %v1246_v3, 0  ;;  %v745_v48 = vperm.slane %v1246_v3, 5 }
 0x368   : > { %v743_v32 = vperm.slane %v1246_v3, 3  ;;  %v744_v50 = vperm.slane %v1246_v3, 4  ;;  %v746_v33 = vperm.slane %v1246_v3, 6  ;;  %v747_v51 = vperm.slane %v1246_v3, 7 }
 0x369   : > { %v758_v16 = vmul.f32 %v742_v30, %v733_v25  ;;  %v757_v37 = vmul.f32 %v741_v20, %v732_v11  ;;  %v756_v38 = vmul.f32 %v740_v31, %v731_v23  ;;  %v761_v39 = vmul.f32 %v745_v48, %v736_v59 }
 0x36a   : > { %v759_v60 = vmul.f32 %v743_v32, %v734_v54  ;;  %v760_v41 = vmul.f32 %v744_v50, %v735_v34  ;;  %v762_v63 = vmul.f32 %v746_v33, %v737_v27  ;;  %v763_v42 = vmul.f32 %v747_v51, %v738_v35 }
 0x36b   : > { %v841_v27 = vstv %s1145_s9  ;;  %v884_v30 = vstv %s1146_s10 }
 0x36c   : > { %v844_v20 = vmul.f32 %v841_v27, %v1557_v8  ;;  %v887_v31 = vmul.f32 %v884_v30, %v1557_v8  ;;  %v848_v48 = vmul.f32 %v841_v27, %v1583_v18  ;;  %v891_v32 = vmul.f32 %v884_v30, %v1583_v18 }
 0x36d   : > { %v845_v50 = vmul.f32 %v841_v27, %v1567_v12  ;;  %v888_v33 = vmul.f32 %v884_v30, %v1567_v12  ;;  %v846_v51 = vmul.f32 %v841_v27, %v1577_v15  ;;  %v847_v34 = vmul.f32 %v841_v27, %v1587_v19 }
 0x36e   : > { %v890_v8 = vmul.f32 %v884_v30, %v1587_v19 }
 0x378   : > { %v616_v26 = vpop.xlane.xlu1 %615 }
 0x379   : > { %1247 = vrcp.f32 %v616_v26 }
 0x37f   : > { %v1248_v40 = vpop.eup %1247 }
 0x380   : > { %v631_v0 = vperm.slane %v1248_v40, 2  ;;  %v630_v43 = vperm.slane %v1248_v40, 1  ;;  %v629_v5 = vperm.slane %v1248_v40, 0  ;;  %v634_v44 = vperm.slane %v1248_v40, 5 }
 0x381   : > { %v632_v1 = vperm.slane %v1248_v40, 3  ;;  %v633_v45 = vperm.slane %v1248_v40, 4  ;;  %v635_v6 = vperm.slane %v1248_v40, 6  ;;  %v636_v46 = vperm.slane %v1248_v40, 7 }
 0x382   : > { %v647_v13 = vmul.f32 %v631_v0, %v622_v24  ;;  %v646_v14 = vmul.f32 %v630_v43, %v621_v21  ;;  %v645_v47 = vmul.f32 %v629_v5, %v620_v7  ;;  %v650_v49 = vmul.f32 %v634_v44, %v625_v10 }
 0x383   : > { %v648_v22 = vmul.f32 %v632_v1, %v623_v55  ;;  %v649_v52 = vmul.f32 %v633_v45, %v624_v9  ;;  %v651_v53 = vmul.f32 %v635_v6, %v626_v29  ;;  %v652_v56 = vmul.f32 %v636_v46, %v627_v36 }
 0x384   : > { %v766_v57 = vadd.f32 %v758_v16, %v647_v13  ;;  %v765_v61 = vadd.f32 %v757_v37, %v646_v14  ;;  %v764_v62 = vadd.f32 %v756_v38, %v645_v47  ;;  %v769_v2 = vadd.f32 %v761_v39, %v650_v49 }
 0x385   : > { %v767_v3 = vadd.f32 %v759_v60, %v648_v22  ;;  %v768_v11 = vadd.f32 %v760_v41, %v649_v52  ;;  %v770_v23 = vadd.f32 %v762_v63, %v651_v53  ;;  %v771_v25 = vadd.f32 %v763_v42, %v652_v56 }
 0x386   : > { %v842_v7 = vmul.f32 %v841_v27, %v1525_v58  ;;  %v885_v21 = vmul.f32 %v884_v30, %v1525_v58  ;;  %v843_v24 = vmul.f32 %v841_v27, %v1548_v4  ;;  %v886_v29 = vmul.f32 %v884_v30, %v1548_v4 }
 0x387   : > { %v889_v58 = vmul.f32 %v884_v30, %v1577_v15  ;;  %v849_v55 = vmul.f32 %v841_v27, %v1579_v17  ;;  %v892_v4 = vmul.f32 %v884_v30, %v1579_v17 }
 0x389   : > { %v838_v26 = vpop.xlane.xlu2 %837 }
 0x38a   : > { %1249 = vrcp.f32 %v838_v26 }
 0x390   : > { %v1250_v54 = vpop.eup %1249 }
 0x391   : > { %v853_v59 = vperm.slane %v1250_v54, 2  ;;  %v852_v9 = vperm.slane %v1250_v54, 1  ;;  %v851_v18 = vperm.slane %v1250_v54, 0  ;;  %v856_v10 = vperm.slane %v1250_v54, 5 }
 0x392   : > { %v854_v35 = vperm.slane %v1250_v54, 3  ;;  %v855_v36 = vperm.slane %v1250_v54, 4  ;;  %v857_v12 = vperm.slane %v1250_v54, 6  ;;  %v858_v16 = vperm.slane %v1250_v54, 7 }
 0x393   : > { %v869_v37 = vmul.f32 %v853_v59, %v844_v20  ;;  %v895_v38 = vmul.f32 %v887_v31, %v853_v59  ;;  %v868_v15 = vmul.f32 %v852_v9, %v843_v24  ;;  %v894_v39 = vmul.f32 %v886_v29, %v852_v9 }
 0x394   : > { %v867_v40 = vmul.f32 %v851_v18, %v842_v7  ;;  %v893_v60 = vmul.f32 %v885_v21, %v851_v18  ;;  %v872_v41 = vmul.f32 %v856_v10, %v847_v34  ;;  %v898_v17 = vmul.f32 %v890_v8, %v856_v10 }
 0x395   : > { %v877_v63 = vadd.f32 %v869_v37, %v766_v57  ;;  %v876_v42 = vadd.f32 %v868_v15, %v765_v61  ;;  %v870_v0 = vmul.f32 %v854_v35, %v845_v50  ;;  %v896_v19 = vmul.f32 %v888_v33, %v854_v35 }
 0x396   : > { %v875_v43 = vadd.f32 %v867_v40, %v764_v62  ;;  %v880_v5 = vadd.f32 %v872_v41, %v769_v2  ;;  %v871_v44 = vmul.f32 %v855_v36, %v846_v51  ;;  %v897_v1 = vmul.f32 %v889_v58, %v855_v36 }
 0x397   : > { %v903_v45 = vadd.f32 %v895_v38, %v877_v63  ;;  %v902_v6 = vadd.f32 %v894_v39, %v876_v42  ;;  %v878_v46 = vadd.f32 %v870_v0, %v767_v3  ;;  %v873_v13 = vmul.f32 %v857_v12, %v848_v48  ;;  %v1134_v3 = vld [vmem:[%s1467_s8 + $0x20] sm:$0xff] }
 0x398   : > { %v901_v14 = vadd.f32 %v893_v60, %v875_v43  ;;  %v906_v47 = vadd.f32 %v898_v17, %v880_v5  ;;  %v879_v49 = vadd.f32 %v871_v44, %v768_v11  ;;  %v899_v22 = vmul.f32 %v891_v32, %v857_v12  ;;  %v1135_v11 = vld [vmem:[%s1467_s8 + $0x28] sm:$0xff]  ;;  %973 = vmatpush.msra.mxu2 %v1134_v3 }
 0x399   : > { %924 = vperm.xlu2 %1236, %v903_v45   ;;  %921 = vperm.xlu0 %1238, %v902_v6   ;;  %v904_v52 = vadd.f32 %v896_v19, %v878_v46  ;;  %v881_v53 = vadd.f32 %v873_v13, %v770_v23  ;;  %v874_v56 = vmul.f32 %v858_v16, %v849_v55 }
 0x39a   : > { %918 = vperm.xlu1 %1237, %v901_v14   ;;  %v905_v57 = vadd.f32 %v897_v1, %v879_v49  ;;  %v900_v2 = vmul.f32 %v892_v4, %v858_v16  ;;  %993 = vmatpush.msra.mxu3 %v1135_v11 }
 0x39b   : > { %v907_v61 = vadd.f32 %v899_v22, %v881_v53  ;;  %v882_v62 = vadd.f32 %v874_v56, %v771_v25 }
 0x39d   : > { %v908_v26 = vadd.f32 %v900_v2, %v882_v62 }
 0x3a1   : > { %933 = vperm.xlu2 %1236, %v906_v47   ;;  %927 = vperm.xlu0 %1238, %v904_v52  }
 0x3a2   : > { %930 = vperm.xlu1 %1237, %v905_v57  }
 0x3a9   : > { %936 = vperm.xlu0 %1238, %v907_v61  }
 0x3aa   : > { %939 = vperm.xlu1 %1237, %v908_v26  }
 0x3f3   : > { %v925_v7 = vpop.permute.xlu2 %924 }
 0x3f4   : > { %v943_v29 = vperm.slane %v925_v7, %v1593_v28 }
 0x3fb   : > { %v934_v33 = vpop.permute.xlu2 %933 }
 0x3fc   : > { %v946_v58 = vperm.slane %v934_v33, %v1593_v28 }
 0x40b   : > { %v922_v27 = vpop.permute.xlu0 %921 }
 0x40c   : > { %v919_v30 = vpop.permute.xlu1 %918  ;;  %v942_v23 = vperm.slane %v922_v27, %v1593_v28 }
 0x40d   : > { %v941_v21 = vperm.slane %v919_v30, %v1593_v28 }
 0x40f   : > { %v949_v25 = vsel %vm599_vm9, %v942_v23, %v941_v21 }
 0x410   : > { %v950_v48 = vsel %vm601_vm10, %v943_v29, %v949_v25 }
 0x413   : > { %v928_v24 = vpop.permute.xlu0 %927 }
 0x414   : > { %v944_v20 = vperm.slane %v928_v24, %v1593_v28  ;;  %v931_v31 = vpop.permute.xlu1 %930 }
 0x415   : > { %v945_v32 = vperm.slane %v931_v31, %v1593_v28 }
 0x416   : > { %v951_v50 = vsel %vm603_vm11, %v944_v20, %v950_v48 }
 0x417   : > { %v952_v51 = vsel %vm605_vm12, %v945_v32, %v951_v50 }
 0x418   : > { %v953_v8 = vsel %vm607_vm13, %v946_v58, %v952_v51 }
 0x41b   : > { %v937_v54 = vpop.permute.xlu0 %936 }
 0x41c   : > { %v947_v55 = vperm.slane %v937_v54, %v1593_v28  ;;  %v940_v4 = vpop.permute.xlu1 %939 }
 0x41d   : > { %v948_v34 = vperm.slane %v940_v4, %v1593_v28 }
 0x41e   : > { %v954_v59 = vsel %vm609_vm14, %v947_v55, %v953_v8 }
 0x41f   : > { %v955_v9 = vsel %vm611_vm15, %v948_v34, %v954_v59 }
 0x420   : > { %1147 = vmatmul.msk.f32.vlgmr.msra.gmra.mxu2 %vm445_vm6, %v955_v9  ;;  %1148 = vmatmul.msk.f32.vlgmr.msra.gmra.mxu3 %vm445_vm6, %v955_v9 }
 0x4a3   : > { %v975_v28 = vpop.f32.mrf.mxu2  ;;  %v995_v18 = vpop.f32.mrf.mxu3 }
 0x4a4   : > { %998 = vst [vmem:[%s253_s29] sm:$0xff] %v975_v28 }
 0x4a5   : > { %999 = vst [vmem:[%s253_s29 + $0x8] sm:$0xff] %v995_v18 }
 0x4a6 PF: > { %s15_s18 = sadd.s32 1, %s1343_s18   ;;  %s1730_s12 = smov %s1323_s13 }
 0x4a7   : > { %p12_p1 = scmp.ge.s32.totalorder %s15_s18, 10   ;;  %s1731_s13 = smov %s1442_s5 }
 0x4a8   : > { %s1732_s14 = smov %s1335_s16  ;;  %s1733_s15 = smov %s1339_s17 }
 0x4a9   : > { %s1734_s16 = smov %s1737_s20  ;;  %s1735_s17 = smov %s1741_s21 }
 0x4aa   :  { %14 = sbr.rel (!%p12_p1) target bundleno = 5 (0x5), region = 101 }
 0x4af   :  { %1029 = vsyncpa [#allocation3], 1 }
 0x4b0   :  { %1031 = vsyncpa [#allocation3 + $0x1], 1 }
 0x4b1   :  { %1032 = vsyncpa [#allocation5], 1 }

// kernel: attention_forward.5
= control target key start
LH: loop header
LB: loop body
LE: loop exit
PB: predicated region body
PF: predicated region fallthrough
CT: control target
= control target key end

     0   :  { %s3327_s12 = smov 0   ;;  %s3329_s13 = smov 0   ;;  %s5822_s0 = inlined_call_operand.vmem [shape: f32[2,96,256], index: 0, kind: input, shape index: {}]   ;;  %s5823_s1 = inlined_call_operand.vmem [shape: f32[96,9], index: 1, kind: input, shape index: {}]   ;;  %s5824_s2 = inlined_call_operand.vmem [shape: f32[2,256], index: 2, kind: input, shape index: {}]   ;;  %s5825_s3 = inlined_call_operand.vmem [shape: f32[2,96,256], index: 3, kind: output, shape index: {}]  }
   0x1   :  { %s3331_s14 = smov 0  }
   0x2 LB: > { %s25_s15 = sadd.s32 1, %s3285_s13  ;;  %p3133_p0 = scmp.ge.s32.totalorder %s3289_s14, 1  ;;  %s3289_s14 = sphi %s3331_s14, %s13_s14   ;;  %s3285_s13 = sphi %s3329_s13, %s6527_s13   ;;  %s3281_s12 = sphi %s3327_s12, %s6526_s12  }
   0x3   : > { %p27_p1 = scmp.ge.s32.totalorder %s25_s15, 2  ;;  %p170_p2 = scmp.lt.s32.totalorder %s3289_s14, 3 }
   0x5   : > { %s6529_s15 = smov (%p27_p1, %s25_s15), 0  ;;  %p171_p3 = pnand %p3133_p0, %p170_p2 }
   0x7   : > { %174 = sbr.rel (%p171_p3) target bundleno = 1884 (0x75c), region = 32 }
   0xc   : > { %v3350_v0 = vld [vmem:[%s5823_s1 + $0x10] sm:$0xff]  ;;  %v3355_v1 = vld [vmem:[%s5823_s1] sm:$0xff]  ;;  %v3291_v2 = vmov 0   ;;  %v3368_v4 = vld [vmem:[%s5823_s1 + $0x18] sm:$0xff]  ;;  %v3292_v13 = vmov 3   ;;  %p210_p4 = scmp.lt.s32.totalorder %s3281_s12, 1 }
   0xd   : > { %3181 = vset.pattern.permute.xlu1 %v3291_v2  ;;  %3180 = vset.pattern.permute.xlu0 %v3291_v2  ;;  %v3360_v3 = vld [vmem:[%s5823_s1 + $0x20] sm:$0xff]  ;;  %v3373_v5 = vld [vmem:[%s5823_s1 + $0x8] sm:$0xff]  ;;  %v3386_v7 = vld [vmem:[%s5823_s1 + $0x38] sm:$0xff]  ;;  %s3293_s21 = smov 112   ;;  %s3295_s22 = smov 96   ;;  %vm648_vm0 = vcmask 916480  }
   0xe   : > { %372 = vperm.xlu1 %3181, %v3350_v0   ;;  %362 = vperm.xlu0 %3180, %v3355_v1   ;;  %v3378_v6 = vld [vmem:[%s5823_s1 + $0x28] sm:$0xff]  ;;  %v3391_v8 = vld [vmem:[%s5823_s1 + $0x30] sm:$0xff]  ;;  %v3396_v9 = vld [vmem:[%s5823_s1 + $0x40] sm:$0xff]  ;;  %s6531_s12 = smov (!%p210_p4, %s3281_s12), 1  ;;  %s3302_s29 = smov 111   ;;  %vm973_vm1 = vcmask 785408  }
   0xf   : > { %3182 = vset.pattern.permute.xlu2 %v3291_v2  ;;  %v3404_v10 = vld [vmem:[%s5823_s1 + $0x50] sm:$0xff]  ;;  %v3409_v11 = vld [vmem:[%s5823_s1 + $0x48] sm:$0xff]  ;;  %v3414_v12 = vld [vmem:[%s5823_s1 + $0x58] sm:$0xff]  ;;  %s3139_s17 = smul.u32 192, %s6531_s12  ;;  %s3303_s30 = smov 127   ;;  %vm2486_vm2 = vcmask 1039360  }
  0x10   : > { %382 = vperm.xlu2 %3182, %v3360_v3   ;;  %s3304_s5 = smov 113   ;;  %vm2337_vm3 = vcmask 908288   ;;  %s3305_s6 = smov 126   ;;  %vm2590_vm4 = vcmask 924672   ;;  %vm2739_vm5 = vcmask 1031168   ;;  %vm2944_vm6 = vcmask 138240  }
  0x11   : > { %s3463_s20 = scalar_lea.vmem %s5822_s0, %s3139_s17  ;;  %s5763_s9 = scalar_lea.vmem %s5825_s3, %s3139_s17 }
  0x12   : > { %v3466_v25 = vld [vmem:[%s3463_s20] sm:$0xff]  ;;  %v3469_v27 = vld [vmem:[%s3463_s20 + $0x8] sm:$0xff]  ;;  %v3479_v33 = vld [vmem:[%s3463_s20 + $0x18] sm:$0xff] }
  0x13   : > { %v3482_v34 = vld [vmem:[%s3463_s20 + $0x10] sm:$0xff]  ;;  %v3490_v39 = vld [vmem:[%s3463_s20 + $0x28] sm:$0xff]  ;;  %v3493_v40 = vld [vmem:[%s3463_s20 + $0x20] sm:$0xff] }
  0x14   : > { %v3501_v45 = vld [vmem:[%s3463_s20 + $0x38] sm:$0xff]  ;;  %v3504_v46 = vld [vmem:[%s3463_s20 + $0x30] sm:$0xff]  ;;  %v3512_v51 = vld [vmem:[%s3463_s20 + $0x48] sm:$0xff] }
  0x15   : > { %v3515_v52 = vld [vmem:[%s3463_s20 + $0x40] sm:$0xff]  ;;  %v3523_v57 = vld [vmem:[%s3463_s20 + $0x58] sm:$0xff]  ;;  %v3526_v58 = vld [vmem:[%s3463_s20 + $0x50] sm:$0xff] }
  0x16   : > { %377 = vperm.xlu1 %3181, %v3368_v4   ;;  %367 = vperm.xlu0 %3180, %v3373_v5   ;;  %v3534_v63 = vld [vmem:[%s3463_s20 + $0x68] sm:$0xff]  ;;  %v3537_v2 = vld [vmem:[%s3463_s20 + $0x60] sm:$0xff] }
  0x18   : > { %387 = vperm.xlu2 %3182, %v3378_v6  }
  0x1e   : > { %397 = vperm.xlu1 %3181, %v3386_v7   ;;  %392 = vperm.xlu0 %3180, %v3391_v8  }
  0x20   : > { %402 = vperm.xlu2 %3182, %v3396_v9  }
  0x26   : > { %412 = vperm.xlu1 %3181, %v3404_v10   ;;  %407 = vperm.xlu0 %3180, %v3409_v11  }
  0x28   : > { %417 = vperm.xlu2 %3182, %v3414_v12  }
  0x2e   : > { %3184 = vset.pattern.permute.xlu1 %v3292_v13  ;;  %3183 = vset.pattern.permute.xlu0 %v3292_v13 }
  0x2f   : > { %461 = vperm.xlu1 %3184, %v3373_v5   ;;  %457 = vperm.xlu0 %3183, %v3355_v1  }
  0x30   : > { %3185 = vset.pattern.permute.xlu2 %v3292_v13 }
  0x31   : > { %465 = vperm.xlu2 %3185, %v3350_v0  }
  0x37   : > { %469 = vperm.xlu1 %3184, %v3368_v4   ;;  %477 = vperm.xlu0 %3183, %v3378_v6  }
  0x39   : > { %473 = vperm.xlu2 %3185, %v3360_v3  }
  0x3f   : > { %481 = vperm.xlu1 %3184, %v3391_v8   ;;  %489 = vperm.xlu0 %3183, %v3396_v9  }
  0x41   : > { %485 = vperm.xlu2 %3185, %v3386_v7  }
  0x47   : > { %493 = vperm.xlu1 %3184, %v3409_v11   ;;  %501 = vperm.xlu0 %3183, %v3414_v12  }
  0x49   : > { %497 = vperm.xlu2 %3185, %v3404_v10  }
  0x6a   : > { %v3435_v16 = vpop.permute.xlu2 %382 }
  0x6b   : > { %6008 = vst [vmem:[#allocation5_spill] sm:$0xff] %v3435_v16 }
  0x72   : > { %v3443_v20 = vpop.permute.xlu2 %387 }
  0x73   : > { %6012 = vst [vmem:[#allocation9_spill] sm:$0xff] %v3443_v20 }
  0x7a   : > { %v3454_v23 = vpop.permute.xlu2 %402 }
  0x7b   : > { %6015 = vst [vmem:[#allocation12_spill] sm:$0xff] %v3454_v23 }
  0x80   : > { %v3431_v14 = vpop.permute.xlu1 %372  ;;  %v3433_v15 = vpop.permute.xlu0 %362 }
  0x81   : > { %6006 = vst [vmem:[#allocation3_spill] sm:$0xff] %v3431_v14 }
  0x82   : > { %6007 = vst [vmem:[#allocation4_spill] sm:$0xff] %v3433_v15  ;;  %v3475_v31 = vpop.permute.xlu2 %417 }
  0x83   : > { %6017 = vst [vmem:[#allocation14_spill] sm:$0xff] %v3475_v31 }
  0x88   : > { %v3437_v17 = vpop.permute.xlu0 %367  ;;  %v3439_v18 = vpop.permute.xlu1 %377 }
  0x89   : > { %6009 = vst [vmem:[#allocation6_spill] sm:$0xff] %v3437_v17 }
  0x8a   : > { %6010 = vst [vmem:[#allocation7_spill] sm:$0xff] %v3439_v18 }
  0x8b   : > { %v466_v38 = vpop.permute.xlu2 %465 }
  0x8c   : > { %v510_v41 = vmul.f32 0.0, %v466_v38  ;;  %v512_v42 = vmul.f32 %v466_v38, %v3490_v39  ;;  %v511_v43 = vmul.f32 %v466_v38, %v3493_v40 }
  0x90   : > { %v3441_v19 = vpop.permute.xlu0 %392  ;;  %v3446_v21 = vpop.permute.xlu1 %397 }
  0x91   : > { %6011 = vst [vmem:[#allocation8_spill] sm:$0xff] %v3441_v19 }
  0x92   : > { %6013 = vst [vmem:[#allocation10_spill] sm:$0xff] %v3446_v21 }
  0x93   : > { %v474_v50 = vpop.permute.xlu2 %473 }
  0x94   : > { %v516_v53 = vmul.f32 0.0, %v474_v50  ;;  %v518_v54 = vmul.f32 %v474_v50, %v3512_v51  ;;  %v517_v55 = vmul.f32 %v474_v50, %v3515_v52  ;;  %v3567_v50 = vld [vmem:[%s3463_s20 + $0x98] sm:$0xff] }
  0x98   : > { %v3451_v22 = vpop.permute.xlu0 %407  ;;  %v3456_v24 = vpop.permute.xlu1 %412 }
  0x99   : > { %6014 = vst [vmem:[#allocation11_spill] sm:$0xff] %v3451_v22 }
  0x9a   : > { %6016 = vst [vmem:[#allocation13_spill] sm:$0xff] %v3456_v24 }
  0xa1   : > { %v458_v26 = vpop.permute.xlu0 %457  ;;  %v462_v32 = vpop.permute.xlu1 %461 }
  0xa2   : > { %v504_v28 = vmul.f32 0.0, %v458_v26  ;;  %v506_v29 = vmul.f32 %v458_v26, %v3469_v27  ;;  %v505_v30 = vmul.f32 %v458_v26, %v3466_v25  ;;  %v507_v35 = vmul.f32 0.0, %v462_v32 }
  0xa3   : > { %v509_v36 = vmul.f32 %v462_v32, %v3479_v33  ;;  %v508_v37 = vmul.f32 %v462_v32, %v3482_v34  ;;  %v3548_v32 = vld [vmem:[%s3463_s20 + $0x70] sm:$0xff] }
  0xa4   : > { %576 = vrot.lane.b32.xlu1 %v504_v28, %s3293_s21  ;;  %580 = vrot.lane.b32.xlu0 %v506_v29, %s3293_s21  ;;  %v486_v29 = vpop.permute.xlu2 %485 }
  0xa5   : > { %578 = vrot.lane.b32.xlu2 %v505_v30, %s3293_s21  ;;  %v3545_v30 = vld [vmem:[%s3463_s20 + $0x78] sm:$0xff] }
  0xa9   : > { %v470_v44 = vpop.permute.xlu1 %469  ;;  %v478_v56 = vpop.permute.xlu0 %477 }
  0xaa   : > { %v513_v47 = vmul.f32 0.0, %v470_v44  ;;  %v515_v48 = vmul.f32 %v470_v44, %v3501_v45  ;;  %v514_v49 = vmul.f32 %v470_v44, %v3504_v46  ;;  %v519_v59 = vmul.f32 0.0, %v478_v56 }
  0xab   : > { %v521_v60 = vmul.f32 %v478_v56, %v3523_v57  ;;  %v520_v61 = vmul.f32 %v478_v56, %v3526_v58 }
  0xac   : > { %582 = vrot.lane.b32.xlu1 %v507_v35, %s3293_s21  ;;  %586 = vrot.lane.b32.xlu0 %v509_v36, %s3293_s21  ;;  %v525_v35 = vmul.f32 0.0, %v486_v29  ;;  %v527_v36 = vmul.f32 %v486_v29, %v3545_v30 }
  0xad   : > { %584 = vrot.lane.b32.xlu2 %v508_v37, %s3293_s21  ;;  %v526_v37 = vmul.f32 %v486_v29, %v3548_v32  ;;  %v3589_v29 = vld [vmem:[%s3463_s20 + $0xb8] sm:$0xff] }
  0xb1   : > { %v482_v62 = vpop.permute.xlu1 %481  ;;  %v490_v38 = vpop.permute.xlu0 %489 }
  0xb2   : > { %v522_v13 = vmul.f32 0.0, %v482_v62  ;;  %v524_v26 = vmul.f32 %v482_v62, %v3534_v63  ;;  %v523_v28 = vmul.f32 %v482_v62, %v3537_v2  ;;  %v528_v44 = vmul.f32 0.0, %v490_v38 }
  0xb4   : > { %588 = vrot.lane.b32.xlu1 %v510_v41, %s3293_s21  ;;  %592 = vrot.lane.b32.xlu0 %v512_v42, %s3293_s21  ;;  %v3294_v41 = vmov 6   ;;  %v3556_v42 = vld [vmem:[%s3463_s20 + $0x88] sm:$0xff] }
  0xb5   : > { %590 = vrot.lane.b32.xlu2 %v511_v43, %s3293_s21  ;;  %3186 = vset.pattern.permute.xlu1 %v3294_v41  ;;  %v3559_v43 = vld [vmem:[%s3463_s20 + $0x80] sm:$0xff] }
  0xb6   : > { %3188 = vset.pattern.permute.xlu0 %v3294_v41  ;;  %3187 = vset.pattern.permute.xlu2 %v3294_v41 }
  0xbc   : > { %594 = vrot.lane.b32.xlu1 %v513_v47, %s3293_s21  ;;  %598 = vrot.lane.b32.xlu0 %v515_v48, %s3293_s21  ;;  %v530_v47 = vmul.f32 %v490_v38, %v3556_v42  ;;  %v529_v48 = vmul.f32 %v490_v38, %v3559_v43 }
  0xbd   : > { %596 = vrot.lane.b32.xlu2 %v514_v49, %s3293_s21  ;;  %v494_v49 = vpop.permute.xlu1 %493 }
  0xc4   : > { %600 = vrot.lane.b32.xlu1 %v516_v53, %s3293_s21  ;;  %604 = vrot.lane.b32.xlu0 %v518_v54, %s3293_s21  ;;  %v3570_v53 = vld [vmem:[%s3463_s20 + $0x90] sm:$0xff]  ;;  %v531_v54 = vmul.f32 0.0, %v494_v49 }
  0xc5   : > { %602 = vrot.lane.b32.xlu2 %v517_v55, %s3293_s21  ;;  %v533_v55 = vmul.f32 %v494_v49, %v3567_v50  ;;  %v532_v56 = vmul.f32 %v494_v49, %v3570_v53 }
  0xcc   : > { %606 = vrot.lane.b32.xlu1 %v519_v59, %s3293_s21  ;;  %610 = vrot.lane.b32.xlu0 %v521_v60, %s3293_s21  ;;  %v498_v59 = vpop.permute.xlu2 %497  ;;  %v3578_v60 = vld [vmem:[%s3463_s20 + $0xa8] sm:$0xff] }
  0xcd   : > { %608 = vrot.lane.b32.xlu2 %v520_v61, %s3293_s21  ;;  %v3581_v61 = vld [vmem:[%s3463_s20 + $0xa0] sm:$0xff]  ;;  %v534_v62 = vmul.f32 0.0, %v498_v59 }
  0xd4   : > { %612 = vrot.lane.b32.xlu1 %v522_v13, %s3293_s21  ;;  %616 = vrot.lane.b32.xlu0 %v524_v26, %s3293_s21  ;;  %v536_v13 = vmul.f32 %v498_v59, %v3578_v60  ;;  %v535_v26 = vmul.f32 %v498_v59, %v3581_v61 }
  0xd5   : > { %614 = vrot.lane.b32.xlu2 %v523_v28, %s3293_s21  ;;  %v502_v28 = vpop.permute.xlu0 %501 }
  0xdc   : > { %618 = vrot.lane.b32.xlu1 %v525_v35, %s3293_s21  ;;  %622 = vrot.lane.b32.xlu0 %v527_v36, %s3293_s21  ;;  %v3592_v35 = vld [vmem:[%s3463_s20 + $0xb0] sm:$0xff]  ;;  %v537_v36 = vmul.f32 0.0, %v502_v28 }
  0xdd   : > { %620 = vrot.lane.b32.xlu2 %v526_v37, %s3293_s21  ;;  %v539_v37 = vmul.f32 %v502_v28, %v3589_v29  ;;  %v538_v38 = vmul.f32 %v502_v28, %v3592_v35 }
  0xe4   : > { %624 = vrot.lane.b32.xlu1 %v528_v44, %s3293_s21  ;;  %628 = vrot.lane.b32.xlu0 %v530_v47, %s3293_s21 }
  0xe5   : > { %626 = vrot.lane.b32.xlu2 %v529_v48, %s3293_s21 }
  0xec   : > { %630 = vrot.lane.b32.xlu1 %v531_v54, %s3293_s21  ;;  %634 = vrot.lane.b32.xlu0 %v533_v55, %s3293_s21 }
  0xed   : > { %632 = vrot.lane.b32.xlu2 %v532_v56, %s3293_s21 }
  0xf4   : > { %636 = vrot.lane.b32.xlu1 %v534_v62, %s3293_s21  ;;  %640 = vrot.lane.b32.xlu0 %v536_v13, %s3293_s21 }
  0xf5   : > { %638 = vrot.lane.b32.xlu2 %v535_v26, %s3293_s21 }
  0xfc   : > { %642 = vrot.lane.b32.xlu1 %v537_v36, %s3293_s21  ;;  %646 = vrot.lane.b32.xlu0 %v539_v37, %s3293_s21 }
  0xfd   : > { %644 = vrot.lane.b32.xlu2 %v538_v38, %s3293_s21 }
  0xff   : > { %v3601_v41 = vpop.permute.xlu2 %578 }
 0x100   : > { %6018 = vst [vmem:[#allocation15_spill] sm:$0xff] %v3601_v41 }
 0x104   : > { %782 = vperm.xlu1 %3186, %v3355_v1   ;;  %790 = vperm.xlu0 %3188, %v3350_v0  }
 0x105   : > { %786 = vperm.xlu2 %3187, %v3373_v5  }
 0x107   : > { %v3607_v44 = vpop.permute.xlu2 %584 }
 0x108   : > { %6019 = vst [vmem:[#allocation16_spill] sm:$0xff] %v3607_v44 }
 0x10c   : > { %794 = vperm.xlu1 %3186, %v3368_v4   ;;  %810 = vperm.xlu0 %3188, %v3386_v7  }
 0x10d   : > { %798 = vperm.xlu2 %3187, %v3360_v3  }
 0x10f   : > { %v3616_v49 = vpop.permute.xlu2 %590 }
 0x110   : > { %6022 = vst [vmem:[#allocation19_spill] sm:$0xff] %v3616_v49 }
 0x114   : > { %802 = vperm.xlu1 %3186, %v3378_v6   ;;  %822 = vperm.xlu0 %3188, %v3404_v10  }
 0x115   : > { %806 = vperm.xlu2 %3187, %v3391_v8  }
 0x116   : > { %v3612_v47 = vpop.permute.xlu1 %576  ;;  %v3614_v48 = vpop.permute.xlu0 %580 }
 0x117   : > { %6020 = vst [vmem:[#allocation17_spill] sm:$0xff] %v3612_v47  ;;  %v3624_v56 = vpop.permute.xlu2 %596 }
 0x118   : > { %6021 = vst [vmem:[#allocation18_spill] sm:$0xff] %v3614_v48 }
 0x119   : > { %6025 = vst [vmem:[#allocation22_spill] sm:$0xff] %v3624_v56 }
 0x11c   : > { %814 = vperm.xlu1 %3186, %v3396_v9  }
 0x11d   : > { %818 = vperm.xlu2 %3187, %v3409_v11  }
 0x11e   : > { %v3620_v54 = vpop.permute.xlu1 %582  ;;  %v3622_v55 = vpop.permute.xlu0 %586 }
 0x11f   : > { %6023 = vst [vmem:[#allocation20_spill] sm:$0xff] %v3620_v54  ;;  %v3631_v13 = vpop.permute.xlu2 %602 }
 0x120   : > { %6024 = vst [vmem:[#allocation21_spill] sm:$0xff] %v3622_v55 }
 0x121   : > { %6028 = vst [vmem:[#allocation25_spill] sm:$0xff] %v3631_v13 }
 0x124   : > { %826 = vperm.xlu1 %3186, %v3414_v12  }
 0x126   : > { %v3627_v59 = vpop.permute.xlu1 %588  ;;  %v3629_v62 = vpop.permute.xlu0 %592 }
 0x127   : > { %6026 = vst [vmem:[#allocation23_spill] sm:$0xff] %v3627_v59  ;;  %v3641_v38 = vpop.permute.xlu2 %608 }
 0x128   : > { %6027 = vst [vmem:[#allocation24_spill] sm:$0xff] %v3629_v62 }
 0x129   : > { %6033 = vst [vmem:[#allocation30_spill] sm:$0xff] %v3641_v38 }
 0x12e   : > { %v3633_v26 = vpop.permute.xlu1 %594  ;;  %v3635_v28 = vpop.permute.xlu0 %598 }
 0x12f   : > { %6029 = vst [vmem:[#allocation26_spill] sm:$0xff] %v3633_v26  ;;  %v3647_v22 = vpop.permute.xlu2 %614 }
 0x130   : > { %6030 = vst [vmem:[#allocation27_spill] sm:$0xff] %v3635_v28 }
 0x131   : > { %6036 = vst [vmem:[#allocation33_spill] sm:$0xff] %v3647_v22 }
 0x136   : > { %v3637_v36 = vpop.permute.xlu1 %600  ;;  %v3639_v37 = vpop.permute.xlu0 %604 }
 0x137   : > { %6031 = vst [vmem:[#allocation28_spill] sm:$0xff] %v3637_v36  ;;  %v3653_v19 = vpop.permute.xlu2 %620 }
 0x138   : > { %6032 = vst [vmem:[#allocation29_spill] sm:$0xff] %v3639_v37 }
 0x139   : > { %6039 = vst [vmem:[#allocation36_spill] sm:$0xff] %v3653_v19 }
 0x13e   : > { %v3643_v31 = vpop.permute.xlu1 %606  ;;  %v3645_v24 = vpop.permute.xlu0 %610 }
 0x13f   : > { %6034 = vst [vmem:[#allocation31_spill] sm:$0xff] %v3643_v31  ;;  %v3659_v28 = vpop.permute.xlu2 %626 }
 0x140   : > { %6035 = vst [vmem:[#allocation32_spill] sm:$0xff] %v3645_v24 }
 0x141   : > { %6042 = vst [vmem:[#allocation39_spill] sm:$0xff] %v3659_v28 }
 0x146   : > { %v3649_v23 = vpop.permute.xlu1 %612  ;;  %v3651_v21 = vpop.permute.xlu0 %616 }
 0x147   : > { %6037 = vst [vmem:[#allocation34_spill] sm:$0xff] %v3649_v23  ;;  %v3667_v24 = vpop.permute.xlu2 %632 }
 0x148   : > { %6038 = vst [vmem:[#allocation35_spill] sm:$0xff] %v3651_v21 }
 0x149   : > { %6046 = vst [vmem:[#allocation43_spill] sm:$0xff] %v3667_v24 }
 0x14e   : > { %v3655_v20 = vpop.permute.xlu1 %618  ;;  %v3657_v16 = vpop.permute.xlu0 %622 }
 0x14f   : > { %6040 = vst [vmem:[#allocation37_spill] sm:$0xff] %v3655_v20  ;;  %v3673_v21 = vpop.permute.xlu2 %638 }
 0x150   : > { %6041 = vst [vmem:[#allocation38_spill] sm:$0xff] %v3657_v16 }
 0x151   : > { %6049 = vst [vmem:[#allocation46_spill] sm:$0xff] %v3673_v21 }
 0x156   : > { %v3661_v37 = vpop.permute.xlu1 %624  ;;  %v3663_v38 = vpop.permute.xlu0 %628 }
 0x157   : > { %6043 = vst [vmem:[#allocation40_spill] sm:$0xff] %v3661_v37  ;;  %v3679_v16 = vpop.permute.xlu2 %644 }
 0x158   : > { %6044 = vst [vmem:[#allocation41_spill] sm:$0xff] %v3663_v38 }
 0x159   : > { %6052 = vst [vmem:[#allocation49_spill] sm:$0xff] %v3679_v16 }
 0x15e   : > { %v3665_v31 = vpop.permute.xlu1 %630  ;;  %v3669_v22 = vpop.permute.xlu0 %634 }
 0x15f   : > { %6045 = vst [vmem:[#allocation42_spill] sm:$0xff] %v3665_v31 }
 0x160   : > { %6047 = vst [vmem:[#allocation44_spill] sm:$0xff] %v3669_v22 }
 0x166   : > { %v3671_v23 = vpop.permute.xlu1 %636  ;;  %v3677_v20 = vpop.permute.xlu0 %640 }
 0x167   : > { %6048 = vst [vmem:[#allocation45_spill] sm:$0xff] %v3671_v23 }
 0x168   : > { %6051 = vst [vmem:[#allocation48_spill] sm:$0xff] %v3677_v20 }
 0x16e   : > { %v3675_v19 = vpop.permute.xlu1 %642  ;;  %v3685_v22 = vpop.permute.xlu0 %646 }
 0x16f   : > { %6050 = vst [vmem:[#allocation47_spill] sm:$0xff] %v3675_v19  ;;  %v787_v19 = vpop.permute.xlu2 %786 }
 0x170   : > { %6053 = vst [vmem:[#allocation50_spill] sm:$0xff] %v3685_v22  ;;  %v833_v20 = vmul.f32 %v787_v19, %v3479_v33  ;;  %v834_v23 = vmul.f32 0.0, %v787_v19  ;;  %v832_v16 = vmul.f32 %v787_v19, %v3482_v34 }
 0x176   : > { %v783_v28 = vpop.permute.xlu1 %782 }
 0x177   : > { %v831_v37 = vmul.f32 0.0, %v783_v28  ;;  %v830_v38 = vmul.f32 %v783_v28, %v3469_v27  ;;  %v829_v31 = vmul.f32 %v783_v28, %v3466_v25  ;;  %v791_v28 = vpop.permute.xlu0 %790 }
 0x178   : > { %v835_v22 = vmul.f32 %v791_v28, %v3493_v40 }
 0x179   : > { %905 = vrot.lane.b32.xlu1 %v831_v37, %s3295_s22  ;;  %903 = vrot.lane.b32.xlu0 %v830_v38, %s3295_s22  ;;  %v836_v37 = vmul.f32 %v791_v28, %v3490_v39  ;;  %v837_v38 = vmul.f32 0.0, %v791_v28 }
 0x17a   : > { %901 = vrot.lane.b32.xlu2 %v829_v31, %s3295_s22 }
 0x17e   : > { %v795_v31 = vpop.permute.xlu1 %794 }
 0x17f   : > { %v839_v19 = vmul.f32 %v795_v31, %v3501_v45 }
 0x181   : > { %909 = vrot.lane.b32.xlu0 %v833_v20, %s3295_s22  ;;  %911 = vrot.lane.b32.xlu1 %v834_v23, %s3295_s22  ;;  %v840_v20 = vmul.f32 0.0, %v795_v31  ;;  %v838_v23 = vmul.f32 %v795_v31, %v3504_v46 }
 0x182   : > { %907 = vrot.lane.b32.xlu2 %v832_v16, %s3295_s22  ;;  %v799_v16 = vpop.permute.xlu2 %798 }
 0x183   : > { %v842_v28 = vmul.f32 %v799_v16, %v3512_v51 }
 0x189   : > { %915 = vrot.lane.b32.xlu0 %v836_v37, %s3295_s22  ;;  %917 = vrot.lane.b32.xlu1 %v837_v38, %s3295_s22  ;;  %v843_v37 = vmul.f32 0.0, %v799_v16  ;;  %v841_v38 = vmul.f32 %v799_v16, %v3515_v52 }
 0x18a   : > { %913 = vrot.lane.b32.xlu2 %v835_v22, %s3295_s22  ;;  %v803_v22 = vpop.permute.xlu1 %802 }
 0x18b   : > { %v845_v31 = vmul.f32 %v803_v22, %v3523_v57 }
 0x191   : > { %921 = vrot.lane.b32.xlu0 %v839_v19, %s3295_s22  ;;  %923 = vrot.lane.b32.xlu1 %v840_v20, %s3295_s22  ;;  %v846_v19 = vmul.f32 0.0, %v803_v22  ;;  %v844_v20 = vmul.f32 %v803_v22, %v3526_v58 }
 0x192   : > { %919 = vrot.lane.b32.xlu2 %v838_v23, %s3295_s22  ;;  %v807_v23 = vpop.permute.xlu2 %806 }
 0x193   : > { %v848_v16 = vmul.f32 %v807_v23, %v3534_v63 }
 0x199   : > { %927 = vrot.lane.b32.xlu0 %v842_v28, %s3295_s22  ;;  %929 = vrot.lane.b32.xlu1 %v843_v37, %s3295_s22  ;;  %v849_v28 = vmul.f32 0.0, %v807_v23  ;;  %v847_v37 = vmul.f32 %v807_v23, %v3537_v2  ;;  %v3296_v23 = vmov 1  }
 0x19a   : > { %925 = vrot.lane.b32.xlu2 %v841_v38, %s3295_s22  ;;  %v811_v38 = vpop.permute.xlu0 %810  ;;  %3191 = vset.pattern.permute.xlu1 %v3296_v23 }
 0x19b   : > { %v851_v22 = vmul.f32 %v811_v38, %v3545_v30  ;;  %3190 = vset.pattern.permute.xlu0 %v3296_v23  ;;  %3189 = vset.pattern.permute.xlu2 %v3296_v23 }
 0x1a1   : > { %933 = vrot.lane.b32.xlu0 %v845_v31, %s3295_s22  ;;  %935 = vrot.lane.b32.xlu1 %v846_v19, %s3295_s22  ;;  %v852_v31 = vmul.f32 0.0, %v811_v38  ;;  %v850_v19 = vmul.f32 %v811_v38, %v3548_v32  ;;  %v819_v38 = vpop.permute.xlu2 %818 }
 0x1a2   : > { %931 = vrot.lane.b32.xlu2 %v844_v20, %s3295_s22  ;;  %v815_v20 = vpop.permute.xlu1 %814  ;;  %v823_v23 = vpop.permute.xlu0 %822 }
 0x1a9   : > { %939 = vrot.lane.b32.xlu0 %v848_v16, %s3295_s22  ;;  %941 = vrot.lane.b32.xlu1 %v849_v28, %s3295_s22  ;;  %v854_v16 = vmul.f32 %v815_v20, %v3556_v42  ;;  %v855_v28 = vmul.f32 0.0, %v815_v20 }
 0x1aa   : > { %937 = vrot.lane.b32.xlu2 %v847_v37, %s3295_s22  ;;  %v853_v37 = vmul.f32 %v815_v20, %v3559_v43  ;;  %v860_v20 = vmul.f32 %v823_v23, %v3578_v60 }
 0x1b1   : > { %945 = vrot.lane.b32.xlu0 %v851_v22, %s3295_s22  ;;  %947 = vrot.lane.b32.xlu1 %v852_v31, %s3295_s22  ;;  %v857_v22 = vmul.f32 %v819_v38, %v3567_v50  ;;  %v858_v31 = vmul.f32 0.0, %v819_v38 }
 0x1b2   : > { %943 = vrot.lane.b32.xlu2 %v850_v19, %s3295_s22  ;;  %v856_v19 = vmul.f32 %v819_v38, %v3570_v53 }
 0x1b9   : > { %951 = vrot.lane.b32.xlu0 %v854_v16, %s3295_s22  ;;  %953 = vrot.lane.b32.xlu1 %v855_v28, %s3295_s22  ;;  %v861_v16 = vmul.f32 0.0, %v823_v23  ;;  %v859_v28 = vmul.f32 %v823_v23, %v3581_v61 }
 0x1ba   : > { %949 = vrot.lane.b32.xlu2 %v853_v37, %s3295_s22  ;;  %v827_v37 = vpop.permute.xlu1 %826 }
 0x1bb   : > { %v863_v38 = vmul.f32 %v827_v37, %v3589_v29 }
 0x1c1   : > { %957 = vrot.lane.b32.xlu0 %v857_v22, %s3295_s22  ;;  %959 = vrot.lane.b32.xlu1 %v858_v31, %s3295_s22  ;;  %v864_v22 = vmul.f32 0.0, %v827_v37  ;;  %v862_v31 = vmul.f32 %v827_v37, %v3592_v35 }
 0x1c2   : > { %955 = vrot.lane.b32.xlu2 %v856_v19, %s3295_s22 }
 0x1c9   : > { %963 = vrot.lane.b32.xlu0 %v860_v20, %s3295_s22  ;;  %965 = vrot.lane.b32.xlu1 %v861_v16, %s3295_s22 }
 0x1ca   : > { %961 = vrot.lane.b32.xlu2 %v859_v28, %s3295_s22 }
 0x1d1   : > { %969 = vrot.lane.b32.xlu0 %v863_v38, %s3295_s22  ;;  %971 = vrot.lane.b32.xlu1 %v864_v22, %s3295_s22  ;;  %v3297_v38 = vmov 4  }
 0x1d2   : > { %967 = vrot.lane.b32.xlu2 %v862_v31, %s3295_s22 }
 0x1d4   : > { %v3743_v19 = vpop.permute.xlu2 %901 }
 0x1d5   : > { %6054 = vst [vmem:[#allocation51_spill] sm:$0xff] %v3743_v19 }
 0x1d9   : > { %1075 = vperm.xlu0 %3190, %v3373_v5   ;;  %1079 = vperm.xlu1 %3191, %v3350_v0  }
 0x1da   : > { %1071 = vperm.xlu2 %3189, %v3355_v1  }
 0x1dc   : > { %v3748_v23 = vpop.permute.xlu2 %907 }
 0x1dd   : > { %6055 = vst [vmem:[#allocation52_spill] sm:$0xff] %v3748_v23 }
 0x1e1   : > { %1095 = vperm.xlu0 %3190, %v3391_v8   ;;  %1087 = vperm.xlu1 %3191, %v3360_v3  }
 0x1e2   : > { %1083 = vperm.xlu2 %3189, %v3368_v4  }
 0x1e4   : > { %v3753_v20 = vpop.permute.xlu2 %913 }
 0x1e5   : > { %6056 = vst [vmem:[#allocation53_spill] sm:$0xff] %v3753_v20 }
 0x1e9   : > { %1107 = vperm.xlu0 %3190, %v3409_v11   ;;  %1099 = vperm.xlu1 %3191, %v3386_v7  }
 0x1ea   : > { %1091 = vperm.xlu2 %3189, %v3378_v6  }
 0x1eb   : > { %v3758_v16 = vpop.permute.xlu1 %905  ;;  %v3760_v28 = vpop.permute.xlu0 %903 }
 0x1ec   : > { %6057 = vst [vmem:[#allocation54_spill] sm:$0xff] %v3758_v16  ;;  %v3762_v37 = vpop.permute.xlu2 %919 }
 0x1ed   : > { %6058 = vst [vmem:[#allocation55_spill] sm:$0xff] %v3760_v28 }
 0x1ee   : > { %6059 = vst [vmem:[#allocation56_spill] sm:$0xff] %v3762_v37 }
 0x1f1   : > { %3192 = vset.pattern.permute.xlu0 %v3297_v38  ;;  %1111 = vperm.xlu1 %3191, %v3404_v10  }
 0x1f2   : > { %1103 = vperm.xlu2 %3189, %v3396_v9   ;;  %1155 = vperm.xlu0 %3192, %v3355_v1  }
 0x1f3   : > { %v3767_v22 = vpop.permute.xlu0 %909  ;;  %v3769_v31 = vpop.permute.xlu1 %911 }
 0x1f4   : > { %6060 = vst [vmem:[#allocation57_spill] sm:$0xff] %v3767_v22  ;;  %v3771_v21 = vpop.permute.xlu2 %925 }
 0x1f5   : > { %6061 = vst [vmem:[#allocation58_spill] sm:$0xff] %v3769_v31 }
 0x1f6   : > { %6062 = vst [vmem:[#allocation59_spill] sm:$0xff] %v3771_v21 }
 0x1f9   : > { %3193 = vset.pattern.permute.xlu1 %v3297_v38 }
 0x1fa   : > { %1115 = vperm.xlu2 %3189, %v3414_v12   ;;  %1175 = vperm.xlu0 %3192, %v3378_v6  }
 0x1fb   : > { %1159 = vperm.xlu1 %3193, %v3373_v5   ;;  %v3776_v16 = vpop.permute.xlu0 %915  ;;  %v3778_v24 = vpop.permute.xlu1 %917 }
 0x1fc   : > { %6063 = vst [vmem:[#allocation60_spill] sm:$0xff] %v3776_v16  ;;  %v3780_v36 = vpop.permute.xlu2 %931 }
 0x1fd   : > { %6064 = vst [vmem:[#allocation61_spill] sm:$0xff] %v3778_v24 }
 0x1fe   : > { %6065 = vst [vmem:[#allocation62_spill] sm:$0xff] %v3780_v36 }
 0x202   : > { %3194 = vset.pattern.permute.xlu2 %v3297_v38  ;;  %1187 = vperm.xlu0 %3192, %v3396_v9  }
 0x203   : > { %1163 = vperm.xlu2 %3194, %v3350_v0   ;;  %1167 = vperm.xlu1 %3193, %v3368_v4   ;;  %v3785_v31 = vpop.permute.xlu0 %921  ;;  %v3787_v21 = vpop.permute.xlu1 %923 }
 0x204   : > { %6066 = vst [vmem:[#allocation63_spill] sm:$0xff] %v3785_v31  ;;  %v3789_v13 = vpop.permute.xlu2 %937 }
 0x205   : > { %6067 = vst [vmem:[#allocation64_spill] sm:$0xff] %v3787_v21 }
 0x206   : > { %6068 = vst [vmem:[#allocation65_spill] sm:$0xff] %v3789_v13 }
 0x20a   : > { %1199 = vperm.xlu0 %3192, %v3414_v12  }
 0x20b   : > { %1171 = vperm.xlu2 %3194, %v3360_v3   ;;  %1179 = vperm.xlu1 %3193, %v3391_v8   ;;  %v3794_v24 = vpop.permute.xlu0 %927  ;;  %v3796_v38 = vpop.permute.xlu1 %929 }
 0x20c   : > { %6069 = vst [vmem:[#allocation66_spill] sm:$0xff] %v3794_v24  ;;  %v3798_v36 = vpop.permute.xlu2 %943 }
 0x20d   : > { %6070 = vst [vmem:[#allocation67_spill] sm:$0xff] %v3796_v38 }
 0x20e   : > { %6071 = vst [vmem:[#allocation68_spill] sm:$0xff] %v3798_v36 }
 0x213   : > { %1183 = vperm.xlu2 %3194, %v3386_v7   ;;  %1191 = vperm.xlu1 %3193, %v3409_v11   ;;  %v3802_v31 = vpop.permute.xlu0 %933  ;;  %v3804_v21 = vpop.permute.xlu1 %935 }
 0x214   : > { %6072 = vst [vmem:[#allocation69_spill] sm:$0xff] %v3802_v31  ;;  %v3806_v13 = vpop.permute.xlu2 %949 }
 0x215   : > { %6073 = vst [vmem:[#allocation70_spill] sm:$0xff] %v3804_v21 }
 0x216   : > { %6074 = vst [vmem:[#allocation71_spill] sm:$0xff] %v3806_v13 }
 0x21b   : > { %1195 = vperm.xlu2 %3194, %v3404_v10   ;;  %v3809_v37 = vpop.permute.xlu0 %939  ;;  %v3811_v16 = vpop.permute.xlu1 %941 }
 0x21c   : > { %6075 = vst [vmem:[#allocation72_spill] sm:$0xff] %v3809_v37  ;;  %v3813_v24 = vpop.permute.xlu2 %955 }
 0x21d   : > { %6076 = vst [vmem:[#allocation73_spill] sm:$0xff] %v3811_v16 }
 0x21e   : > { %6077 = vst [vmem:[#allocation74_spill] sm:$0xff] %v3813_v24 }
 0x223   : > { %v3815_v38 = vpop.permute.xlu0 %945  ;;  %v3817_v36 = vpop.permute.xlu1 %947 }
 0x224   : > { %6078 = vst [vmem:[#allocation75_spill] sm:$0xff] %v3815_v38  ;;  %v3819_v18 = vpop.permute.xlu2 %961 }
 0x225   : > { %6079 = vst [vmem:[#allocation76_spill] sm:$0xff] %v3817_v36 }
 0x226   : > { %6080 = vst [vmem:[#allocation77_spill] sm:$0xff] %v3819_v18 }
 0x22b   : > { %v3821_v62 = vpop.permute.xlu0 %951  ;;  %v3823_v31 = vpop.permute.xlu1 %953 }
 0x22c   : > { %6081 = vst [vmem:[#allocation78_spill] sm:$0xff] %v3821_v62  ;;  %v3825_v21 = vpop.permute.xlu2 %967 }
 0x22d   : > { %6082 = vst [vmem:[#allocation79_spill] sm:$0xff] %v3823_v31 }
 0x22e   : > { %6083 = vst [vmem:[#allocation80_spill] sm:$0xff] %v3825_v21 }
 0x233   : > { %v3827_v13 = vpop.permute.xlu0 %957  ;;  %v3829_v26 = vpop.permute.xlu1 %959 }
 0x234   : > { %6084 = vst [vmem:[#allocation81_spill] sm:$0xff] %v3827_v13  ;;  %v3831_v37 = vpop.permute.xlu2 %1071 }
 0x235   : > { %6085 = vst [vmem:[#allocation82_spill] sm:$0xff] %v3829_v26 }
 0x23b   : > { %v3833_v16 = vpop.permute.xlu0 %963  ;;  %v3835_v24 = vpop.permute.xlu1 %965 }
 0x23c   : > { %6086 = vst [vmem:[#allocation83_spill] sm:$0xff] %v3833_v16  ;;  %v3837_v38 = vpop.permute.xlu2 %1083 }
 0x23d   : > { %6087 = vst [vmem:[#allocation84_spill] sm:$0xff] %v3835_v24 }
 0x243   : > { %v3839_v36 = vpop.permute.xlu0 %969  ;;  %v3841_v18 = vpop.permute.xlu1 %971 }
 0x244   : > { %6088 = vst [vmem:[#allocation85_spill] sm:$0xff] %v3839_v36  ;;  %v3847_v21 = vpop.permute.xlu2 %1091 }
 0x245   : > { %6089 = vst [vmem:[#allocation86_spill] sm:$0xff] %v3841_v18 }
 0x246   : > { %6090 = vst [vmem:[#allocation87_spill] sm:$0xff] %v3847_v21 }
 0x24b   : > { %v3843_v62 = vpop.permute.xlu0 %1075  ;;  %v3845_v31 = vpop.permute.xlu1 %1079 }
 0x24c   : > { %v3853_v56 = vpop.permute.xlu2 %1103 }
 0x24d   : > { %6093 = vst [vmem:[#allocation90_spill] sm:$0xff] %v3853_v56 }
 0x253   : > { %v3849_v13 = vpop.permute.xlu0 %1095  ;;  %v3851_v26 = vpop.permute.xlu1 %1087 }
 0x254   : > { %6091 = vst [vmem:[#allocation88_spill] sm:$0xff] %v3849_v13  ;;  %v3859_v20 = vpop.permute.xlu2 %1115 }
 0x255   : > { %6092 = vst [vmem:[#allocation89_spill] sm:$0xff] %v3851_v26 }
 0x256   : > { %6096 = vst [vmem:[#allocation93_spill] sm:$0xff] %v3859_v20 }
 0x25b   : > { %v3855_v16 = vpop.permute.xlu0 %1107  ;;  %v3857_v24 = vpop.permute.xlu1 %1099 }
 0x25c   : > { %6094 = vst [vmem:[#allocation91_spill] sm:$0xff] %v3855_v16 }
 0x25d   : > { %6095 = vst [vmem:[#allocation92_spill] sm:$0xff] %v3857_v24  ;;  %v1164_v55 = vpop.permute.xlu2 %1163 }
 0x25e   : > { %v1206_v59 = vmul.f32 %v1164_v55, %v3493_v40 }
 0x263   : > { %v3861_v36 = vpop.permute.xlu1 %1111 }
 0x264   : > { %6097 = vst [vmem:[#allocation94_spill] sm:$0xff] %v3861_v36  ;;  %v1156_v18 = vpop.permute.xlu0 %1155 }
 0x265   : > { %v1202_v22 = vmul.f32 %v1156_v18, %v3466_v25  ;;  %v1203_v14 = vmul.f32 %v1156_v18, %v3469_v27  ;;  %v1207_v18 = vmul.f32 %v1164_v55, %v3490_v39  ;;  %v1172_v48 = vpop.permute.xlu2 %1171 }
 0x267   : > { %1252 = vrot.lane.b32.xlu2 %v1203_v14, %s3293_s21  ;;  %1250 = vrot.lane.b32.xlu1 %v1202_v22, %s3293_s21 }
 0x26d   : > { %v1160_v49 = vpop.permute.xlu1 %1159 }
 0x26e   : > { %v1204_v23 = vmul.f32 %v1160_v49, %v3482_v34  ;;  %v1205_v28 = vmul.f32 %v1160_v49, %v3479_v33  ;;  %v1176_v49 = vpop.permute.xlu0 %1175 }
 0x26f   : > { %1258 = vrot.lane.b32.xlu2 %v1206_v59, %s3293_s21  ;;  %v1210_v59 = vmul.f32 %v1172_v48, %v3515_v52 }
 0x270   : > { %1256 = vrot.lane.b32.xlu1 %v1205_v28, %s3293_s21  ;;  %1254 = vrot.lane.b32.xlu0 %v1204_v23, %s3293_s21  ;;  %v1211_v28 = vmul.f32 %v1172_v48, %v3512_v51  ;;  %v1212_v23 = vmul.f32 %v1176_v49, %v3526_v58 }
 0x275   : > { %v1168_v17 = vpop.permute.xlu1 %1167 }
 0x276   : > { %v1208_v14 = vmul.f32 %v1168_v17, %v3504_v46  ;;  %v1209_v22 = vmul.f32 %v1168_v17, %v3501_v45  ;;  %v3298_v17 = vmov 7   ;;  %v1188_v48 = vpop.permute.xlu0 %1187 }
 0x277   : > { %3195 = vset.pattern.permute.xlu1 %v3298_v17  ;;  %3197 = vset.pattern.permute.xlu0 %v3298_v17 }
 0x278   : > { %1262 = vrot.lane.b32.xlu1 %v1208_v14, %s3293_s21  ;;  %1260 = vrot.lane.b32.xlu0 %v1207_v18, %s3293_s21  ;;  %v1213_v18 = vmul.f32 %v1176_v49, %v3523_v57 }
 0x279   : > { %1264 = vrot.lane.b32.xlu2 %v1209_v22, %s3293_s21 }
 0x27a   : > { %3196 = vset.pattern.permute.xlu2 %v3298_v17  ;;  %v1218_v17 = vmul.f32 %v1188_v48, %v3559_v43 }
 0x27d   : > { %v1180_v55 = vpop.permute.xlu1 %1179 }
 0x27e   : > { %v1214_v14 = vmul.f32 %v1180_v55, %v3537_v2  ;;  %v1215_v22 = vmul.f32 %v1180_v55, %v3534_v63  ;;  %v1219_v55 = vmul.f32 %v1188_v48, %v3556_v42 }
 0x280   : > { %1268 = vrot.lane.b32.xlu1 %v1211_v28, %s3293_s21  ;;  %1266 = vrot.lane.b32.xlu0 %v1210_v59, %s3293_s21  ;;  %v1184_v59 = vpop.permute.xlu2 %1183 }
 0x281   : > { %1270 = vrot.lane.b32.xlu2 %v1212_v23, %s3293_s21  ;;  %v1216_v28 = vmul.f32 %v1184_v59, %v3548_v32  ;;  %v1217_v23 = vmul.f32 %v1184_v59, %v3545_v30  ;;  %v1200_v59 = vpop.permute.xlu0 %1199 }
 0x282   : > { %v1225_v48 = vmul.f32 %v1200_v59, %v3589_v29 }
 0x285   : > { %v1192_v49 = vpop.permute.xlu1 %1191 }
 0x288   : > { %1274 = vrot.lane.b32.xlu1 %v1214_v14, %s3293_s21  ;;  %1272 = vrot.lane.b32.xlu0 %v1213_v18, %s3293_s21  ;;  %v1220_v18 = vmul.f32 %v1192_v49, %v3570_v53  ;;  %v1221_v14 = vmul.f32 %v1192_v49, %v3567_v50 }
 0x289   : > { %1276 = vrot.lane.b32.xlu2 %v1215_v22, %s3293_s21  ;;  %v1196_v22 = vpop.permute.xlu2 %1195 }
 0x290   : > { %1280 = vrot.lane.b32.xlu1 %v1217_v23, %s3293_s21  ;;  %1278 = vrot.lane.b32.xlu0 %v1216_v28, %s3293_s21  ;;  %v1222_v23 = vmul.f32 %v1196_v22, %v3581_v61  ;;  %v1223_v28 = vmul.f32 %v1196_v22, %v3578_v60 }
 0x291   : > { %1282 = vrot.lane.b32.xlu2 %v1218_v17, %s3293_s21  ;;  %v1224_v17 = vmul.f32 %v1200_v59, %v3592_v35 }
 0x298   : > { %1286 = vrot.lane.b32.xlu1 %v1220_v18, %s3293_s21  ;;  %1284 = vrot.lane.b32.xlu0 %v1219_v55, %s3293_s21 }
 0x299   : > { %1288 = vrot.lane.b32.xlu2 %v1221_v14, %s3293_s21 }
 0x2a0   : > { %1292 = vrot.lane.b32.xlu1 %v1223_v28, %s3293_s21  ;;  %1290 = vrot.lane.b32.xlu0 %v1222_v23, %s3293_s21 }
 0x2a1   : > { %1294 = vrot.lane.b32.xlu2 %v1224_v17, %s3293_s21 }
 0x2a8   : > { %1383 = vperm.xlu1 %3195, %v3355_v1   ;;  %1296 = vrot.lane.b32.xlu0 %v1225_v48, %s3293_s21 }
 0x2a9   : > { %1387 = vperm.xlu2 %3196, %v3373_v5  }
 0x2b0   : > { %1395 = vperm.xlu1 %3195, %v3368_v4   ;;  %1391 = vperm.xlu0 %3197, %v3350_v0  }
 0x2b1   : > { %1399 = vperm.xlu2 %3196, %v3360_v3  }
 0x2b8   : > { %1403 = vperm.xlu1 %3195, %v3378_v6   ;;  %1411 = vperm.xlu0 %3197, %v3386_v7  }
 0x2b9   : > { %1407 = vperm.xlu2 %3196, %v3391_v8  }
 0x2c0   : > { %1415 = vperm.xlu1 %3195, %v3396_v9   ;;  %1423 = vperm.xlu0 %3197, %v3404_v10  }
 0x2c1   : > { %1419 = vperm.xlu2 %3196, %v3409_v11   ;;  %v3923_v1 = vpop.permute.xlu2 %1252 }
 0x2c8   : > { %1427 = vperm.xlu1 %3195, %v3414_v12  }
 0x2c9   : > { %v3927_v0 = vpop.permute.xlu2 %1258 }
 0x2d3   : > { %v3933_v6 = vpop.permute.xlu2 %1264 }
 0x2d4   : > { %6098 = vst [vmem:[#allocation95_spill] sm:$0xff] %v3933_v6  ;;  %v4337_v6 = vld [vmem:[%s3463_s20 + $0xb0] sm:$0xff] }
 0x2d9   : > { %v3925_v4 = vpop.permute.xlu1 %1250 }
 0x2db   : > { %v3939_v9 = vpop.permute.xlu2 %1270 }
 0x2dc   : > { %6099 = vst [vmem:[#allocation96_spill] sm:$0xff] %v3939_v9 }
 0x2e2   : > { %v3929_v3 = vpop.permute.xlu0 %1254  ;;  %v3931_v5 = vpop.permute.xlu1 %1256 }
 0x2e3   : > { %v3945_v12 = vpop.permute.xlu2 %1276 }
 0x2e4   : > { %6102 = vst [vmem:[#allocation99_spill] sm:$0xff] %v3945_v12  ;;  %v4238_v12 = vld [vmem:[%s3463_s20 + $0x20] sm:$0xff] }
 0x2ea   : > { %v3935_v7 = vpop.permute.xlu1 %1262  ;;  %v3937_v8 = vpop.permute.xlu0 %1260 }
 0x2eb   : > { %v3955_v22 = vpop.permute.xlu2 %1282 }
 0x2ec   : > { %6107 = vst [vmem:[#allocation104_spill] sm:$0xff] %v3955_v22 }
 0x2f2   : > { %v3941_v10 = vpop.permute.xlu1 %1268  ;;  %v3943_v11 = vpop.permute.xlu0 %1266 }
 0x2f3   : > { %6100 = vst [vmem:[#allocation97_spill] sm:$0xff] %v3941_v10  ;;  %v3961_v28 = vpop.permute.xlu2 %1288 }
 0x2f4   : > { %6101 = vst [vmem:[#allocation98_spill] sm:$0xff] %v3943_v11 }
 0x2f5   : > { %6110 = vst [vmem:[#allocation107_spill] sm:$0xff] %v3961_v28 }
 0x2fa   : > { %v3947_v49 = vpop.permute.xlu1 %1274  ;;  %v3949_v55 = vpop.permute.xlu0 %1272 }
 0x2fb   : > { %6103 = vst [vmem:[#allocation100_spill] sm:$0xff] %v3947_v49  ;;  %v3967_v54 = vpop.permute.xlu2 %1294 }
 0x2fc   : > { %6104 = vst [vmem:[#allocation101_spill] sm:$0xff] %v3949_v55  ;;  %v4271_v55 = vld [vmem:[%s3463_s20 + $0x50] sm:$0xff] }
 0x2fd   : > { %6113 = vst [vmem:[#allocation110_spill] sm:$0xff] %v3967_v54 }
 0x302   : > { %v3951_v18 = vpop.permute.xlu1 %1280  ;;  %v3953_v14 = vpop.permute.xlu0 %1278 }
 0x303   : > { %6105 = vst [vmem:[#allocation102_spill] sm:$0xff] %v3951_v18  ;;  %v1388_v20 = vpop.permute.xlu2 %1387 }
 0x304   : > { %6106 = vst [vmem:[#allocation103_spill] sm:$0xff] %v3953_v14  ;;  %v1434_v54 = vmul.f32 %v1388_v20, %v3479_v33 }
 0x30a   : > { %v3957_v59 = vpop.permute.xlu1 %1286  ;;  %v3959_v23 = vpop.permute.xlu0 %1284 }
 0x30b   : > { %6108 = vst [vmem:[#allocation105_spill] sm:$0xff] %v3957_v59 }
 0x30c   : > { %6109 = vst [vmem:[#allocation106_spill] sm:$0xff] %v3959_v23 }
 0x312   : > { %v3963_v17 = vpop.permute.xlu1 %1292  ;;  %v3965_v48 = vpop.permute.xlu0 %1290 }
 0x313   : > { %6111 = vst [vmem:[#allocation108_spill] sm:$0xff] %v3963_v17  ;;  %v1433_v17 = vmul.f32 %v1388_v20, %v3482_v34 }
 0x314   : > { %6112 = vst [vmem:[#allocation109_spill] sm:$0xff] %v3965_v48  ;;  %v1435_v48 = vmul.f32 0.0, %v1388_v20 }
 0x31a   : > { %v1384_v44 = vpop.permute.xlu1 %1383  ;;  %v3973_v41 = vpop.permute.xlu0 %1296 }
 0x31b   : > { %v1430_v19 = vmul.f32 %v1384_v44, %v3466_v25  ;;  %v1431_v15 = vmul.f32 %v1384_v44, %v3469_v27  ;;  %v1432_v47 = vmul.f32 0.0, %v1384_v44  ;;  %6114 = vst [vmem:[#allocation111_spill] sm:$0xff] %v3973_v41 }
 0x31d   : > { %1502 = vrot.lane.b32.xlu2 %v1430_v19, %s3295_s22  ;;  %1506 = vrot.lane.b32.xlu1 %v1432_v47, %s3295_s22 }
 0x31e   : > { %1504 = vrot.lane.b32.xlu0 %v1431_v15, %s3295_s22 }
 0x322   : > { %v1392_v25 = vpop.permute.xlu0 %1391  ;;  %v1396_v15 = vpop.permute.xlu1 %1395 }
 0x323   : > { %v1436_v27 = vmul.f32 %v1392_v25, %v3493_v40  ;;  %v1438_v44 = vmul.f32 0.0, %v1392_v25  ;;  %v1437_v47 = vmul.f32 %v1392_v25, %v3490_v39  ;;  %v1439_v33 = vmul.f32 %v1396_v15, %v3504_v46  ;;  %v1400_v40 = vpop.permute.xlu2 %1399 }
 0x324   : > { %v1441_v34 = vmul.f32 0.0, %v1396_v15  ;;  %v1440_v19 = vmul.f32 %v1396_v15, %v3501_v45  ;;  %v1442_v39 = vmul.f32 %v1400_v40, %v3515_v52  ;;  %v1443_v20 = vmul.f32 %v1400_v40, %v3512_v51 }
 0x325   : > { %1508 = vrot.lane.b32.xlu2 %v1433_v17, %s3295_s22  ;;  %1512 = vrot.lane.b32.xlu1 %v1435_v48, %s3295_s22 }
 0x326   : > { %1510 = vrot.lane.b32.xlu0 %v1434_v54, %s3295_s22  ;;  %v1444_v54 = vmul.f32 0.0, %v1400_v40 }
 0x32a   : > { %v1404_v46 = vpop.permute.xlu1 %1403 }
 0x32b   : > { %v1445_v45 = vmul.f32 %v1404_v46, %v3526_v58  ;;  %v1447_v17 = vmul.f32 0.0, %v1404_v46  ;;  %v1446_v48 = vmul.f32 %v1404_v46, %v3523_v57  ;;  %v1408_v52 = vpop.permute.xlu2 %1407  ;;  %v1412_v58 = vpop.permute.xlu0 %1411 }
 0x32c   : > { %v1448_v51 = vmul.f32 %v1408_v52, %v3537_v2  ;;  %v1450_v25 = vmul.f32 0.0, %v1408_v52  ;;  %v1451_v57 = vmul.f32 %v1412_v58, %v3548_v32 }
 0x32d   : > { %1514 = vrot.lane.b32.xlu2 %v1436_v27, %s3295_s22  ;;  %1518 = vrot.lane.b32.xlu1 %v1438_v44, %s3295_s22  ;;  %v1449_v27 = vmul.f32 %v1408_v52, %v3534_v63  ;;  %v1453_v44 = vmul.f32 0.0, %v1412_v58  ;;  %v3299_v63 = vmov 2   ;;  %v4068_v52 = vld [vmem:[%s5823_s1 + $0x30] sm:$0xff] }
 0x32e   : > { %1516 = vrot.lane.b32.xlu0 %v1437_v47, %s3295_s22  ;;  %v1452_v47 = vmul.f32 %v1412_v58, %v3545_v30  ;;  %3198 = vset.pattern.permute.xlu2 %v3299_v63  ;;  %v4088_v58 = vld [vmem:[%s5823_s1 + $0x48] sm:$0xff] }
 0x32f   : > { %3200 = vset.pattern.permute.xlu1 %v3299_v63  ;;  %3199 = vset.pattern.permute.xlu0 %v3299_v63  ;;  %v4106_v63 = vld [vmem:[%s5823_s1 + $0x50] sm:$0xff] }
 0x332   : > { %v1416_v2 = vpop.permute.xlu1 %1415 }
 0x333   : > { %v1454_v15 = vmul.f32 %v1416_v2, %v3559_v43  ;;  %v1420_v30 = vpop.permute.xlu2 %1419  ;;  %v1424_v43 = vpop.permute.xlu0 %1423 }
 0x334   : > { %v1457_v32 = vmul.f32 %v1420_v30, %v3570_v53  ;;  %v1458_v40 = vmul.f32 %v1420_v30, %v3567_v50 }
 0x335   : > { %1520 = vrot.lane.b32.xlu2 %v1439_v33, %s3295_s22  ;;  %1524 = vrot.lane.b32.xlu1 %v1441_v34, %s3295_s22  ;;  %v1456_v33 = vmul.f32 0.0, %v1416_v2  ;;  %v1455_v34 = vmul.f32 %v1416_v2, %v3556_v42  ;;  %v1460_v42 = vmul.f32 %v1424_v43, %v3581_v61  ;;  %v4100_v2 = vld [vmem:[%s5823_s1 + $0x40] sm:$0xff] }
 0x336   : > { %1522 = vrot.lane.b32.xlu0 %v1440_v19, %s3295_s22  ;;  %v1459_v19 = vmul.f32 0.0, %v1420_v30 }
 0x33a   : > { %v1428_v53 = vpop.permute.xlu1 %1427 }
 0x33b   : > { %v1463_v50 = vmul.f32 %v1428_v53, %v3592_v35  ;;  %v1464_v46 = vmul.f32 %v1428_v53, %v3589_v29  ;;  %v4042_v35 = vld [vmem:[%s5823_s1 + $0x10] sm:$0xff]  ;;  %v4048_v29 = vld [vmem:[%s5823_s1 + $0x8] sm:$0xff] }
 0x33d   : > { %1526 = vrot.lane.b32.xlu2 %v1442_v39, %s3295_s22  ;;  %1530 = vrot.lane.b32.xlu1 %v1444_v54, %s3295_s22  ;;  %v1462_v39 = vmul.f32 0.0, %v1424_v43  ;;  %v1461_v54 = vmul.f32 %v1424_v43, %v3578_v60  ;;  %v4036_v60 = vld [vmem:[%s5823_s1] sm:$0xff] }
 0x33e   : > { %1528 = vrot.lane.b32.xlu0 %v1443_v20, %s3295_s22  ;;  %v1465_v20 = vmul.f32 0.0, %v1428_v53 }
 0x345   : > { %1532 = vrot.lane.b32.xlu2 %v1445_v45, %s3295_s22  ;;  %1536 = vrot.lane.b32.xlu1 %v1447_v17, %s3295_s22  ;;  %v4056_v17 = vld [vmem:[%s5823_s1 + $0x18] sm:$0xff] }
 0x346   : > { %1534 = vrot.lane.b32.xlu0 %v1446_v48, %s3295_s22  ;;  %v4062_v48 = vld [vmem:[%s5823_s1 + $0x20] sm:$0xff] }
 0x34d   : > { %1538 = vrot.lane.b32.xlu2 %v1448_v51, %s3295_s22  ;;  %1542 = vrot.lane.b32.xlu1 %v1450_v25, %s3295_s22  ;;  %v4076_v25 = vld [vmem:[%s5823_s1 + $0x28] sm:$0xff] }
 0x34e   : > { %1540 = vrot.lane.b32.xlu0 %v1449_v27, %s3295_s22  ;;  %v4082_v27 = vld [vmem:[%s5823_s1 + $0x38] sm:$0xff] }
 0x355   : > { %1544 = vrot.lane.b32.xlu2 %v1451_v57, %s3295_s22  ;;  %1548 = vrot.lane.b32.xlu1 %v1453_v44, %s3295_s22 }
 0x356   : > { %1546 = vrot.lane.b32.xlu0 %v1452_v47, %s3295_s22 }
 0x35d   : > { %1550 = vrot.lane.b32.xlu2 %v1454_v15, %s3295_s22  ;;  %1554 = vrot.lane.b32.xlu1 %v1456_v33, %s3295_s22  ;;  %v3300_v15 = vmov 5  }
 0x35e   : > { %1552 = vrot.lane.b32.xlu0 %v1455_v34, %s3295_s22 }
 0x365   : > { %1556 = vrot.lane.b32.xlu2 %v1457_v32, %s3295_s22  ;;  %1560 = vrot.lane.b32.xlu1 %v1459_v19, %s3295_s22  ;;  %v4119_v32 = vld [vmem:[%s5823_s1 + $0x58] sm:$0xff] }
 0x366   : > { %1558 = vrot.lane.b32.xlu0 %v1458_v40, %s3295_s22 }
 0x36d   : > { %1562 = vrot.lane.b32.xlu2 %v1460_v42, %s3295_s22  ;;  %1566 = vrot.lane.b32.xlu1 %v1462_v39, %s3295_s22 }
 0x36e   : > { %1564 = vrot.lane.b32.xlu0 %v1461_v54, %s3295_s22 }
 0x375   : > { %1568 = vrot.lane.b32.xlu2 %v1463_v50, %s3295_s22  ;;  %1572 = vrot.lane.b32.xlu1 %v1465_v20, %s3295_s22 }
 0x376   : > { %1570 = vrot.lane.b32.xlu0 %v1464_v46, %s3295_s22 }
 0x377   : > { %v4031_v61 = vpop.permute.xlu2 %1502 }
 0x37d   : > { %1671 = vperm.xlu2 %3198, %v4036_v60   ;;  %1679 = vperm.xlu1 %3200, %v4042_v35  }
 0x37e   : > { %1675 = vperm.xlu0 %3199, %v4048_v29  }
 0x37f   : > { %v4051_v45 = vpop.permute.xlu2 %1508 }
 0x385   : > { %1683 = vperm.xlu2 %3198, %v4056_v17   ;;  %1687 = vperm.xlu1 %3200, %v4062_v48  }
 0x386   : > { %1695 = vperm.xlu0 %3199, %v4068_v52  }
 0x387   : > { %v4071_v51 = vpop.permute.xlu2 %1514 }
 0x38d   : > { %1691 = vperm.xlu2 %3198, %v4076_v25   ;;  %1699 = vperm.xlu1 %3200, %v4082_v27  }
 0x38e   : > { %1707 = vperm.xlu0 %3199, %v4088_v58  }
 0x38f   : > { %v4091_v57 = vpop.permute.xlu1 %1506  ;;  %v4093_v44 = vpop.permute.xlu2 %1520 }
 0x390   : > { %6115 = vst [vmem:[#allocation112_spill] sm:$0xff] %v4093_v44  ;;  %v4095_v47 = vpop.permute.xlu0 %1504 }
 0x395   : > { %1703 = vperm.xlu2 %3198, %v4100_v2   ;;  %1711 = vperm.xlu1 %3200, %v4106_v63  }
 0x396   : > { %3201 = vset.pattern.permute.xlu0 %v3300_v15 }
 0x397   : > { %1755 = vperm.xlu0 %3201, %v4036_v60   ;;  %v4110_v33 = vpop.permute.xlu1 %1512  ;;  %v4112_v34 = vpop.permute.xlu2 %1526 }
 0x398   : > { %6116 = vst [vmem:[#allocation113_spill] sm:$0xff] %v4112_v34  ;;  %v4114_v30 = vpop.permute.xlu0 %1510 }
 0x39d   : > { %1715 = vperm.xlu2 %3198, %v4119_v32   ;;  %3202 = vset.pattern.permute.xlu1 %v3300_v15 }
 0x39e   : > { %1759 = vperm.xlu1 %3202, %v4048_v29  }
 0x39f   : > { %1775 = vperm.xlu0 %3201, %v4076_v25   ;;  %v4124_v19 = vpop.permute.xlu1 %1518  ;;  %v4126_v40 = vpop.permute.xlu2 %1532 }
 0x3a0   : > { %6117 = vst [vmem:[#allocation114_spill] sm:$0xff] %v4126_v40  ;;  %v4128_v43 = vpop.permute.xlu0 %1516 }
 0x3a5   : > { %3203 = vset.pattern.permute.xlu2 %v3300_v15 }
 0x3a6   : > { %1763 = vperm.xlu2 %3203, %v4042_v35   ;;  %1767 = vperm.xlu1 %3202, %v4056_v17  }
 0x3a7   : > { %1787 = vperm.xlu0 %3201, %v4100_v2   ;;  %v4133_v42 = vpop.permute.xlu1 %1524  ;;  %v4137_v54 = vpop.permute.xlu2 %1538 }
 0x3a8   : > { %6118 = vst [vmem:[#allocation115_spill] sm:$0xff] %v4133_v42  ;;  %v4135_v39 = vpop.permute.xlu0 %1522  ;;  %v4315_v42 = vld [vmem:[%s3463_s20 + $0x90] sm:$0xff] }
 0x3a9   : > { %6119 = vst [vmem:[#allocation116_spill] sm:$0xff] %v4135_v39  ;;  %v4326_v39 = vld [vmem:[%s3463_s20 + $0xa0] sm:$0xff] }
 0x3aa   : > { %6120 = vst [vmem:[#allocation117_spill] sm:$0xff] %v4137_v54 }
 0x3ae   : > { %1771 = vperm.xlu2 %3203, %v4062_v48   ;;  %1779 = vperm.xlu1 %3202, %v4068_v52  }
 0x3af   : > { %1799 = vperm.xlu0 %3201, %v4119_v32   ;;  %v4142_v53 = vpop.permute.xlu1 %1530  ;;  %v4146_v20 = vpop.permute.xlu2 %1544 }
 0x3b0   : > { %6121 = vst [vmem:[#allocation118_spill] sm:$0xff] %v4142_v53  ;;  %v4144_v50 = vpop.permute.xlu0 %1528  ;;  %v4282_v53 = vld [vmem:[%s3463_s20 + $0x60] sm:$0xff] }
 0x3b1   : > { %6122 = vst [vmem:[#allocation119_spill] sm:$0xff] %v4144_v50  ;;  %v4293_v50 = vld [vmem:[%s3463_s20 + $0x70] sm:$0xff] }
 0x3b2   : > { %6123 = vst [vmem:[#allocation120_spill] sm:$0xff] %v4146_v20 }
 0x3b6   : > { %1783 = vperm.xlu2 %3203, %v4082_v27   ;;  %1791 = vperm.xlu1 %3202, %v4088_v58  }
 0x3b7   : > { %v4150_v46 = vpop.permute.xlu1 %1536  ;;  %v4154_v41 = vpop.permute.xlu2 %1550 }
 0x3b8   : > { %6124 = vst [vmem:[#allocation121_spill] sm:$0xff] %v4150_v46  ;;  %v4152_v15 = vpop.permute.xlu0 %1534  ;;  %v4249_v46 = vld [vmem:[%s3463_s20 + $0x30] sm:$0xff] }
 0x3b9   : > { %6125 = vst [vmem:[#allocation122_spill] sm:$0xff] %v4152_v15  ;;  %v4260_v15 = vld [vmem:[%s3463_s20 + $0x40] sm:$0xff] }
 0x3ba   : > { %6126 = vst [vmem:[#allocation123_spill] sm:$0xff] %v4154_v41 }
 0x3be   : > { %1795 = vperm.xlu2 %3203, %v4106_v63  }
 0x3bf   : > { %v4157_v36 = vpop.permute.xlu1 %1542  ;;  %v4161_v59 = vpop.permute.xlu2 %1556 }
 0x3c0   : > { %6127 = vst [vmem:[#allocation124_spill] sm:$0xff] %v4157_v36  ;;  %v4159_v28 = vpop.permute.xlu0 %1540 }
 0x3c1   : > { %6128 = vst [vmem:[#allocation125_spill] sm:$0xff] %v4159_v28  ;;  %v4227_v28 = vld [vmem:[%s3463_s20 + $0x18] sm:$0xff] }
 0x3c2   : > { %6129 = vst [vmem:[#allocation126_spill] sm:$0xff] %v4161_v59 }
 0x3c7   : > { %v4163_v16 = vpop.permute.xlu1 %1548  ;;  %v4171_v18 = vpop.permute.xlu2 %1562 }
 0x3c8   : > { %6130 = vst [vmem:[#allocation127_spill] sm:$0xff] %v4163_v16  ;;  %v4165_v23 = vpop.permute.xlu0 %1546 }
 0x3c9   : > { %6131 = vst [vmem:[#allocation128_spill] sm:$0xff] %v4165_v23 }
 0x3ca   : > { %6134 = vst [vmem:[#allocation131_spill] sm:$0xff] %v4171_v18 }
 0x3cf   : > { %v4167_v22 = vpop.permute.xlu1 %1554  ;;  %v4177_v14 = vpop.permute.xlu2 %1568 }
 0x3d0   : > { %6132 = vst [vmem:[#allocation129_spill] sm:$0xff] %v4167_v22  ;;  %v4169_v56 = vpop.permute.xlu0 %1552 }
 0x3d1   : > { %6133 = vst [vmem:[#allocation130_spill] sm:$0xff] %v4169_v56 }
 0x3d2   : > { %6137 = vst [vmem:[#allocation134_spill] sm:$0xff] %v4177_v14 }
 0x3d7   : > { %v4173_v20 = vpop.permute.xlu1 %1560  ;;  %v4183_v16 = vpop.permute.xlu2 %1671 }
 0x3d8   : > { %6135 = vst [vmem:[#allocation132_spill] sm:$0xff] %v4173_v20  ;;  %v4175_v41 = vpop.permute.xlu0 %1558 }
 0x3d9   : > { %6136 = vst [vmem:[#allocation133_spill] sm:$0xff] %v4175_v41 }
 0x3da   : > { %6140 = vst [vmem:[#allocation137_spill] sm:$0xff] %v4183_v16 }
 0x3df   : > { %v4179_v36 = vpop.permute.xlu1 %1566  ;;  %v4189_v56 = vpop.permute.xlu2 %1683 }
 0x3e0   : > { %6138 = vst [vmem:[#allocation135_spill] sm:$0xff] %v4179_v36  ;;  %v4181_v59 = vpop.permute.xlu0 %1564 }
 0x3e1   : > { %6139 = vst [vmem:[#allocation136_spill] sm:$0xff] %v4181_v59 }
 0x3e2   : > { %6143 = vst [vmem:[#allocation140_spill] sm:$0xff] %v4189_v56 }
 0x3e7   : > { %v4185_v23 = vpop.permute.xlu1 %1572  ;;  %v4199_v36 = vpop.permute.xlu2 %1691 }
 0x3e8   : > { %6141 = vst [vmem:[#allocation138_spill] sm:$0xff] %v4185_v23  ;;  %v4187_v22 = vpop.permute.xlu0 %1570 }
 0x3e9   : > { %6142 = vst [vmem:[#allocation139_spill] sm:$0xff] %v4187_v22 }
 0x3ea   : > { %6148 = vst [vmem:[#allocation145_spill] sm:$0xff] %v4199_v36 }
 0x3ef   : > { %v4191_v18 = vpop.permute.xlu1 %1679  ;;  %v4205_v23 = vpop.permute.xlu2 %1703 }
 0x3f0   : > { %6144 = vst [vmem:[#allocation141_spill] sm:$0xff] %v4191_v18  ;;  %v4193_v20 = vpop.permute.xlu0 %1675  ;;  %v4210_v18 = vld [vmem:[%s3463_s20] sm:$0xff] }
 0x3f1   : > { %6145 = vst [vmem:[#allocation142_spill] sm:$0xff] %v4193_v20 }
 0x3f2   : > { %6151 = vst [vmem:[#allocation148_spill] sm:$0xff] %v4205_v23 }
 0x3f7   : > { %v4195_v41 = vpop.permute.xlu1 %1687 }
 0x3f8   : > { %6146 = vst [vmem:[#allocation143_spill] sm:$0xff] %v4195_v41  ;;  %v4197_v14 = vpop.permute.xlu0 %1695  ;;  %v4214_v41 = vld [vmem:[%s3463_s20 + $0x8] sm:$0xff] }
 0x3f9   : > { %6147 = vst [vmem:[#allocation144_spill] sm:$0xff] %v4197_v14 }
 0x3ff   : > { %v4201_v59 = vpop.permute.xlu1 %1699 }
 0x400   : > { %6149 = vst [vmem:[#allocation146_spill] sm:$0xff] %v4201_v59  ;;  %v4203_v16 = vpop.permute.xlu0 %1707  ;;  %v4219_v59 = vpop.permute.xlu2 %1715 }
 0x401   : > { %6150 = vst [vmem:[#allocation147_spill] sm:$0xff] %v4203_v16  ;;  %v4223_v16 = vld [vmem:[%s3463_s20 + $0x10] sm:$0xff] }
 0x402   : > { %6153 = vst [vmem:[#allocation150_spill] sm:$0xff] %v4219_v59 }
 0x407   : > { %v4207_v22 = vpop.permute.xlu1 %1711 }
 0x408   : > { %6152 = vst [vmem:[#allocation149_spill] sm:$0xff] %v4207_v22 }
 0x409   : > { %v1756_v56 = vpop.permute.xlu0 %1755 }
 0x40a   : > { %v1802_v20 = vmul.f32 %v4210_v18, %v1756_v56  ;;  %v1803_v14 = vmul.f32 %v4214_v41, %v1756_v56  ;;  %v1804_v36 = vmul.f32 0.0, %v1756_v56 }
 0x40c   : > { %1878 = vrot.lane.b32.xlu0 %v1804_v36, %s3293_s21  ;;  %1876 = vrot.lane.b32.xlu2 %v1803_v14, %s3293_s21  ;;  %v1764_v36 = vpop.permute.xlu2 %1763  ;;  %v4234_v14 = vld [vmem:[%s3463_s20 + $0x28] sm:$0xff] }
 0x40d   : > { %1874 = vrot.lane.b32.xlu1 %v1802_v20, %s3293_s21  ;;  %v1809_v20 = vmul.f32 %v4234_v14, %v1764_v36  ;;  %v1810_v59 = vmul.f32 0.0, %v1764_v36  ;;  %v1808_v54 = vmul.f32 %v4238_v12, %v1764_v36 }
 0x410   : > { %v1760_v22 = vpop.permute.xlu1 %1759 }
 0x411   : > { %v1805_v23 = vmul.f32 %v4223_v16, %v1760_v22  ;;  %v1806_v24 = vmul.f32 %v4227_v28, %v1760_v22  ;;  %v1807_v56 = vmul.f32 0.0, %v1760_v22  ;;  %v4245_v22 = vld [vmem:[%s3463_s20 + $0x38] sm:$0xff] }
 0x414   : > { %1882 = vrot.lane.b32.xlu2 %v1806_v24, %s3293_s21  ;;  %1884 = vrot.lane.b32.xlu0 %v1807_v56, %s3293_s21 }
 0x415   : > { %1880 = vrot.lane.b32.xlu1 %v1805_v23, %s3293_s21 }
 0x418   : > { %v1768_v24 = vpop.permute.xlu1 %1767 }
 0x419   : > { %v1812_v23 = vmul.f32 %v4245_v22, %v1768_v24  ;;  %v1813_v56 = vmul.f32 0.0, %v1768_v24  ;;  %v1811_v49 = vmul.f32 %v4249_v46, %v1768_v24  ;;  %v1776_v24 = vpop.permute.xlu0 %1775 }
 0x41a   : > { %v1817_v40 = vmul.f32 %v4271_v55, %v1776_v24 }
 0x41c   : > { %1888 = vrot.lane.b32.xlu2 %v1809_v20, %s3293_s21  ;;  %1890 = vrot.lane.b32.xlu0 %v1810_v59, %s3293_s21  ;;  %v1772_v59 = vpop.permute.xlu2 %1771 }
 0x41d   : > { %1886 = vrot.lane.b32.xlu1 %v1808_v54, %s3293_s21  ;;  %v4256_v54 = vld [vmem:[%s3463_s20 + $0x48] sm:$0xff]  ;;  %v1816_v20 = vmul.f32 0.0, %v1772_v59  ;;  %v1814_v13 = vmul.f32 %v4260_v15, %v1772_v59 }
 0x41e   : > { %v1815_v36 = vmul.f32 %v4256_v54, %v1772_v59 }
 0x420   : > { %v1780_v59 = vpop.permute.xlu1 %1779 }
 0x421   : > { %v1820_v9 = vmul.f32 %v4282_v53, %v1780_v59 }
 0x424   : > { %1894 = vrot.lane.b32.xlu2 %v1812_v23, %s3293_s21  ;;  %1896 = vrot.lane.b32.xlu0 %v1813_v56, %s3293_s21  ;;  %v1819_v56 = vmul.f32 0.0, %v1776_v24 }
 0x425   : > { %1892 = vrot.lane.b32.xlu1 %v1811_v49, %s3293_s21  ;;  %v4267_v49 = vld [vmem:[%s3463_s20 + $0x58] sm:$0xff] }
 0x426   : > { %v1818_v23 = vmul.f32 %v4267_v49, %v1776_v24  ;;  %v1784_v24 = vpop.permute.xlu2 %1783 }
 0x427   : > { %v1823_v21 = vmul.f32 %v4293_v50, %v1784_v24 }
 0x42c   : > { %1900 = vrot.lane.b32.xlu2 %v1815_v36, %s3293_s21  ;;  %1902 = vrot.lane.b32.xlu0 %v1816_v20, %s3293_s21  ;;  %v1822_v20 = vmul.f32 0.0, %v1780_v59 }
 0x42d   : > { %1898 = vrot.lane.b32.xlu1 %v1814_v13, %s3293_s21  ;;  %v4278_v13 = vld [vmem:[%s3463_s20 + $0x68] sm:$0xff] }
 0x42e   : > { %v1821_v36 = vmul.f32 %v4278_v13, %v1780_v59  ;;  %v1788_v59 = vpop.permute.xlu0 %1787 }
 0x42f   : > { %v1828_v10 = vmul.f32 0.0, %v1788_v59 }
 0x434   : > { %1906 = vrot.lane.b32.xlu2 %v1818_v23, %s3293_s21  ;;  %1908 = vrot.lane.b32.xlu0 %v1819_v56, %s3293_s21  ;;  %v4289_v23 = vld [vmem:[%s3463_s20 + $0x78] sm:$0xff]  ;;  %v1825_v56 = vmul.f32 0.0, %v1784_v24 }
 0x435   : > { %1904 = vrot.lane.b32.xlu1 %v1817_v40, %s3293_s21  ;;  %v1824_v40 = vmul.f32 %v4289_v23, %v1784_v24  ;;  %v4304_v24 = vld [vmem:[%s3463_s20 + $0x80] sm:$0xff] }
 0x43c   : > { %1912 = vrot.lane.b32.xlu2 %v1821_v36, %s3293_s21  ;;  %1914 = vrot.lane.b32.xlu0 %v1822_v20, %s3293_s21  ;;  %v4300_v36 = vld [vmem:[%s3463_s20 + $0x88] sm:$0xff] }
 0x43d   : > { %1910 = vrot.lane.b32.xlu1 %v1820_v9, %s3293_s21  ;;  %v3301_v9 = vmov 8   ;;  %v1827_v20 = vmul.f32 %v4300_v36, %v1788_v59 }
 0x43e   : > { %3206 = vset.pattern.permute.xlu0 %v3301_v9  ;;  %3204 = vset.pattern.permute.xlu1 %v3301_v9 }
 0x43f   : > { %3205 = vset.pattern.permute.xlu2 %v3301_v9 }
 0x444   : > { %1918 = vrot.lane.b32.xlu2 %v1824_v40, %s3293_s21  ;;  %1920 = vrot.lane.b32.xlu0 %v1825_v56, %s3293_s21  ;;  %v1826_v40 = vmul.f32 %v4304_v24, %v1788_v59  ;;  %v4311_v56 = vld [vmem:[%s3463_s20 + $0x98] sm:$0xff]  ;;  %v4322_v59 = vld [vmem:[%s3463_s20 + $0xa8] sm:$0xff] }
 0x445   : > { %1916 = vrot.lane.b32.xlu1 %v1823_v21, %s3293_s21  ;;  %v1792_v21 = vpop.permute.xlu1 %1791 }
 0x446   : > { %v1830_v9 = vmul.f32 %v4311_v56, %v1792_v21  ;;  %v1831_v34 = vmul.f32 0.0, %v1792_v21  ;;  %v1829_v11 = vmul.f32 %v4315_v42, %v1792_v21  ;;  %v1800_v21 = vpop.permute.xlu0 %1799 }
 0x447   : > { %v1835_v44 = vmul.f32 %v4337_v6, %v1800_v21 }
 0x44c   : > { %1924 = vrot.lane.b32.xlu2 %v1827_v20, %s3293_s21  ;;  %1926 = vrot.lane.b32.xlu0 %v1828_v10, %s3293_s21  ;;  %v1796_v10 = vpop.permute.xlu2 %1795 }
 0x44d   : > { %1922 = vrot.lane.b32.xlu1 %v1826_v40, %s3293_s21  ;;  %v1833_v20 = vmul.f32 %v4322_v59, %v1796_v10  ;;  %v1834_v40 = vmul.f32 0.0, %v1796_v10  ;;  %v1832_v26 = vmul.f32 %v4326_v39, %v1796_v10 }
 0x454   : > { %1930 = vrot.lane.b32.xlu2 %v1830_v9, %s3293_s21  ;;  %1932 = vrot.lane.b32.xlu0 %v1831_v34, %s3293_s21  ;;  %v4333_v34 = vld [vmem:[%s3463_s20 + $0xb8] sm:$0xff]  ;;  %v1837_v9 = vmul.f32 0.0, %v1800_v21 }
 0x455   : > { %1928 = vrot.lane.b32.xlu1 %v1829_v11, %s3293_s21  ;;  %v1836_v11 = vmul.f32 %v4333_v34, %v1800_v21 }
 0x45c   : > { %1936 = vrot.lane.b32.xlu2 %v1833_v20, %s3293_s21  ;;  %1938 = vrot.lane.b32.xlu0 %v1834_v40, %s3293_s21 }
 0x45d   : > { %1934 = vrot.lane.b32.xlu1 %v1832_v26, %s3293_s21 }
 0x464   : > { %1942 = vrot.lane.b32.xlu2 %v1836_v11, %s3293_s21  ;;  %1944 = vrot.lane.b32.xlu0 %v1837_v9, %s3293_s21 }
 0x465   : > { %1940 = vrot.lane.b32.xlu1 %v1835_v44, %s3293_s21 }
 0x466   : > { %v4346_v26 = vpop.permute.xlu2 %1876 }
 0x46c   : > { %2051 = vperm.xlu0 %3206, %v4042_v35   ;;  %2047 = vperm.xlu2 %3205, %v4048_v29  }
 0x46d   : > { %2043 = vperm.xlu1 %3204, %v4036_v60  }
 0x46e   : > { %v4351_v10 = vpop.permute.xlu2 %1882 }
 0x474   : > { %2071 = vperm.xlu0 %3206, %v4082_v27   ;;  %2059 = vperm.xlu2 %3205, %v4062_v48  }
 0x475   : > { %2055 = vperm.xlu1 %3204, %v4056_v17  }
 0x476   : > { %v4360_v60 = vpop.permute.xlu2 %1888 }
 0x47c   : > { %2083 = vperm.xlu0 %3206, %v4106_v63   ;;  %2067 = vperm.xlu2 %3205, %v4068_v52  }
 0x47d   : > { %2063 = vperm.xlu1 %3204, %v4076_v25  }
 0x47e   : > { %v4356_v35 = vpop.permute.xlu0 %1878  ;;  %v4368_v27 = vpop.permute.xlu2 %1894 }
 0x47f   : > { %v4358_v29 = vpop.permute.xlu1 %1874  ;;  %6155 = vst [vmem:[#allocation152_spill] sm:$0xff] %v4368_v27 }
 0x484   : > { %2079 = vperm.xlu2 %3205, %v4088_v58  }
 0x485   : > { %2075 = vperm.xlu1 %3204, %v4100_v2  }
 0x486   : > { %v4364_v48 = vpop.permute.xlu0 %1884  ;;  %v4377_v63 = vpop.permute.xlu2 %1900 }
 0x487   : > { %v4366_v17 = vpop.permute.xlu1 %1880  ;;  %6158 = vst [vmem:[#allocation155_spill] sm:$0xff] %v4377_v63 }
 0x488   : > { %6154 = vst [vmem:[#allocation151_spill] sm:$0xff] %v4366_v17 }
 0x48d   : > { %2087 = vperm.xlu1 %3204, %v4119_v32  }
 0x48e   : > { %v4371_v52 = vpop.permute.xlu0 %1890  ;;  %v4385_v40 = vpop.permute.xlu2 %1906 }
 0x48f   : > { %v4373_v25 = vpop.permute.xlu1 %1886  ;;  %6162 = vst [vmem:[#allocation159_spill] sm:$0xff] %v4385_v40 }
 0x490   : > { %6156 = vst [vmem:[#allocation153_spill] sm:$0xff] %v4373_v25 }
 0x496   : > { %v4375_v44 = vpop.permute.xlu0 %1896  ;;  %v4391_v32 = vpop.permute.xlu2 %1912 }
 0x497   : > { %6157 = vst [vmem:[#allocation154_spill] sm:$0xff] %v4375_v44  ;;  %v4379_v20 = vpop.permute.xlu1 %1892 }
 0x498   : > { %6159 = vst [vmem:[#allocation156_spill] sm:$0xff] %v4379_v20 }
 0x499   : > { %6165 = vst [vmem:[#allocation162_spill] sm:$0xff] %v4391_v32 }
 0x49e   : > { %v4381_v58 = vpop.permute.xlu0 %1902  ;;  %v4397_v27 = vpop.permute.xlu2 %1918 }
 0x49f   : > { %6160 = vst [vmem:[#allocation157_spill] sm:$0xff] %v4381_v58  ;;  %v4383_v2 = vpop.permute.xlu1 %1898 }
 0x4a0   : > { %6161 = vst [vmem:[#allocation158_spill] sm:$0xff] %v4383_v2 }
 0x4a1   : > { %6168 = vst [vmem:[#allocation165_spill] sm:$0xff] %v4397_v27 }
 0x4a6   : > { %v4389_v11 = vpop.permute.xlu0 %1908  ;;  %v4403_v58 = vpop.permute.xlu2 %1924 }
 0x4a7   : > { %v4387_v21 = vpop.permute.xlu1 %1904  ;;  %6164 = vst [vmem:[#allocation161_spill] sm:$0xff] %v4389_v11 }
 0x4a8   : > { %6163 = vst [vmem:[#allocation160_spill] sm:$0xff] %v4387_v21 }
 0x4a9   : > { %6171 = vst [vmem:[#allocation168_spill] sm:$0xff] %v4403_v58 }
 0x4ae   : > { %v4395_v25 = vpop.permute.xlu0 %1914  ;;  %v4411_v11 = vpop.permute.xlu2 %1930 }
 0x4af   : > { %v4393_v9 = vpop.permute.xlu1 %1910  ;;  %6167 = vst [vmem:[#allocation164_spill] sm:$0xff] %v4395_v25 }
 0x4b0   : > { %6166 = vst [vmem:[#allocation163_spill] sm:$0xff] %v4393_v9 }
 0x4b1   : > { %6175 = vst [vmem:[#allocation172_spill] sm:$0xff] %v4411_v11 }
 0x4b6   : > { %v4401_v20 = vpop.permute.xlu0 %1920  ;;  %v4417_v25 = vpop.permute.xlu2 %1936 }
 0x4b7   : > { %v4399_v63 = vpop.permute.xlu1 %1916  ;;  %6170 = vst [vmem:[#allocation167_spill] sm:$0xff] %v4401_v20 }
 0x4b8   : > { %6169 = vst [vmem:[#allocation166_spill] sm:$0xff] %v4399_v63 }
 0x4b9   : > { %6178 = vst [vmem:[#allocation175_spill] sm:$0xff] %v4417_v25 }
 0x4be   : > { %v4407_v40 = vpop.permute.xlu0 %1926  ;;  %v4423_v20 = vpop.permute.xlu2 %1942 }
 0x4bf   : > { %v4405_v2 = vpop.permute.xlu1 %1922  ;;  %6173 = vst [vmem:[#allocation170_spill] sm:$0xff] %v4407_v40 }
 0x4c0   : > { %6172 = vst [vmem:[#allocation169_spill] sm:$0xff] %v4405_v2 }
 0x4c1   : > { %6181 = vst [vmem:[#allocation178_spill] sm:$0xff] %v4423_v20 }
 0x4c6   : > { %v4413_v32 = vpop.permute.xlu0 %1932 }
 0x4c7   : > { %v4409_v21 = vpop.permute.xlu1 %1928  ;;  %6176 = vst [vmem:[#allocation173_spill] sm:$0xff] %v4413_v32 }
 0x4c8   : > { %6174 = vst [vmem:[#allocation171_spill] sm:$0xff] %v4409_v21 }
 0x4ce   : > { %v4421_v63 = vpop.permute.xlu0 %1938 }
 0x4cf   : > { %v4415_v9 = vpop.permute.xlu1 %1934  ;;  %6180 = vst [vmem:[#allocation177_spill] sm:$0xff] %v4421_v63 }
 0x4d0   : > { %6177 = vst [vmem:[#allocation174_spill] sm:$0xff] %v4415_v9  ;;  %v2048_v9 = vpop.permute.xlu2 %2047 }
 0x4d1   : > { %v2095_v63 = vmul.f32 0.0, %v2048_v9  ;;  %v2094_v20 = vmul.f32 %v4227_v28, %v2048_v9 }
 0x4d6   : > { %v4429_v32 = vpop.permute.xlu0 %1944 }
 0x4d7   : > { %v4419_v27 = vpop.permute.xlu1 %1940  ;;  %6182 = vst [vmem:[#allocation179_spill] sm:$0xff] %v4429_v32 }
 0x4d8   : > { %6179 = vst [vmem:[#allocation176_spill] sm:$0xff] %v4419_v27  ;;  %v2093_v27 = vmul.f32 %v4223_v16, %v2048_v9 }
 0x4df   : > { %v2044_v44 = vpop.permute.xlu1 %2043 }
 0x4e0   : > { %v2090_v2 = vmul.f32 %v4210_v18, %v2044_v44  ;;  %v2091_v40 = vmul.f32 %v4214_v41, %v2044_v44  ;;  %v2092_v21 = vmul.f32 0.0, %v2044_v44  ;;  %v2052_v44 = vpop.permute.xlu0 %2051 }
 0x4e1   : > { %v2097_v32 = vmul.f32 %v4234_v14, %v2052_v44 }
 0x4e2   : > { %2162 = vrot.lane.b32.xlu2 %v2090_v2, %s3295_s22  ;;  %2166 = vrot.lane.b32.xlu1 %v2092_v21, %s3295_s22  ;;  %v2096_v2 = vmul.f32 %v4238_v12, %v2052_v44  ;;  %v2098_v21 = vmul.f32 0.0, %v2052_v44 }
 0x4e3   : > { %2164 = vrot.lane.b32.xlu0 %v2091_v40, %s3295_s22 }
 0x4e7   : > { %v2056_v40 = vpop.permute.xlu1 %2055 }
 0x4e8   : > { %v2099_v9 = vmul.f32 %v4249_v46, %v2056_v40 }
 0x4ea   : > { %2168 = vrot.lane.b32.xlu2 %v2093_v27, %s3295_s22  ;;  %2172 = vrot.lane.b32.xlu1 %v2095_v63, %s3295_s22  ;;  %v2101_v27 = vmul.f32 0.0, %v2056_v40  ;;  %v2100_v63 = vmul.f32 %v4245_v22, %v2056_v40 }
 0x4eb   : > { %2170 = vrot.lane.b32.xlu0 %v2094_v20, %s3295_s22  ;;  %v2060_v20 = vpop.permute.xlu2 %2059 }
 0x4ec   : > { %v2102_v44 = vmul.f32 %v4260_v15, %v2060_v20 }
 0x4f2   : > { %2174 = vrot.lane.b32.xlu2 %v2096_v2, %s3295_s22  ;;  %2178 = vrot.lane.b32.xlu1 %v2098_v21, %s3295_s22  ;;  %v2104_v2 = vmul.f32 0.0, %v2060_v20  ;;  %v2103_v21 = vmul.f32 %v4256_v54, %v2060_v20 }
 0x4f3   : > { %2176 = vrot.lane.b32.xlu0 %v2097_v32, %s3295_s22  ;;  %v2064_v32 = vpop.permute.xlu1 %2063 }
 0x4f4   : > { %v2105_v40 = vmul.f32 %v4271_v55, %v2064_v32 }
 0x4fa   : > { %2180 = vrot.lane.b32.xlu2 %v2099_v9, %s3295_s22  ;;  %2184 = vrot.lane.b32.xlu1 %v2101_v27, %s3295_s22  ;;  %v2107_v9 = vmul.f32 0.0, %v2064_v32  ;;  %v2106_v27 = vmul.f32 %v4267_v49, %v2064_v32 }
 0x4fb   : > { %2182 = vrot.lane.b32.xlu0 %v2100_v63, %s3295_s22  ;;  %v2068_v63 = vpop.permute.xlu2 %2067 }
 0x4fc   : > { %v2108_v20 = vmul.f32 %v4282_v53, %v2068_v63 }
 0x502   : > { %2186 = vrot.lane.b32.xlu2 %v2102_v44, %s3295_s22  ;;  %2190 = vrot.lane.b32.xlu1 %v2104_v2, %s3295_s22  ;;  %v2110_v44 = vmul.f32 0.0, %v2068_v63  ;;  %v2109_v2 = vmul.f32 %v4278_v13, %v2068_v63 }
 0x503   : > { %2188 = vrot.lane.b32.xlu0 %v2103_v21, %s3295_s22  ;;  %v2072_v21 = vpop.permute.xlu0 %2071 }
 0x504   : > { %v2111_v32 = vmul.f32 %v4293_v50, %v2072_v21 }
 0x50a   : > { %2192 = vrot.lane.b32.xlu2 %v2105_v40, %s3295_s22  ;;  %2196 = vrot.lane.b32.xlu1 %v2107_v9, %s3295_s22  ;;  %v2113_v40 = vmul.f32 0.0, %v2072_v21  ;;  %v2112_v9 = vmul.f32 %v4289_v23, %v2072_v21 }
 0x50b   : > { %2194 = vrot.lane.b32.xlu0 %v2106_v27, %s3295_s22  ;;  %v2076_v27 = vpop.permute.xlu1 %2075 }
 0x50c   : > { %v2114_v63 = vmul.f32 %v4304_v24, %v2076_v27 }
 0x512   : > { %2198 = vrot.lane.b32.xlu2 %v2108_v20, %s3295_s22  ;;  %2202 = vrot.lane.b32.xlu1 %v2110_v44, %s3295_s22  ;;  %v2116_v20 = vmul.f32 0.0, %v2076_v27  ;;  %v2115_v44 = vmul.f32 %v4300_v36, %v2076_v27 }
 0x513   : > { %2200 = vrot.lane.b32.xlu0 %v2109_v2, %s3295_s22  ;;  %v2080_v2 = vpop.permute.xlu2 %2079 }
 0x514   : > { %v2117_v21 = vmul.f32 %v4315_v42, %v2080_v2 }
 0x51a   : > { %2204 = vrot.lane.b32.xlu2 %v2111_v32, %s3295_s22  ;;  %2208 = vrot.lane.b32.xlu1 %v2113_v40, %s3295_s22  ;;  %v2119_v32 = vmul.f32 0.0, %v2080_v2  ;;  %v2118_v40 = vmul.f32 %v4311_v56, %v2080_v2 }
 0x51b   : > { %2206 = vrot.lane.b32.xlu0 %v2112_v9, %s3295_s22  ;;  %v2084_v9 = vpop.permute.xlu0 %2083 }
 0x51c   : > { %v2120_v27 = vmul.f32 %v4326_v39, %v2084_v9 }
 0x522   : > { %2210 = vrot.lane.b32.xlu2 %v2114_v63, %s3295_s22  ;;  %2214 = vrot.lane.b32.xlu1 %v2116_v20, %s3295_s22  ;;  %v2122_v63 = vmul.f32 0.0, %v2084_v9  ;;  %v2121_v20 = vmul.f32 %v4322_v59, %v2084_v9  ;;  %v1118_v9 = vmul.f32 0.0, %v3831_v37 }
 0x523   : > { %2212 = vrot.lane.b32.xlu0 %v2115_v44, %s3295_s22  ;;  %v2088_v44 = vpop.permute.xlu1 %2087 }
 0x524   : > { %v2123_v2 = vmul.f32 %v4337_v6, %v2088_v44 }
 0x52a   : > { %2216 = vrot.lane.b32.xlu2 %v2117_v21, %s3295_s22  ;;  %2220 = vrot.lane.b32.xlu1 %v2119_v32, %s3295_s22  ;;  %v2125_v21 = vmul.f32 0.0, %v2088_v44  ;;  %v2124_v32 = vmul.f32 %v4333_v34, %v2088_v44 }
 0x52b   : > { %2218 = vrot.lane.b32.xlu0 %v2118_v40, %s3295_s22  ;;  %v321_v40 = vld [vmem:[%s5824_s2] ss:$2 sm:$0x3] }
 0x52c   : > { %v2332_v25 = vperm.slane %v321_v40, 1 }
 0x532   : > { %2222 = vrot.lane.b32.xlu2 %v2120_v27, %s3295_s22  ;;  %2226 = vrot.lane.b32.xlu1 %v2122_v63, %s3295_s22  ;;  %v1346_v63 = vadd.f32 %v3925_v4, %v1118_v9  ;;  %v1120_v9 = vmul.f32 %v4214_v41, %v3831_v37  ;;  %v1299_v41 = vsel %vm648_vm0, %v3929_v3, %v3931_v5 }
 0x533   : > { %2224 = vrot.lane.b32.xlu0 %v2121_v20, %s3295_s22  ;;  %v2331_v20 = vperm.slane %v321_v40, 0 }
 0x534   : > { %v1634_v44 = vadd.f32 %v4031_v61, %v1346_v63  ;;  %v1574_v63 = vsel %vm973_vm1, %v4031_v61, %v4095_v47  ;;  %v1124_v61 = vmul.f32 0.0, %v3845_v31 }
 0x53a   : > { %2228 = vrot.lane.b32.xlu2 %v2123_v2, %s3295_s22  ;;  %2232 = vrot.lane.b32.xlu1 %v2125_v21, %s3295_s22  ;;  %v1298_v2 = vsel %vm648_vm0, %v3925_v4, %v3923_v1  ;;  %v1119_v21 = vmul.f32 %v4210_v18, %v3831_v37  ;;  %v1575_v4 = vsel %vm973_vm1, %v4095_v47, %v4091_v57 }
 0x53b   : > { %2230 = vrot.lane.b32.xlu0 %v2124_v32, %s3295_s22  ;;  %v1121_v32 = vmul.f32 0.0, %v3843_v62  ;;  %v1122_v37 = vmul.f32 %v4223_v16, %v3843_v62  ;;  %v1123_v57 = vmul.f32 %v4227_v28, %v3843_v62  ;;  %v1576_v47 = vsel %vm973_vm1, %v4051_v45, %v4114_v30 }
 0x53c   : > { %v4491_v27 = vpop.permute.xlu2 %2162  ;;  %v1300_v62 = vsel %vm648_vm0, %v3927_v0, %v3937_v8  ;;  %v1125_v28 = vmul.f32 %v4238_v12, %v3845_v31 }
 0x542   : > { %2333 = vrot.lane.b32.xlu2 %v2331_v20, %s3302_s29  ;;  %2414 = vrot.lane.b32.xlu1 %v1634_v44, %s3303_s30  ;;  %v1347_v20 = vadd.f32 %v1298_v2, %v1119_v21  ;;  %v1349_v44 = vadd.f32 %v3929_v3, %v1121_v32  ;;  %v1577_v3 = vsel %vm973_vm1, %v4114_v30, %v4110_v33 }
 0x543   : > { %2335 = vrot.lane.b32.xlu0 %v2332_v25, %s3302_s29  ;;  %v1348_v25 = vadd.f32 %v3923_v1, %v1120_v9  ;;  %v1126_v30 = vmul.f32 %v4234_v14, %v3845_v31  ;;  %v1578_v9 = vsel %vm973_vm1, %v4071_v51, %v4128_v43  ;;  %v6184_v31 = vld [vmem:[#allocation95_spill] sm:$0xff]  ;;  %v1128_v14 = vmul.f32 %v4249_v46, %v3837_v38 }
 0x544   : > { %v4502_v40 = vpop.permute.xlu2 %2168  ;;  %v1637_v11 = vadd.f32 %v4051_v45, %v1349_v44  ;;  %v1635_v58 = vadd.f32 %v1574_v63, %v1347_v20  ;;  %v1127_v45 = vmul.f32 0.0, %v3837_v38  ;;  %v1353_v20 = vadd.f32 %v1300_v62, %v1125_v28 }
 0x545   : > { %v1636_v17 = vadd.f32 %v1575_v4, %v1348_v25  ;;  %v1579_v44 = vsel %vm973_vm1, %v4128_v43, %v4124_v19  ;;  %v1354_v4 = vadd.f32 %v3937_v8, %v1126_v30  ;;  %v6183_v25 = vld [vmem:[#allocation112_spill] sm:$0xff]  ;;  %v6185_v19 = vld [vmem:[#allocation89_spill] sm:$0xff] }
 0x546   : > { %v1130_v43 = vmul.f32 0.0, %v6185_v19 }
 0x54a   : > { %2416 = vrot.lane.b32.xlu2 %v1635_v58, %s3303_s30  ;;  %2420 = vrot.lane.b32.xlu1 %v1637_v11, %s3303_s30  ;;  %v1352_v58 = vadd.f32 %v3927_v0, %v1124_v61  ;;  %v1350_v11 = vadd.f32 %v1299_v41, %v1122_v37  ;;  %v1355_v0 = vadd.f32 %v3935_v7, %v1127_v45 }
 0x54b   : > { %2418 = vrot.lane.b32.xlu0 %v1636_v17, %s3303_s30  ;;  %v1351_v17 = vadd.f32 %v3931_v5, %v1123_v57  ;;  %v1641_v37 = vadd.f32 %v1578_v9, %v1353_v20  ;;  %v1642_v61 = vadd.f32 %v1579_v44, %v1354_v4  ;;  %v6191_v9 = vld [vmem:[#allocation97_spill] sm:$0xff]  ;;  %v1131_v20 = vmul.f32 %v4260_v15, %v6185_v19  ;;  %v6192_v44 = vld [vmem:[#allocation87_spill] sm:$0xff] }
 0x54c   : > { %v4524_v1 = vpop.permute.xlu2 %2174  ;;  %v1640_v2 = vadd.f32 %v4071_v51, %v1352_v58  ;;  %v1638_v21 = vadd.f32 %v1576_v47, %v1350_v11  ;;  %v1643_v41 = vadd.f32 %v6183_v25, %v1355_v0  ;;  %v1301_v51 = vsel %vm648_vm0, %v3935_v7, %v6184_v31  ;;  %v6187_v58 = vld [vmem:[#allocation116_spill] sm:$0xff] }
 0x54d   : > { %v1639_v32 = vadd.f32 %v1577_v3, %v1351_v17  ;;  %v1129_v47 = vmul.f32 %v4245_v22, %v3837_v38  ;;  %v1580_v11 = vsel %vm973_vm1, %v6183_v25, %v6187_v58  ;;  %v1356_v7 = vadd.f32 %v1301_v51, %v1128_v14  ;;  %v6188_v17 = vld [vmem:[#allocation98_spill] sm:$0xff]  ;;  %v6190_v22 = vld [vmem:[#allocation113_spill] sm:$0xff]  ;;  %v6195_v14 = vld [vmem:[#allocation96_spill] sm:$0xff] }
 0x54e   : > { %v1302_v0 = vsel %vm648_vm0, %v6188_v17, %v6191_v9  ;;  %v1133_v4 = vmul.f32 0.0, %v6192_v44 }
 0x54f   : > { %v1357_v38 = vadd.f32 %v6184_v31, %v1129_v47  ;;  %v1644_v45 = vadd.f32 %v1580_v11, %v1356_v7  ;;  %v1359_v47 = vadd.f32 %v1302_v0, %v1131_v20  ;;  %v6201_v0 = vld [vmem:[#allocation122_spill] sm:$0xff] }
 0x552   : > { %2422 = vrot.lane.b32.xlu2 %v1638_v21, %s3303_s30  ;;  %2426 = vrot.lane.b32.xlu1 %v1640_v2, %s3303_s30  ;;  %v1358_v2 = vadd.f32 %v6188_v17, %v1130_v43  ;;  %v6189_v21 = vld [vmem:[#allocation115_spill] sm:$0xff]  ;;  %v1361_v43 = vadd.f32 %v6195_v14, %v1133_v4 }
 0x553   : > { %2424 = vrot.lane.b32.xlu0 %v1639_v32, %s3303_s30  ;;  %v1581_v32 = vsel %vm973_vm1, %v6187_v58, %v6189_v21  ;;  %v6196_v58 = vld [vmem:[#allocation118_spill] sm:$0xff]  ;;  %v6198_v21 = vld [vmem:[#allocation101_spill] sm:$0xff] }
 0x554   : > { %v4546_v5 = vpop.permute.xlu1 %2166  ;;  %v4548_v33 = vpop.permute.xlu2 %2180  ;;  %v1646_v28 = vadd.f32 %v6190_v22, %v1358_v2  ;;  %v1645_v30 = vadd.f32 %v1581_v32, %v1357_v38  ;;  %v1303_v32 = vsel %vm648_vm0, %v6195_v14, %v6198_v21  ;;  %v1134_v38 = vmul.f32 %v4271_v55, %v6192_v44  ;;  %v6203_v14 = vld [vmem:[#allocation121_spill] sm:$0xff] }
 0x555   : > { %v4555_v63 = vpop.permute.xlu0 %2164  ;;  %v1585_v55 = vsel %vm973_vm1, %v6201_v0, %v6203_v14 }
 0x55a   : > { %2428 = vrot.lane.b32.xlu2 %v1641_v37, %s3303_s30  ;;  %2432 = vrot.lane.b32.xlu1 %v1643_v41, %s3303_s30  ;;  %v1132_v37 = vmul.f32 %v4256_v54, %v6185_v19  ;;  %v6197_v19 = vld [vmem:[#allocation114_spill] sm:$0xff] }
 0x55b   : > { %2430 = vrot.lane.b32.xlu0 %v1642_v61, %s3303_s30  ;;  %v6194_v61 = vld [vmem:[#allocation119_spill] sm:$0xff]  ;;  %v1649_v7 = vadd.f32 %v6197_v19, %v1361_v43  ;;  %v1584_v20 = vsel %vm973_vm1, %v6197_v19, %v6201_v0 }
 0x55c   : > { %v4572_v8 = vpop.permute.xlu1 %2172  ;;  %v4574_v57 = vpop.permute.xlu2 %2186  ;;  %v1582_v31 = vsel %vm973_vm1, %v6190_v22, %v6194_v61  ;;  %v1583_v15 = vsel %vm973_vm1, %v6194_v61, %v6196_v58  ;;  %v1360_v54 = vadd.f32 %v6191_v9, %v1132_v37  ;;  %v6199_v22 = vld [vmem:[#allocation88_spill] sm:$0xff]  ;;  %v1135_v9 = vmul.f32 %v4267_v49, %v6192_v44  ;;  %v6204_v44 = vld [vmem:[#allocation117_spill] sm:$0xff] }
 0x55d   : > { %6186 = vst [vmem:[#allocation112_spill] sm:$0xff] %v4574_v57  ;;  %v4581_v3 = vpop.permute.xlu0 %2170  ;;  %v1647_v17 = vadd.f32 %v1582_v31, %v1359_v47  ;;  %v6202_v37 = vld [vmem:[#allocation100_spill] sm:$0xff]  ;;  %v1362_v31 = vadd.f32 %v1303_v32, %v1134_v38  ;;  %v1138_v38 = vmul.f32 %v4278_v13, %v6199_v22 }
 0x55e   : > { %v4590_v62 = vsel %vm973_vm1, %v4502_v40, %v4581_v3  ;;  %v1648_v2 = vadd.f32 %v1583_v15, %v1360_v54  ;;  %v1363_v49 = vadd.f32 %v6198_v21, %v1135_v9  ;;  %v6205_v54 = vld [vmem:[#allocation99_spill] sm:$0xff] }
 0x55f   : > { %v1650_v58 = vadd.f32 %v1584_v20, %v1362_v31  ;;  %v1304_v19 = vsel %vm648_vm0, %v6202_v37, %v6205_v54  ;;  %v6210_v31 = vld [vmem:[#allocation124_spill] sm:$0xff]  ;;  %v1366_v13 = vadd.f32 %v6205_v54, %v1138_v38 }
 0x560   : > { %v1651_v15 = vadd.f32 %v1585_v55, %v1363_v49 }
 0x562   : > { %2434 = vrot.lane.b32.xlu2 %v1644_v45, %s3303_s30  ;;  %2438 = vrot.lane.b32.xlu1 %v1646_v28, %s3303_s30  ;;  %v1136_v28 = vmul.f32 0.0, %v6199_v22 }
 0x563   : > { %2436 = vrot.lane.b32.xlu0 %v1645_v30, %s3303_s30 }
 0x564   : > { %v4603_v25 = vpop.permute.xlu1 %2178  ;;  %v4605_v41 = vpop.permute.xlu2 %2192  ;;  %v1364_v61 = vadd.f32 %v6202_v37, %v1136_v28  ;;  %v6208_v28 = vld [vmem:[#allocation125_spill] sm:$0xff]  ;;  %v6209_v37 = vld [vmem:[#allocation103_spill] sm:$0xff] }
 0x565   : > { %6193 = vst [vmem:[#allocation95_spill] sm:$0xff] %v4605_v41  ;;  %v4612_v51 = vpop.permute.xlu0 %2176  ;;  %v1586_v9 = vsel %vm973_vm1, %v6204_v44, %v6208_v28 }
 0x566   : > { %v4621_v11 = vsel %vm973_vm1, %v4524_v1, %v4612_v51  ;;  %v1652_v47 = vadd.f32 %v6204_v44, %v1364_v61 }
 0x56a   : > { %2440 = vrot.lane.b32.xlu2 %v1647_v17, %s3303_s30  ;;  %2444 = vrot.lane.b32.xlu1 %v1649_v7, %s3303_s30  ;;  %v1137_v7 = vmul.f32 %v4282_v53, %v6199_v22  ;;  %v6206_v17 = vld [vmem:[#allocation92_spill] sm:$0xff]  ;;  %v1587_v53 = vsel %vm973_vm1, %v6208_v28, %v6210_v31 }
 0x56b   : > { %2442 = vrot.lane.b32.xlu0 %v1648_v2, %s3303_s30  ;;  %v1139_v2 = vmul.f32 0.0, %v6206_v17  ;;  %v6212_v22 = vld [vmem:[#allocation120_spill] sm:$0xff]  ;;  %v1654_v44 = vadd.f32 %v1587_v53, %v1366_v13  ;;  %v1141_v38 = vmul.f32 %v4289_v23, %v6206_v17  ;;  %v6218_v53 = vld [vmem:[#allocation127_spill] sm:$0xff] }
 0x56c   : > { %v4634_v45 = vpop.permute.xlu1 %2184  ;;  %v4636_v30 = vpop.permute.xlu2 %2198  ;;  %v1365_v20 = vadd.f32 %v1304_v19, %v1137_v7  ;;  %v6214_v19 = vld [vmem:[#allocation90_spill] sm:$0xff]  ;;  %v6216_v28 = vld [vmem:[#allocation128_spill] sm:$0xff] }
 0x56d   : > { %6200 = vst [vmem:[#allocation89_spill] sm:$0xff] %v4636_v30  ;;  %v4643_v4 = vpop.permute.xlu0 %2182  ;;  %v1367_v61 = vadd.f32 %v6209_v37, %v1139_v2  ;;  %v1142_v7 = vmul.f32 0.0, %v6214_v19 }
 0x56e   : > { %v4652_v43 = vsel %vm973_vm1, %v4548_v33, %v4643_v4  ;;  %v1653_v49 = vadd.f32 %v1586_v9, %v1365_v20  ;;  %v1588_v9 = vsel %vm973_vm1, %v6212_v22, %v6216_v28 }
 0x56f   : > { %v1655_v55 = vadd.f32 %v6212_v22, %v1367_v61 }
 0x572   : > { %2446 = vrot.lane.b32.xlu2 %v1650_v58, %s3303_s30  ;;  %2450 = vrot.lane.b32.xlu1 %v1652_v47, %s3303_s30  ;;  %v6213_v47 = vld [vmem:[#allocation102_spill] sm:$0xff] }
 0x573   : > { %2448 = vrot.lane.b32.xlu0 %v1651_v15, %s3303_s30  ;;  %v1305_v58 = vsel %vm648_vm0, %v6209_v37, %v6213_v47  ;;  %v1140_v15 = vmul.f32 %v4293_v50, %v6206_v17  ;;  %v6217_v37 = vld [vmem:[#allocation104_spill] sm:$0xff]  ;;  %v1589_v50 = vsel %vm973_vm1, %v6216_v28, %v6218_v53  ;;  %v1369_v23 = vadd.f32 %v6213_v47, %v1141_v38  ;;  %v6220_v17 = vld [vmem:[#allocation123_spill] sm:$0xff] }
 0x574   : > { %v4665_v21 = vpop.permute.xlu1 %2190  ;;  %v4667_v32 = vpop.permute.xlu2 %2204  ;;  %v1370_v61 = vadd.f32 %v6217_v37, %v1142_v7  ;;  %v6222_v7 = vld [vmem:[#allocation91_spill] sm:$0xff] }
 0x575   : > { %6207 = vst [vmem:[#allocation116_spill] sm:$0xff] %v4667_v32  ;;  %v4674_v0 = vpop.permute.xlu0 %2188  ;;  %v1368_v31 = vadd.f32 %v1305_v58, %v1140_v15  ;;  %v1657_v22 = vadd.f32 %v1589_v50, %v1369_v23  ;;  %v1143_v15 = vmul.f32 %v4304_v24, %v6214_v19  ;;  %v1145_v28 = vmul.f32 0.0, %v6222_v7 }
 0x576   : > { %v4683_v14 = vsel %vm973_vm1, %v4574_v57, %v4674_v0 }
 0x577   : > { %6211 = vst [vmem:[#allocation98_spill] sm:$0xff] %v4683_v14 }
 0x57a   : > { %2452 = vrot.lane.b32.xlu2 %v1653_v49, %s3303_s30  ;;  %2456 = vrot.lane.b32.xlu1 %v1655_v55, %s3303_s30  ;;  %v1658_v55 = vadd.f32 %v6220_v17, %v1370_v61  ;;  %v1656_v49 = vadd.f32 %v1588_v9, %v1368_v31  ;;  %v1144_v9 = vmul.f32 %v4300_v36, %v6214_v19  ;;  %v6224_v61 = vld [vmem:[#allocation130_spill] sm:$0xff] }
 0x57b   : > { %2454 = vrot.lane.b32.xlu0 %v1654_v44, %s3303_s30  ;;  %v6221_v44 = vld [vmem:[#allocation106_spill] sm:$0xff]  ;;  %v1590_v31 = vsel %vm973_vm1, %v6220_v17, %v6224_v61 }
 0x57c   : > { %v4696_v54 = vpop.permute.xlu1 %2196  ;;  %v4698_v2 = vpop.permute.xlu2 %2210  ;;  %v1306_v58 = vsel %vm648_vm0, %v6217_v37, %v6221_v44  ;;  %v6226_v37 = vld [vmem:[#allocation105_spill] sm:$0xff]  ;;  %v1372_v36 = vadd.f32 %v6221_v44, %v1144_v9  ;;  %v6229_v19 = vld [vmem:[#allocation126_spill] sm:$0xff] }
 0x57d   : > { %6215 = vst [vmem:[#allocation115_spill] sm:$0xff] %v4698_v2  ;;  %v4705_v20 = vpop.permute.xlu0 %2194  ;;  %v1373_v50 = vadd.f32 %v6226_v37, %v1145_v28  ;;  %v1371_v23 = vadd.f32 %v1306_v58, %v1143_v15  ;;  %v6230_v58 = vld [vmem:[#allocation107_spill] sm:$0xff]  ;;  %v1146_v28 = vmul.f32 %v4315_v42, %v6222_v7 }
 0x57e   : > { %v4714_v13 = vsel %vm973_vm1, %v4605_v41, %v4705_v20  ;;  %v1307_v15 = vsel %vm648_vm0, %v6226_v37, %v6230_v58  ;;  %v6269_v41 = vld [vmem:[#allocation52_spill] sm:$0xff] }
 0x57f   : > { %6219 = vst [vmem:[#allocation113_spill] sm:$0xff] %v4714_v13  ;;  %v1659_v13 = vadd.f32 %v1590_v31, %v1371_v23  ;;  %v6234_v31 = vld [vmem:[#allocation133_spill] sm:$0xff]  ;;  %v1374_v37 = vadd.f32 %v1307_v15, %v1146_v28  ;;  %v6240_v15 = vld [vmem:[#allocation108_spill] sm:$0xff] }
 0x582   : > { %2458 = vrot.lane.b32.xlu2 %v1656_v49, %s3303_s30  ;;  %2462 = vrot.lane.b32.xlu1 %v1658_v55, %s3303_s30  ;;  %v6227_v55 = vld [vmem:[#allocation129_spill] sm:$0xff] }
 0x583   : > { %2460 = vrot.lane.b32.xlu0 %v1657_v22, %s3303_s30  ;;  %v1591_v24 = vsel %vm973_vm1, %v6224_v61, %v6227_v55  ;;  %v1661_v22 = vadd.f32 %v6229_v19, %v1373_v50  ;;  %v6231_v61 = vld [vmem:[#allocation94_spill] sm:$0xff]  ;;  %v1592_v50 = vsel %vm973_vm1, %v6229_v19, %v6234_v31 }
 0x584   : > { %v4727_v47 = vpop.permute.xlu1 %2202  ;;  %v4729_v38 = vpop.permute.xlu2 %2216  ;;  %v1660_v17 = vadd.f32 %v1591_v24, %v1372_v36  ;;  %v1148_v55 = vmul.f32 0.0, %v6231_v61  ;;  %v6236_v24 = vld [vmem:[#allocation109_spill] sm:$0xff] }
 0x585   : > { %6223 = vst [vmem:[#allocation97_spill] sm:$0xff] %v4729_v38  ;;  %v4736_v53 = vpop.permute.xlu0 %2200  ;;  %v1308_v28 = vsel %vm648_vm0, %v6236_v24, %v6240_v15 }
 0x586   : > { %6225 = vst [vmem:[#allocation87_spill] sm:$0xff] %v4736_v53  ;;  %v4745_v49 = vsel %vm973_vm1, %v4636_v30, %v4736_v53  ;;  %v1376_v36 = vadd.f32 %v6236_v24, %v1148_v55  ;;  %v1662_v30 = vadd.f32 %v1592_v50, %v1374_v37  ;;  %v1149_v55 = vmul.f32 %v4326_v39, %v6231_v61  ;;  %v6244_v50 = vld [vmem:[#allocation136_spill] sm:$0xff]  ;;  %v6246_v24 = vld [vmem:[#allocation110_spill] sm:$0xff] }
 0x587   : > { %6228 = vst [vmem:[#allocation119_spill] sm:$0xff] %v4745_v49 }
 0x58a   : > { %2464 = vrot.lane.b32.xlu2 %v1659_v13, %s3303_s30  ;;  %2468 = vrot.lane.b32.xlu1 %v1661_v22, %s3303_s30  ;;  %v1147_v13 = vmul.f32 %v4311_v56, %v6222_v7  ;;  %v6237_v22 = vld [vmem:[#allocation132_spill] sm:$0xff]  ;;  %v6239_v7 = vld [vmem:[#allocation131_spill] sm:$0xff] }
 0x58b   : > { %2466 = vrot.lane.b32.xlu0 %v1660_v17, %s3303_s30  ;;  %v1593_v42 = vsel %vm973_vm1, %v6234_v31, %v6237_v22  ;;  %v1664_v49 = vadd.f32 %v6239_v7, %v1376_v36  ;;  %v6241_v31 = vld [vmem:[#allocation93_spill] sm:$0xff] }
 0x58c   : > { %v4758_v44 = vpop.permute.xlu1 %2208  ;;  %v4760_v9 = vpop.permute.xlu2 %2222  ;;  %v1375_v56 = vadd.f32 %v6230_v58, %v1147_v13  ;;  %v1151_v22 = vmul.f32 0.0, %v6241_v31 }
 0x58d   : > { %6232 = vst [vmem:[#allocation96_spill] sm:$0xff] %v4758_v44  ;;  %v4767_v23 = vpop.permute.xlu0 %2206  ;;  %v6271_v44 = vld [vmem:[#allocation23_spill] sm:$0xff] }
 0x58e   : > { %6233 = vst [vmem:[#allocation118_spill] sm:$0xff] %v4760_v9  ;;  %v4776_v17 = vsel %vm973_vm1, %v4667_v32, %v4767_v23  ;;  %v1663_v19 = vadd.f32 %v1593_v42, %v1375_v56  ;;  %v1379_v36 = vadd.f32 %v6246_v24, %v1151_v22  ;;  %v1377_v42 = vadd.f32 %v1308_v28, %v1149_v55  ;;  %v6247_v56 = vld [vmem:[#allocation135_spill] sm:$0xff] }
 0x58f   : > { %6235 = vst [vmem:[#allocation114_spill] sm:$0xff] %v4767_v23  ;;  %v1595_v39 = vsel %vm973_vm1, %v6244_v50, %v6247_v56  ;;  %v6249_v28 = vld [vmem:[#allocation111_spill] sm:$0xff] }
 0x590   : > { %6238 = vst [vmem:[#allocation101_spill] sm:$0xff] %v4776_v17  ;;  %v1309_v55 = vsel %vm648_vm0, %v6246_v24, %v6249_v28  ;;  %v3136_v22 = vld [vmem:[%s5824_s2 + $0x1] ss:$2 sm:$0x3] }
 0x592   : > { %2470 = vrot.lane.b32.xlu2 %v1662_v30, %s3303_s30  ;;  %2474 = vrot.lane.b32.xlu1 %v1664_v49, %s3303_s30  ;;  %v1150_v30 = vmul.f32 %v4322_v59, %v6231_v61  ;;  %v1594_v49 = vsel %vm973_vm1, %v6239_v7, %v6244_v50  ;;  %v6248_v61 = vld [vmem:[#allocation134_spill] sm:$0xff] }
 0x593   : > { %2472 = vrot.lane.b32.xlu0 %v1663_v19, %s3303_s30  ;;  %v1667_v17 = vadd.f32 %v6248_v61, %v1379_v36  ;;  %v1665_v32 = vadd.f32 %v1594_v49, %v1377_v42  ;;  %v6253_v42 = vld [vmem:[#allocation138_spill] sm:$0xff] }
 0x594   : > { %v4789_v58 = vpop.permute.xlu1 %2214  ;;  %v4791_v13 = vpop.permute.xlu2 %2228  ;;  %v1378_v59 = vadd.f32 %v6240_v15, %v1150_v30  ;;  %v1152_v15 = vmul.f32 %v4337_v6, %v6241_v31 }
 0x595   : > { %6242 = vst [vmem:[#allocation88_spill] sm:$0xff] %v4789_v58  ;;  %v4798_v37 = vpop.permute.xlu0 %2212 }
 0x596   : > { %6243 = vst [vmem:[#allocation122_spill] sm:$0xff] %v4791_v13  ;;  %v4807_v19 = vsel %vm973_vm1, %v4698_v2, %v4798_v37  ;;  %v1666_v7 = vadd.f32 %v1595_v39, %v1378_v59  ;;  %v1380_v36 = vadd.f32 %v1309_v55, %v1152_v15  ;;  %v2584_v39 = vperm.slane %v3136_v22, 0  ;;  %v6262_v2 = vld [vmem:[#allocation16_spill] sm:$0xff] }
 0x597   : > { %6245 = vst [vmem:[#allocation100_spill] sm:$0xff] %v4798_v37  ;;  %v6268_v37 = vld [vmem:[#allocation55_spill] sm:$0xff] }
 0x59a   : > { %2476 = vrot.lane.b32.xlu2 %v1665_v32, %s3303_s30  ;;  %2480 = vrot.lane.b32.xlu1 %v1667_v17, %s3303_s30  ;;  %v1153_v32 = vmul.f32 %v4333_v34, %v6241_v31  ;;  %v6251_v17 = vld [vmem:[#allocation139_spill] sm:$0xff] }
 0x59b   : > { %2478 = vrot.lane.b32.xlu0 %v1666_v7, %s3303_s30  ;;  %v1596_v49 = vsel %vm973_vm1, %v6248_v61, %v6251_v17  ;;  %v1597_v56 = vsel %vm973_vm1, %v6251_v17, %v6253_v42  ;;  %v2585_v17 = vperm.slane %v3136_v22, 1 }
 0x59c   : > { %v4822_v30 = vpop.permute.xlu1 %2220  ;;  %v4824_v50 = vpop.permute.xlu2 %2333  ;;  %v1381_v59 = vadd.f32 %v6249_v28, %v1153_v32  ;;  %v1668_v34 = vadd.f32 %v1596_v49, %v1380_v36  ;;  %v6257_v49 = vld [vmem:[#allocation15_spill] sm:$0xff]  ;;  %v6258_v36 = vld [vmem:[#allocation17_spill] sm:$0xff] }
 0x59d   : > { %6250 = vst [vmem:[#allocation121_spill] sm:$0xff] %v4822_v30  ;;  %v4831_v24 = vpop.permute.xlu0 %2218  ;;  %v649_v42 = vsel %vm648_vm0, %v6258_v36, %v6257_v49  ;;  %v6263_v36 = vld [vmem:[#allocation20_spill] sm:$0xff]  ;;  %v6265_v30 = vld [vmem:[#allocation18_spill] sm:$0xff] }
 0x59e   : > { %6252 = vst [vmem:[#allocation117_spill] sm:$0xff] %v4831_v24  ;;  %v4839_v6 = vsel %vm973_vm1, %v4729_v38, %v4831_v24  ;;  %v1669_v31 = vadd.f32 %v1597_v56, %v1381_v59 }
 0x5a2   : > { %2482 = vrot.lane.b32.xlu2 %v1668_v34, %s3303_s30  ;;  %2586 = vrot.lane.b32.xlu1 %v2584_v39, %s3304_s5  ;;  %v6260_v39 = vld [vmem:[#allocation4_spill] sm:$0xff] }
 0x5a3   : > { %2484 = vrot.lane.b32.xlu0 %v1669_v31, %s3303_s30  ;;  %v420_v59 = vmul.f32 0.0, %v6260_v39 }
 0x5a4   : > { %v4844_v61 = vpop.permute.xlu1 %2226  ;;  %v2417_v7 = vpop.permute.xlu2 %2416 }
 0x5a5   : > { %6254 = vst [vmem:[#allocation99_spill] sm:$0xff] %v4844_v61  ;;  %v4846_v55 = vpop.permute.xlu0 %2224  ;;  %v709_v31 = vadd.f32 %v649_v42, %v420_v59  ;;  %v650_v42 = vsel %vm648_vm0, %v6257_v49, %v6265_v30  ;;  %v6266_v59 = vld [vmem:[#allocation6_spill] sm:$0xff] }
 0x5a6   : > { %6255 = vst [vmem:[#allocation92_spill] sm:$0xff] %v4846_v55  ;;  %v4851_v15 = vsel %vm973_vm1, %v4760_v9, %v4846_v55  ;;  %v6261_v9 = vld [vmem:[#allocation51_spill] sm:$0xff]  ;;  %v651_v55 = vsel %vm648_vm0, %v6263_v36, %v6262_v2 }
 0x5a7   : > { %v1034_v22 = vadd.f32 %v6261_v9, %v709_v31  ;;  %v423_v31 = vmul.f32 0.0, %v6266_v59 }
 0x5a9   : > { %v2342_v38 = vmul.f32 %v4824_v50, %v1034_v22  ;;  %v712_v36 = vadd.f32 %v651_v55, %v423_v31  ;;  %v6273_v31 = vld [vmem:[#allocation21_spill] sm:$0xff] }
 0x5aa   : > { %2588 = vrot.lane.b32.xlu2 %v2585_v17, %s3304_s5 }
 0x5ab   : > { %v1037_v23 = vadd.f32 %v6269_v41, %v712_v36 }
 0x5ac   : > { %v4853_v28 = vpop.permute.xlu1 %2232  ;;  %v2423_v32 = vpop.permute.xlu2 %2422 }
 0x5ad   : > { %6256 = vst [vmem:[#allocation125_spill] sm:$0xff] %v4853_v28  ;;  %v4858_v56 = vpop.permute.xlu0 %2230 }
 0x5ae   : > { %6259 = vst [vmem:[#allocation103_spill] sm:$0xff] %v4858_v56  ;;  %v4864_v34 = vsel %vm973_vm1, %v4791_v13, %v4858_v56  ;;  %v421_v56 = vmul.f32 %v4210_v18, %v6260_v39  ;;  %v6278_v39 = vld [vmem:[#allocation53_spill] sm:$0xff] }
 0x5b0   : > { %v710_v58 = vadd.f32 %v650_v42, %v421_v56  ;;  %v6274_v56 = vld [vmem:[#allocation3_spill] sm:$0xff] }
 0x5b4   : > { %v2415_v17 = vpop.permute.xlu1 %2414  ;;  %v2429_v28 = vpop.permute.xlu2 %2428 }
 0x5b5   : > { %v4871_v61 = vpop.permute.xlu0 %2335  ;;  %v2487_v24 = vsel %vm2486_vm2, %v2415_v17, %v2417_v7  ;;  %v974_v17 = vsel %vm973_vm1, %v6261_v9, %v6268_v37  ;;  %v652_v9 = vsel %vm648_vm0, %v6262_v2, %v6273_v31 }
 0x5b6   : > { %6264 = vst [vmem:[#allocation124_spill] sm:$0xff] %v4871_v61  ;;  %v4878_v13 = vadd.f32 %v2487_v24, %v2342_v38  ;;  %v4882_v22 = vsel %vm2337_vm3, %v4824_v50, %v4871_v61  ;;  %v1035_v49 = vadd.f32 %v974_v17, %v710_v58  ;;  %v2345_v38 = vmul.f32 %v4824_v50, %v1037_v23 }
 0x5b7   : > { %v426_v58 = vmul.f32 0.0, %v6274_v56 }
 0x5b8   : > { %6267 = vst [vmem:[#allocation120_spill] sm:$0xff] %v4878_v13  ;;  %v6270_v13 = vld [vmem:[#allocation19_spill] sm:$0xff]  ;;  %v2343_v18 = vmul.f32 %v4882_v22, %v1035_v49  ;;  %v6277_v49 = vld [vmem:[#allocation57_spill] sm:$0xff] }
 0x5b9   : > { %v653_v61 = vsel %vm648_vm0, %v6271_v44, %v6270_v13  ;;  %v424_v44 = vmul.f32 %v4223_v16, %v6266_v59 }
 0x5ba   : > { %v715_v17 = vadd.f32 %v653_v61, %v426_v58 }
 0x5bb   : > { %v713_v37 = vadd.f32 %v652_v9, %v424_v44 }
 0x5bc   : > { %v2421_v30 = vpop.permute.xlu1 %2420  ;;  %v2435_v24 = vpop.permute.xlu2 %2434  ;;  %v1040_v2 = vadd.f32 %v6278_v39, %v715_v17 }
 0x5bd   : > { %v4894_v14 = vpop.permute.xlu0 %2418  ;;  %v2489_v55 = vsel %vm2486_vm2, %v2421_v30, %v2423_v32  ;;  %v976_v30 = vsel %vm973_vm1, %v6269_v41, %v6277_v49  ;;  %v6282_v41 = vld [vmem:[#allocation24_spill] sm:$0xff] }
 0x5be   : > { %6272 = vst [vmem:[#allocation102_spill] sm:$0xff] %v4894_v14  ;;  %v2488_v23 = vsel %vm2486_vm2, %v2417_v7, %v4894_v14  ;;  %v4904_v42 = vadd.f32 %v2489_v55, %v2345_v38  ;;  %v1038_v31 = vadd.f32 %v976_v30, %v713_v37  ;;  %v2348_v53 = vmul.f32 %v4824_v50, %v1040_v2  ;;  %v6279_v38 = vld [vmem:[#allocation22_spill] sm:$0xff]  ;;  %v6283_v37 = vld [vmem:[#allocation7_spill] sm:$0xff] }
 0x5bf   : > { %v4908_v36 = vadd.f32 %v2488_v23, %v2343_v18  ;;  %v6280_v55 = vld [vmem:[#allocation26_spill] sm:$0xff]  ;;  %v654_v9 = vsel %vm648_vm0, %v6270_v13, %v6282_v41  ;;  %v429_v23 = vmul.f32 0.0, %v6283_v37  ;;  %v427_v30 = vmul.f32 %v4238_v12, %v6274_v56 }
 0x5c0   : > { %6275 = vst [vmem:[#allocation90_spill] sm:$0xff] %v4904_v42  ;;  %v655_v16 = vsel %vm648_vm0, %v6280_v55, %v6279_v38  ;;  %v2346_v61 = vmul.f32 %v4882_v22, %v1038_v31  ;;  %v6286_v31 = vld [vmem:[#allocation60_spill] sm:$0xff] }
 0x5c1   : > { %6276 = vst [vmem:[#allocation128_spill] sm:$0xff] %v4908_v36  ;;  %v718_v55 = vadd.f32 %v655_v16, %v429_v23  ;;  %v716_v42 = vadd.f32 %v654_v9, %v427_v30  ;;  %v6287_v36 = vld [vmem:[#allocation56_spill] sm:$0xff] }
 0x5c3   : > { %v1043_v13 = vadd.f32 %v6287_v36, %v718_v55 }
 0x5c4   : > { %v2427_v57 = vpop.permute.xlu1 %2426  ;;  %v4915_v7 = vpop.permute.xlu2 %2440 }
 0x5c5   : > { %v4920_v18 = vpop.permute.xlu0 %2424  ;;  %v2491_v58 = vsel %vm2486_vm2, %v2427_v57, %v2429_v28  ;;  %v978_v57 = vsel %vm973_vm1, %v6278_v39, %v6286_v31  ;;  %v2351_v14 = vmul.f32 %v4824_v50, %v1043_v13  ;;  %v6291_v39 = vld [vmem:[#allocation27_spill] sm:$0xff] }
 0x5c6   : > { %6281 = vst [vmem:[#allocation104_spill] sm:$0xff] %v4920_v18  ;;  %v2490_v44 = vsel %vm2486_vm2, %v2423_v32, %v4920_v18  ;;  %v4930_v17 = vadd.f32 %v2491_v58, %v2348_v53  ;;  %v1041_v41 = vadd.f32 %v978_v57, %v716_v42  ;;  %v6288_v53 = vld [vmem:[#allocation25_spill] sm:$0xff]  ;;  %v6289_v58 = vld [vmem:[#allocation28_spill] sm:$0xff]  ;;  %v656_v9 = vsel %vm648_vm0, %v6279_v38, %v6291_v39  ;;  %v6296_v38 = vld [vmem:[#allocation59_spill] sm:$0xff] }
 0x5c7   : > { %v4934_v2 = vadd.f32 %v2490_v44, %v2346_v61  ;;  %v657_v12 = vsel %vm648_vm0, %v6289_v58, %v6288_v53  ;;  %v6292_v42 = vld [vmem:[#allocation5_spill] sm:$0xff]  ;;  %v430_v57 = vmul.f32 %v4249_v46, %v6283_v37 }
 0x5c8   : > { %6284 = vst [vmem:[#allocation127_spill] sm:$0xff] %v4930_v17  ;;  %v2349_v16 = vmul.f32 %v4882_v22, %v1041_v41  ;;  %v432_v44 = vmul.f32 0.0, %v6292_v42  ;;  %v6295_v41 = vld [vmem:[#allocation63_spill] sm:$0xff] }
 0x5c9   : > { %6285 = vst [vmem:[#allocation123_spill] sm:$0xff] %v4934_v2  ;;  %v719_v17 = vadd.f32 %v656_v9, %v430_v57  ;;  %v6300_v9 = vld [vmem:[#allocation29_spill] sm:$0xff] }
 0x5ca   : > { %v721_v58 = vadd.f32 %v657_v12, %v432_v44  ;;  %v6301_v44 = vld [vmem:[#allocation9_spill] sm:$0xff] }
 0x5cc   : > { %v2433_v49 = vpop.permute.xlu1 %2432  ;;  %v4941_v32 = vpop.permute.xlu2 %2446  ;;  %v1046_v2 = vadd.f32 %v6296_v38, %v721_v58  ;;  %v4986_v58 = vld [vmem:[%s3463_s20 + $0x40] sm:$0xff] }
 0x5cd   : > { %v4946_v61 = vpop.permute.xlu0 %2430  ;;  %v2493_v23 = vsel %vm2486_vm2, %v2433_v49, %v2435_v24  ;;  %v980_v49 = vsel %vm973_vm1, %v6287_v36, %v6295_v41 }
 0x5ce   : > { %6290 = vst [vmem:[#allocation106_spill] sm:$0xff] %v4946_v61  ;;  %v2492_v30 = vsel %vm2486_vm2, %v2429_v28, %v4946_v61  ;;  %v4956_v55 = vadd.f32 %v2493_v23, %v2351_v14  ;;  %v1044_v39 = vadd.f32 %v980_v49, %v719_v17  ;;  %v2354_v28 = vmul.f32 %v4824_v50, %v1046_v2  ;;  %v6297_v23 = vld [vmem:[#allocation30_spill] sm:$0xff] }
 0x5cf   : > { %v4960_v13 = vadd.f32 %v2492_v30, %v2349_v16  ;;  %v658_v17 = vsel %vm648_vm0, %v6288_v53, %v6300_v9  ;;  %v435_v30 = vmul.f32 0.0, %v6301_v44  ;;  %v6305_v9 = vld [vmem:[#allocation62_spill] sm:$0xff] }
 0x5d0   : > { %6293 = vst [vmem:[#allocation91_spill] sm:$0xff] %v4956_v55  ;;  %v6298_v55 = vld [vmem:[#allocation31_spill] sm:$0xff]  ;;  %v2352_v12 = vmul.f32 %v4882_v22, %v1044_v39 }
 0x5d1   : > { %6294 = vst [vmem:[#allocation130_spill] sm:$0xff] %v4960_v13  ;;  %v659_v46 = vsel %vm648_vm0, %v6298_v55, %v6297_v23  ;;  %v433_v55 = vmul.f32 %v4986_v58, %v6292_v42 }
 0x5d2   : > { %v724_v49 = vadd.f32 %v659_v46, %v435_v30  ;;  %v6310_v30 = vld [vmem:[#allocation8_spill] sm:$0xff] }
 0x5d3   : > { %v722_v13 = vadd.f32 %v658_v17, %v433_v55  ;;  %v6309_v17 = vld [vmem:[#allocation32_spill] sm:$0xff]  ;;  %v438_v55 = vmul.f32 0.0, %v6310_v30 }
 0x5d4   : > { %v2439_v31 = vpop.permute.xlu1 %2438  ;;  %v4967_v14 = vpop.permute.xlu2 %2452  ;;  %v1049_v41 = vadd.f32 %v6305_v9, %v724_v49 }
 0x5d5   : > { %v4972_v16 = vpop.permute.xlu0 %2436  ;;  %v2495_v36 = vsel %vm2486_vm2, %v2439_v31, %v4915_v7  ;;  %v6304_v31 = vld [vmem:[#allocation66_spill] sm:$0xff] }
 0x5d6   : > { %6299 = vst [vmem:[#allocation105_spill] sm:$0xff] %v4972_v16  ;;  %v2494_v2 = vsel %vm2486_vm2, %v2435_v24, %v4972_v16  ;;  %v4983_v57 = vadd.f32 %v2495_v36, %v2354_v28  ;;  %v982_v53 = vsel %vm973_vm1, %v6296_v38, %v6304_v31  ;;  %v2357_v28 = vmul.f32 %v4824_v50, %v1049_v41  ;;  %v6307_v16 = vld [vmem:[#allocation34_spill] sm:$0xff]  ;;  %v6314_v31 = vld [vmem:[#allocation65_spill] sm:$0xff] }
 0x5d7   : > { %v4990_v39 = vadd.f32 %v2494_v2, %v2352_v12  ;;  %v1047_v61 = vadd.f32 %v982_v53, %v722_v13  ;;  %v660_v13 = vsel %vm648_vm0, %v6297_v23, %v6309_v17 }
 0x5d8   : > { %6302 = vst [vmem:[#allocation129_spill] sm:$0xff] %v4983_v57  ;;  %v6306_v57 = vld [vmem:[#allocation33_spill] sm:$0xff] }
 0x5d9   : > { %6303 = vst [vmem:[#allocation126_spill] sm:$0xff] %v4990_v39  ;;  %v661_v12 = vsel %vm648_vm0, %v6307_v16, %v6306_v57  ;;  %v2355_v46 = vmul.f32 %v4882_v22, %v1047_v61  ;;  %v5017_v16 = vld [vmem:[%s3463_s20 + $0x50] sm:$0xff] }
 0x5da   : > { %v436_v61 = vmul.f32 %v5017_v16, %v6301_v44  ;;  %v6313_v39 = vld [vmem:[#allocation69_spill] sm:$0xff] }
 0x5db   : > { %v984_v23 = vsel %vm973_vm1, %v6305_v9, %v6313_v39  ;;  %v6324_v39 = vld [vmem:[#allocation68_spill] sm:$0xff] }
 0x5dc   : > { %v2445_v24 = vpop.permute.xlu1 %2444  ;;  %v4997_v36 = vpop.permute.xlu2 %2458  ;;  %v725_v17 = vadd.f32 %v660_v13, %v436_v61  ;;  %v6318_v13 = vld [vmem:[#allocation35_spill] sm:$0xff] }
 0x5dd   : > { %v5002_v2 = vpop.permute.xlu0 %2442  ;;  %v2497_v38 = vsel %vm2486_vm2, %v2445_v24, %v4941_v32  ;;  %v727_v24 = vadd.f32 %v661_v12, %v438_v55  ;;  %v6319_v55 = vld [vmem:[#allocation10_spill] sm:$0xff] }
 0x5de   : > { %6308 = vst [vmem:[#allocation107_spill] sm:$0xff] %v5002_v2  ;;  %v2496_v41 = vsel %vm2486_vm2, %v4915_v7, %v5002_v2  ;;  %v5014_v49 = vadd.f32 %v2497_v38, %v2357_v28  ;;  %v1050_v37 = vadd.f32 %v984_v23, %v725_v17  ;;  %v6316_v2 = vld [vmem:[#allocation37_spill] sm:$0xff]  ;;  %v662_v17 = vsel %vm648_vm0, %v6306_v57, %v6318_v13 }
 0x5df   : > { %v5021_v53 = vadd.f32 %v2496_v41, %v2355_v46  ;;  %v1052_v42 = vadd.f32 %v6314_v31, %v727_v24  ;;  %v441_v61 = vmul.f32 0.0, %v6319_v55 }
 0x5e0   : > { %6311 = vst [vmem:[#allocation94_spill] sm:$0xff] %v5014_v49  ;;  %v6315_v49 = vld [vmem:[#allocation36_spill] sm:$0xff]  ;;  %v2358_v12 = vmul.f32 %v4882_v22, %v1050_v37 }
 0x5e1   : > { %6312 = vst [vmem:[#allocation133_spill] sm:$0xff] %v5021_v53  ;;  %v2360_v28 = vmul.f32 %v4824_v50, %v1052_v42  ;;  %v663_v46 = vsel %vm648_vm0, %v6316_v2, %v6315_v49  ;;  %v5048_v2 = vld [vmem:[%s3463_s20 + $0x60] sm:$0xff]  ;;  %v6323_v53 = vld [vmem:[#allocation72_spill] sm:$0xff] }
 0x5e2   : > { %6321 = vst [vmem:[#allocation131_spill] sm:$0xff] %v5048_v2  ;;  %v439_v37 = vmul.f32 %v5048_v2, %v6310_v30  ;;  %v986_v57 = vsel %vm973_vm1, %v6314_v31, %v6323_v53  ;;  %v6334_v53 = vld [vmem:[#allocation71_spill] sm:$0xff]  ;;  %v6355_v2 = vld [vmem:[#allocation14_spill] sm:$0xff] }
 0x5e4   : > { %v2451_v7 = vpop.permute.xlu1 %2450  ;;  %v5028_v38 = vpop.permute.xlu2 %2464  ;;  %v728_v13 = vadd.f32 %v662_v17, %v439_v37  ;;  %v6328_v17 = vld [vmem:[#allocation38_spill] sm:$0xff] }
 0x5e5   : > { %v5033_v41 = vpop.permute.xlu0 %2448  ;;  %v2499_v9 = vsel %vm2486_vm2, %v2451_v7, %v4967_v14  ;;  %v730_v7 = vadd.f32 %v663_v46, %v441_v61  ;;  %v6329_v61 = vld [vmem:[#allocation12_spill] sm:$0xff] }
 0x5e6   : > { %6317 = vst [vmem:[#allocation109_spill] sm:$0xff] %v5033_v41  ;;  %v2498_v42 = vsel %vm2486_vm2, %v4941_v32, %v5033_v41  ;;  %v5045_v24 = vadd.f32 %v2499_v9, %v2360_v28  ;;  %v1053_v18 = vadd.f32 %v986_v57, %v728_v13  ;;  %v6326_v41 = vld [vmem:[#allocation40_spill] sm:$0xff]  ;;  %v664_v13 = vsel %vm648_vm0, %v6315_v49, %v6328_v17 }
 0x5e7   : > { %v5052_v23 = vadd.f32 %v2498_v42, %v2358_v12  ;;  %v1055_v44 = vadd.f32 %v6324_v39, %v730_v7  ;;  %v444_v37 = vmul.f32 0.0, %v6329_v61 }
 0x5e8   : > { %6320 = vst [vmem:[#allocation132_spill] sm:$0xff] %v5045_v24  ;;  %v6325_v24 = vld [vmem:[#allocation39_spill] sm:$0xff]  ;;  %v2361_v46 = vmul.f32 %v4882_v22, %v1053_v18 }
 0x5e9   : > { %6322 = vst [vmem:[#allocation108_spill] sm:$0xff] %v5052_v23  ;;  %v2363_v28 = vmul.f32 %v4824_v50, %v1055_v44  ;;  %v665_v12 = vsel %vm648_vm0, %v6326_v41, %v6325_v24  ;;  %v5079_v41 = vld [vmem:[%s3463_s20 + $0x70] sm:$0xff]  ;;  %v6333_v23 = vld [vmem:[#allocation75_spill] sm:$0xff] }
 0x5ea   : > { %6331 = vst [vmem:[#allocation110_spill] sm:$0xff] %v5079_v41  ;;  %v442_v18 = vmul.f32 %v5079_v41, %v6319_v55  ;;  %v988_v49 = vsel %vm973_vm1, %v6324_v39, %v6333_v23  ;;  %v6343_v23 = vld [vmem:[#allocation74_spill] sm:$0xff] }
 0x5ec   : > { %v2457_v32 = vpop.permute.xlu1 %2456  ;;  %v5059_v9 = vpop.permute.xlu2 %2470  ;;  %v731_v17 = vadd.f32 %v664_v13, %v442_v18  ;;  %v6338_v13 = vld [vmem:[#allocation41_spill] sm:$0xff] }
 0x5ed   : > { %v5064_v42 = vpop.permute.xlu0 %2454  ;;  %v2501_v31 = vsel %vm2486_vm2, %v2457_v32, %v4997_v36  ;;  %v733_v32 = vadd.f32 %v665_v12, %v444_v37  ;;  %v6339_v37 = vld [vmem:[#allocation11_spill] sm:$0xff] }
 0x5ee   : > { %6327 = vst [vmem:[#allocation93_spill] sm:$0xff] %v5064_v42  ;;  %v2500_v44 = vsel %vm2486_vm2, %v4967_v14, %v5064_v42  ;;  %v5076_v7 = vadd.f32 %v2501_v31, %v2363_v28  ;;  %v1056_v56 = vadd.f32 %v988_v49, %v731_v17  ;;  %v6336_v42 = vld [vmem:[#allocation42_spill] sm:$0xff]  ;;  %v666_v17 = vsel %vm648_vm0, %v6325_v24, %v6338_v13 }
 0x5ef   : > { %v5083_v57 = vadd.f32 %v2500_v44, %v2361_v46  ;;  %v1058_v30 = vadd.f32 %v6334_v53, %v733_v32  ;;  %v447_v18 = vmul.f32 0.0, %v6339_v37 }
 0x5f0   : > { %6330 = vst [vmem:[#allocation136_spill] sm:$0xff] %v5076_v7  ;;  %v6335_v7 = vld [vmem:[#allocation43_spill] sm:$0xff]  ;;  %v2364_v12 = vmul.f32 %v4882_v22, %v1056_v56 }
 0x5f1   : > { %6332 = vst [vmem:[#allocation135_spill] sm:$0xff] %v5083_v57  ;;  %v2366_v28 = vmul.f32 %v4824_v50, %v1058_v30  ;;  %v667_v46 = vsel %vm648_vm0, %v6336_v42, %v6335_v7  ;;  %v5110_v42 = vld [vmem:[%s3463_s20 + $0x80] sm:$0xff]  ;;  %v6342_v57 = vld [vmem:[#allocation78_spill] sm:$0xff] }
 0x5f2   : > { %v445_v56 = vmul.f32 %v5110_v42, %v6329_v61  ;;  %v990_v24 = vsel %vm973_vm1, %v6334_v53, %v6342_v57 }
 0x5f4   : > { %v2463_v14 = vpop.permute.xlu1 %2462  ;;  %v5090_v31 = vpop.permute.xlu2 %2476  ;;  %v734_v13 = vadd.f32 %v666_v17, %v445_v56  ;;  %v6348_v56 = vld [vmem:[#allocation44_spill] sm:$0xff] }
 0x5f5   : > { %v5095_v44 = vpop.permute.xlu0 %2460  ;;  %v2503_v39 = vsel %vm2486_vm2, %v2463_v14, %v5028_v38  ;;  %v736_v14 = vadd.f32 %v667_v46, %v447_v18 }
 0x5f6   : > { %6337 = vst [vmem:[#allocation134_spill] sm:$0xff] %v5095_v44  ;;  %v2502_v30 = vsel %vm2486_vm2, %v4997_v36, %v5095_v44  ;;  %v5107_v32 = vadd.f32 %v2503_v39, %v2366_v28  ;;  %v1059_v36 = vadd.f32 %v990_v24, %v734_v13  ;;  %v6344_v44 = vld [vmem:[#allocation13_spill] sm:$0xff]  ;;  %v668_v13 = vsel %vm648_vm0, %v6335_v7, %v6348_v56 }
 0x5f7   : > { %v5114_v49 = vadd.f32 %v2502_v30, %v2364_v12  ;;  %v1061_v55 = vadd.f32 %v6343_v23, %v736_v14  ;;  %v450_v61 = vmul.f32 0.0, %v6344_v44  ;;  %v6345_v12 = vld [vmem:[#allocation46_spill] sm:$0xff]  ;;  %v6346_v30 = vld [vmem:[#allocation45_spill] sm:$0xff] }
 0x5f8   : > { %6340 = vst [vmem:[#allocation111_spill] sm:$0xff] %v5107_v32  ;;  %v669_v46 = vsel %vm648_vm0, %v6346_v30, %v6345_v12  ;;  %v2367_v53 = vmul.f32 %v4882_v22, %v1059_v36  ;;  %v5144_v30 = vld [vmem:[%s3463_s20 + $0x90] sm:$0xff] }
 0x5f9   : > { %6341 = vst [vmem:[#allocation139_spill] sm:$0xff] %v5114_v49  ;;  %v2369_v39 = vmul.f32 %v4824_v50, %v1061_v55  ;;  %v1947_v55 = vsel %vm648_vm0, %v4346_v26, %v4356_v35  ;;  %v448_v36 = vmul.f32 %v5144_v30, %v6339_v37  ;;  %v6351_v49 = vld [vmem:[#allocation137_spill] sm:$0xff]  ;;  %v739_v57 = vadd.f32 %v669_v46, %v450_v61 }
 0x5fa   : > { %v6353_v35 = vld [vmem:[#allocation81_spill] sm:$0xff] }
 0x5fb   : > { %v992_v59 = vsel %vm973_vm1, %v6343_v23, %v6353_v35  ;;  %v6356_v23 = vld [vmem:[#allocation49_spill] sm:$0xff] }
 0x5fc   : > { %v2469_v28 = vpop.permute.xlu1 %2468  ;;  %v5121_v32 = vpop.permute.xlu2 %2482 }
 0x5fd   : > { %v5127_v18 = vpop.permute.xlu0 %2466  ;;  %v2505_v17 = vsel %vm2486_vm2, %v2469_v28, %v5059_v9  ;;  %v5149_v28 = vld [vmem:[%s3463_s20 + $0x8] sm:$0xff] }
 0x5fe   : > { %6347 = vst [vmem:[#allocation138_spill] sm:$0xff] %v5127_v18  ;;  %v2504_v14 = vsel %vm2486_vm2, %v5028_v38, %v5127_v18  ;;  %v5141_v24 = vadd.f32 %v2505_v17, %v2369_v39  ;;  %v1720_v7 = vmul.f32 %v5149_v28, %v6351_v49  ;;  %v2235_v38 = vsel %vm973_vm1, %v4555_v63, %v4546_v5 }
 0x5ff   : > { %6350 = vst [vmem:[#allocation17_spill] sm:$0xff] %v5149_v28  ;;  %v5153_v56 = vadd.f32 %v2504_v14, %v2367_v53  ;;  %v737_v39 = vadd.f32 %v668_v13, %v448_v36  ;;  %v453_v53 = vmul.f32 0.0, %v6355_v2  ;;  %v3256_v28 = vld [vmem:[%s3463_s20 + $0x10] sm:$0xff] }
 0x600   : > { %6349 = vst [vmem:[#allocation15_spill] sm:$0xff] %v5141_v24  ;;  %v2008_v17 = vadd.f32 %v1947_v55, %v1720_v7  ;;  %v6354_v24 = vld [vmem:[#allocation77_spill] sm:$0xff]  ;;  %v6359_v55 = vld [vmem:[#allocation48_spill] sm:$0xff] }
 0x601   : > { %6352 = vst [vmem:[#allocation51_spill] sm:$0xff] %v5153_v56  ;;  %v1064_v18 = vadd.f32 %v6354_v24, %v739_v57  ;;  %v1062_v37 = vadd.f32 %v992_v59, %v737_v39  ;;  %v6357_v56 = vld [vmem:[#allocation47_spill] sm:$0xff]  ;;  %v670_v36 = vsel %vm648_vm0, %v6345_v12, %v6359_v55  ;;  %v5189_v39 = vld [vmem:[%s3463_s20 + $0x18] sm:$0xff] }
 0x602   : > { %v2296_v41 = vadd.f32 %v2235_v38, %v2008_v17  ;;  %v671_v35 = vsel %vm648_vm0, %v6357_v56, %v6356_v23  ;;  %6361 = vst [vmem:[#allocation52_spill] sm:$0xff] %v5189_v39 }
 0x603   : > { %v2372_v61 = vmul.f32 %v4824_v50, %v1064_v18  ;;  %v2370_v13 = vmul.f32 %v4882_v22, %v1062_v37  ;;  %v1949_v18 = vsel %vm648_vm0, %v4351_v10, %v4364_v48  ;;  %v3250_v37 = vld [vmem:[%s3463_s20 + $0xa0] sm:$0xff]  ;;  %v742_v48 = vadd.f32 %v671_v35, %v453_v53  ;;  %v6367_v53 = vld [vmem:[#allocation85_spill] sm:$0xff] }
 0x604   : > { %v2475_v14 = vpop.permute.xlu1 %2474  ;;  %v5164_v46 = vpop.permute.xlu2 %2588  ;;  %v451_v38 = vmul.f32 %v3250_v37, %v6344_v44 }
 0x605   : > { %v5169_v5 = vpop.permute.xlu0 %2472  ;;  %v2507_v59 = vsel %vm2486_vm2, %v2475_v14, %v5090_v31  ;;  %v2597_v57 = vmul.f32 %v5164_v46, %v2296_v41  ;;  %v6362_v41 = vld [vmem:[#allocation142_spill] sm:$0xff]  ;;  %v6364_v14 = vld [vmem:[#allocation83_spill] sm:$0xff] }
 0x606   : > { %6358 = vst [vmem:[#allocation16_spill] sm:$0xff] %v5169_v5  ;;  %v2506_v56 = vsel %vm2486_vm2, %v5059_v9, %v5169_v5  ;;  %v5184_v7 = vadd.f32 %v2507_v59, %v2372_v61  ;;  %v1723_v17 = vmul.f32 %v5189_v39, %v6362_v41  ;;  %v994_v9 = vsel %vm973_vm1, %v6354_v24, %v6364_v14  ;;  %v6389_v39 = vld [vmem:[#allocation152_spill] sm:$0xff] }
 0x607   : > { %v5193_v12 = vadd.f32 %v2506_v56, %v2370_v13  ;;  %2671 = vrot.lane.b32.xlu2 %v2597_v57, %s3305_s6  ;;  %v2237_v61 = vsel %vm973_vm1, %v4581_v3, %v4572_v8  ;;  %v740_v59 = vadd.f32 %v670_v36, %v451_v38  ;;  %v3252_v13 = vld [vmem:[%s3463_s20 + $0xb0] sm:$0xff] }
 0x608   : > { %6360 = vst [vmem:[#allocation20_spill] sm:$0xff] %v5184_v7  ;;  %v6365_v7 = vld [vmem:[#allocation50_spill] sm:$0xff]  ;;  %v2011_v5 = vadd.f32 %v1949_v18, %v1723_v17  ;;  %v454_v56 = vmul.f32 %v3252_v13, %v6355_v2 }
 0x609   : > { %6363 = vst [vmem:[#allocation19_spill] sm:$0xff] %v5193_v12  ;;  %v672_v55 = vsel %vm648_vm0, %v6356_v23, %v6365_v7  ;;  %v6366_v12 = vld [vmem:[#allocation80_spill] sm:$0xff]  ;;  %v1065_v35 = vadd.f32 %v994_v9, %v740_v59 }
 0x60a   : > { %v1067_v57 = vadd.f32 %v6366_v12, %v742_v48  ;;  %v996_v24 = vsel %vm973_vm1, %v6366_v12, %v6367_v53  ;;  %v2299_v14 = vadd.f32 %v2237_v61, %v2011_v5  ;;  %v743_v44 = vadd.f32 %v672_v55, %v454_v56  ;;  %v5231_v9 = vld [vmem:[%s3463_s20 + $0x28] sm:$0xff]  ;;  %v6385_v53 = vld [vmem:[#allocation174_spill] sm:$0xff] }
 0x60b   : > { %v2373_v23 = vmul.f32 %v4882_v22, %v1065_v35  ;;  %v1951_v5 = vsel %vm648_vm0, %v4360_v60, %v4371_v52  ;;  %v1718_v12 = vmul.f32 0.0, %v6351_v49  ;;  %v1946_v48 = vsel %vm648_vm0, %v4358_v29, %v4346_v26  ;;  %6370 = vst [vmem:[#allocation22_spill] sm:$0xff] %v5231_v9  ;;  %v3254_v52 = vld [vmem:[%s3463_s20] sm:$0xff]  ;;  %v6373_v59 = vld [vmem:[#allocation148_spill] sm:$0xff] }
 0x60c   : > { %v2481_v8 = vpop.permute.xlu1 %2480  ;;  %v2375_v3 = vmul.f32 %v4824_v50, %v1067_v57  ;;  %v2600_v38 = vmul.f32 %v5164_v46, %v2299_v14  ;;  %v1068_v17 = vadd.f32 %v996_v24, %v743_v44  ;;  %v6371_v14 = vld [vmem:[#allocation141_spill] sm:$0xff]  ;;  %v1743_v56 = vmul.f32 %v5110_v42, %v6373_v59  ;;  %v5243_v57 = vld [vmem:[%s3463_s20 + $0x38] sm:$0xff]  ;;  %v6375_v35 = vld [vmem:[#allocation140_spill] sm:$0xff] }
 0x60d   : > { %v5212_v36 = vpop.permute.xlu0 %2478  ;;  %v2509_v18 = vsel %vm2486_vm2, %v2481_v8, %v5121_v32  ;;  %v1726_v44 = vmul.f32 %v5231_v9, %v6371_v14  ;;  %6374 = vst [vmem:[#allocation56_spill] sm:$0xff] %v5243_v57  ;;  %v1729_v26 = vmul.f32 %v5243_v57, %v6375_v35  ;;  %v2239_v24 = vsel %vm973_vm1, %v4612_v51, %v4603_v25  ;;  %v6376_v8 = vld [vmem:[#allocation150_spill] sm:$0xff]  ;;  %v6380_v51 = vld [vmem:[#allocation168_spill] sm:$0xff] }
 0x60e   : > { %6368 = vst [vmem:[#allocation23_spill] sm:$0xff] %v5212_v36  ;;  %v2508_v55 = vsel %vm2486_vm2, %v5090_v31, %v5212_v36  ;;  %v5224_v50 = vadd.f32 %v2509_v18, %v2375_v3  ;;  %v1719_v31 = vmul.f32 %v3254_v52, %v6351_v49  ;;  %v1752_v3 = vmul.f32 %v3252_v13, %v6376_v8  ;;  %v6381_v13 = vld [vmem:[#allocation169_spill] sm:$0xff]  ;;  %v6388_v9 = vld [vmem:[#allocation154_spill] sm:$0xff] }
 0x60f   : > { %v5235_v61 = vadd.f32 %v2508_v55, %v2373_v23  ;;  %2677 = vrot.lane.b32.xlu2 %v2600_v38, %s3305_s6  ;;  %v2006_v23 = vadd.f32 %v4358_v29, %v1718_v12  ;;  %v2014_v18 = vadd.f32 %v1951_v5, %v1726_v44  ;;  %v2234_v49 = vsel %vm973_vm1, %v4491_v27, %v4555_v63  ;;  %v6377_v38 = vld [vmem:[#allocation147_spill] sm:$0xff]  ;;  %v6378_v55 = vld [vmem:[#allocation149_spill] sm:$0xff]  ;;  %v6382_v44 = vld [vmem:[#allocation172_spill] sm:$0xff] }
 0x610   : > { %6369 = vst [vmem:[#allocation53_spill] sm:$0xff] %v5224_v50  ;;  %v1746_v42 = vmul.f32 %v5144_v30, %v6377_v38  ;;  %v1749_v52 = vmul.f32 %v3250_v37, %v6378_v55  ;;  %v2007_v50 = vadd.f32 %v1946_v48, %v1719_v31  ;;  %v1962_v29 = vsel %vm648_vm0, %v6381_v13, %v6380_v51  ;;  %v6383_v63 = vld [vmem:[#allocation171_spill] sm:$0xff]  ;;  %v6386_v48 = vld [vmem:[#allocation178_spill] sm:$0xff]  ;;  %v6387_v31 = vld [vmem:[#allocation176_spill] sm:$0xff] }
 0x611   : > { %6372 = vst [vmem:[#allocation26_spill] sm:$0xff] %v5235_v61  ;;  %v6379_v61 = vld [vmem:[#allocation151_spill] sm:$0xff]  ;;  %v2294_v5 = vadd.f32 %v4491_v27, %v2006_v23  ;;  %v2302_v12 = vadd.f32 %v2239_v24, %v2014_v18  ;;  %v1964_v7 = vsel %vm648_vm0, %v6383_v63, %v6382_v44  ;;  %v1968_v36 = vsel %vm648_vm0, %v6387_v31, %v6386_v48 }
 0x612   : > { %v1948_v25 = vsel %vm648_vm0, %v6379_v61, %v4351_v10  ;;  %v6384_v30 = vld [vmem:[#allocation175_spill] sm:$0xff]  ;;  %v2295_v10 = vadd.f32 %v2234_v49, %v2007_v50  ;;  %v2376_v27 = vmul.f32 %v4882_v22, %v1068_v17  ;;  %v1953_v31 = vsel %vm648_vm0, %v6389_v39, %v6388_v9 }
 0x613   : > { %v1966_v37 = vsel %vm648_vm0, %v6385_v53, %v6384_v30  ;;  %v2603_v23 = vmul.f32 %v5164_v46, %v2302_v12  ;;  %v2031_v50 = vadd.f32 %v1962_v29, %v1743_v56  ;;  %v1721_v22 = vmul.f32 0.0, %v6362_v41 }
 0x614   : > { %v5274_v2 = vpop.permute.xlu1 %2586  ;;  %v2034_v17 = vadd.f32 %v1964_v7, %v1746_v42  ;;  %v1722_v9 = vmul.f32 %v3256_v28, %v6362_v41  ;;  %v2040_v56 = vadd.f32 %v1968_v36, %v1752_v3  ;;  %v2017_v42 = vadd.f32 %v1953_v31, %v1729_v26  ;;  %v6391_v26 = vld [vmem:[#allocation155_spill] sm:$0xff]  ;;  %v6392_v31 = vld [vmem:[#allocation153_spill] sm:$0xff] }
 0x615   : > { %v5276_v57 = vpop.permute.xlu0 %2484  ;;  %v2595_v24 = vmul.f32 %v5274_v2, %v2294_v5  ;;  %v5283_v18 = vsel %vm2590_vm4, %v5274_v2, %v5164_v46  ;;  %v2037_v5 = vadd.f32 %v1966_v37, %v1749_v52  ;;  %v2319_v29 = vadd.f32 %v4807_v19, %v2031_v50  ;;  %v3258_v50 = vld [vmem:[%s3463_s20 + $0x20] sm:$0xff] }
 0x616   : > { %v2510_v49 = vsel %vm2486_vm2, %v5121_v32, %v5276_v57  ;;  %v2596_v53 = vmul.f32 %v5283_v18, %v2295_v10  ;;  %v2241_v32 = vsel %vm973_vm1, %v4643_v4, %v4634_v45  ;;  %v2009_v7 = vadd.f32 %v6379_v61, %v1721_v22  ;;  %v6390_v61 = vld [vmem:[#allocation157_spill] sm:$0xff] }
 0x617   : > { %v5293_v12 = vadd.f32 %v2510_v49, %v2376_v27  ;;  %2667 = vrot.lane.b32.xlu0 %v2595_v24, %s3305_s6  ;;  %2683 = vrot.lane.b32.xlu2 %v2603_v23, %s3305_s6  ;;  %v2322_v52 = vadd.f32 %v4839_v6, %v2034_v17  ;;  %v2325_v37 = vadd.f32 %v4851_v15, %v2037_v5  ;;  %v6393_v24 = vld [vmem:[#allocation143_spill] sm:$0xff] }
 0x618   : > { %2669 = vrot.lane.b32.xlu1 %v2596_v53, %s3305_s6  ;;  %v2010_v10 = vadd.f32 %v1948_v25, %v1722_v9  ;;  %v2328_v28 = vadd.f32 %v4864_v34, %v2040_v56  ;;  %v5309_v41 = vmul.f32 %v5283_v18, %v2319_v29  ;;  %v2297_v45 = vadd.f32 %v4502_v40, %v2009_v7  ;;  %v6394_v7 = vld [vmem:[#allocation161_spill] sm:$0xff] }
 0x619   : > { %v2305_v4 = vadd.f32 %v2241_v32, %v2017_v42  ;;  %v5313_v19 = vmul.f32 %v5283_v18, %v2322_v52  ;;  %v5316_v53 = vmul.f32 %v5283_v18, %v2325_v37  ;;  %v1955_v40 = vsel %vm648_vm0, %v6391_v26, %v6390_v61  ;;  %v6395_v42 = vld [vmem:[#allocation159_spill] sm:$0xff]  ;;  %v6396_v37 = vld [vmem:[#allocation156_spill] sm:$0xff] }
 0x61a   : > { %v2298_v6 = vadd.f32 %v4590_v62, %v2010_v10  ;;  %v5320_v15 = vmul.f32 %v5283_v18, %v2328_v28  ;;  %v2598_v34 = vmul.f32 %v5274_v2, %v2297_v45  ;;  %v1724_v25 = vmul.f32 0.0, %v6371_v14  ;;  %v5333_v62 = vld [vmem:[%s3463_s20 + $0x48] sm:$0xff]  ;;  %v6397_v28 = vld [vmem:[#allocation145_spill] sm:$0xff] }
 0x61b   : > { %v2606_v36 = vmul.f32 %v5164_v46, %v2305_v4  ;;  %v1950_v27 = vsel %vm648_vm0, %v6392_v31, %v4360_v60  ;;  %v1732_v23 = vmul.f32 %v5333_v62, %v6393_v24  ;;  %v1725_v49 = vmul.f32 %v3258_v50, %v6371_v14  ;;  %v3260_v45 = vld [vmem:[%s3463_s20 + $0x30] sm:$0xff]  ;;  %v6400_v50 = vld [vmem:[#allocation158_spill] sm:$0xff] }
 0x61c   : > { %v2599_v3 = vmul.f32 %v5283_v18, %v2298_v6  ;;  %v2243_v22 = vsel %vm973_vm1, %v4674_v0, %v4665_v21  ;;  %v2012_v60 = vadd.f32 %v6392_v31, %v1724_v25  ;;  %v1957_v21 = vsel %vm648_vm0, %v6395_v42, %v6394_v7  ;;  %v6404_v7 = vld [vmem:[#allocation98_spill] sm:$0xff] }
 0x61d   : > { %v2020_v17 = vadd.f32 %v1955_v40, %v1732_v23  ;;  %v2013_v5 = vadd.f32 %v1950_v27, %v1725_v49  ;;  %v1727_v52 = vmul.f32 0.0, %v6375_v35  ;;  %v1952_v10 = vsel %vm648_vm0, %v6396_v37, %v6389_v39  ;;  %v6399_v27 = vld [vmem:[#allocation162_spill] sm:$0xff] }
 0x61e   : > { %v2300_v9 = vadd.f32 %v4524_v1, %v2012_v60  ;;  %v5359_v1 = vld [vmem:[%s3463_s20 + $0x58] sm:$0xff]  ;;  %v1728_v4 = vmul.f32 %v3260_v45, %v6375_v35  ;;  %v2245_v6 = vsel %vm973_vm1, %v4705_v20, %v4696_v54  ;;  %v6398_v35 = vld [vmem:[#allocation164_spill] sm:$0xff]  ;;  %v1730_v20 = vmul.f32 0.0, %v6393_v24 }
 0x61f   : > { %2673 = vrot.lane.b32.xlu0 %v2598_v34, %s3305_s6  ;;  %2689 = vrot.lane.b32.xlu2 %v2606_v36, %s3305_s6  ;;  %v2308_v56 = vadd.f32 %v2243_v22, %v2020_v17  ;;  %v2301_v32 = vadd.f32 %v4621_v11, %v2013_v5  ;;  %v1735_v11 = vmul.f32 %v5359_v1, %v6397_v28  ;;  %v6401_v22 = vld [vmem:[#allocation144_spill] sm:$0xff]  ;;  %v6402_v17 = vld [vmem:[#allocation87_spill] sm:$0xff] }
 0x620   : > { %2675 = vrot.lane.b32.xlu1 %v2599_v3, %s3305_s6  ;;  %v2601_v29 = vmul.f32 %v5274_v2, %v2300_v9  ;;  %v2015_v39 = vadd.f32 %v6396_v37, %v1727_v52  ;;  %v2016_v36 = vadd.f32 %v1952_v10, %v1728_v4  ;;  %v1959_v23 = vsel %vm648_vm0, %v6399_v27, %v6398_v35  ;;  %v5411_v4 = vld [vmem:[%s3463_s20 + $0x78] sm:$0xff] }
 0x621   : > { %v2609_v14 = vmul.f32 %v5164_v46, %v2308_v56  ;;  %v2602_v0 = vmul.f32 %v5283_v18, %v2301_v32  ;;  %v2023_v34 = vadd.f32 %v1957_v21, %v1735_v11  ;;  %v1954_v49 = vsel %vm648_vm0, %v6400_v50, %v6391_v26  ;;  %v6403_v32 = vld [vmem:[#allocation112_spill] sm:$0xff] }
 0x622   : > { %v2303_v61 = vadd.f32 %v4548_v33, %v2015_v39  ;;  %v2304_v3 = vadd.f32 %v4652_v43, %v2016_v36  ;;  %v5385_v33 = vld [vmem:[%s3463_s20 + $0x68] sm:$0xff]  ;;  %v1731_v60 = vmul.f32 %v4986_v58, %v6393_v24  ;;  %v2247_v5 = vsel %vm973_vm1, %v6402_v17, %v4727_v47  ;;  %v6405_v58 = vld [vmem:[#allocation167_spill] sm:$0xff]  ;;  %v6406_v24 = vld [vmem:[#allocation165_spill] sm:$0xff] }
 0x623   : > { %v2311_v40 = vadd.f32 %v2245_v6, %v2023_v34  ;;  %v1738_v43 = vmul.f32 %v5385_v33, %v6401_v22  ;;  %v2018_v26 = vadd.f32 %v6400_v50, %v1730_v20  ;;  %v1961_v37 = vsel %vm648_vm0, %v6406_v24, %v6405_v58  ;;  %v6407_v11 = vld [vmem:[#allocation160_spill] sm:$0xff]  ;;  %v6408_v6 = vld [vmem:[#allocation146_spill] sm:$0xff]  ;;  %v6414_v17 = vld [vmem:[#allocation163_spill] sm:$0xff] }
 0x624   : > { %v2604_v25 = vmul.f32 %v5274_v2, %v2303_v61  ;;  %v2605_v54 = vmul.f32 %v5283_v18, %v2304_v3  ;;  %v2019_v56 = vadd.f32 %v1954_v49, %v1731_v60  ;;  %v1733_v10 = vmul.f32 0.0, %v6397_v28  ;;  %v6409_v36 = vld [vmem:[#allocation96_spill] sm:$0xff]  ;;  %v6410_v61 = vld [vmem:[#allocation114_spill] sm:$0xff] }
 0x625   : > { %v2612_v31 = vmul.f32 %v5164_v46, %v2311_v40  ;;  %v2026_v9 = vadd.f32 %v1959_v23, %v1738_v43  ;;  %v1956_v45 = vsel %vm648_vm0, %v6407_v11, %v6395_v42  ;;  %v1741_v39 = vmul.f32 %v5411_v4, %v6408_v6 }
 0x626   : > { %v2307_v21 = vadd.f32 %v6404_v7, %v2019_v56  ;;  %v1734_v34 = vmul.f32 %v5017_v16, %v6397_v28  ;;  %v2249_v40 = vsel %vm973_vm1, %v6410_v61, %v6409_v36  ;;  %v2021_v42 = vadd.f32 %v6407_v11, %v1733_v10  ;;  %v6413_v16 = vld [vmem:[#allocation170_spill] sm:$0xff]  ;;  %v6415_v56 = vld [vmem:[#allocation131_spill] sm:$0xff] }
 0x627   : > { %2679 = vrot.lane.b32.xlu0 %v2601_v29, %s3305_s6  ;;  %2695 = vrot.lane.b32.xlu2 %v2609_v14, %s3305_s6  ;;  %v2306_v29 = vadd.f32 %v6403_v32, %v2018_v26  ;;  %v2314_v14 = vadd.f32 %v2247_v5, %v2026_v9  ;;  %v2029_v3 = vadd.f32 %v1961_v37, %v1741_v39  ;;  %v1736_v60 = vmul.f32 0.0, %v6401_v22  ;;  %v5437_v26 = vld [vmem:[%s3463_s20 + $0x88] sm:$0xff]  ;;  %v6419_v37 = vld [vmem:[#allocation119_spill] sm:$0xff]  ;;  %v6421_v36 = vld [vmem:[#allocation166_spill] sm:$0xff] }
 0x628   : > { %2681 = vrot.lane.b32.xlu1 %v2602_v0, %s3305_s6  ;;  %v2608_v47 = vmul.f32 %v5283_v18, %v2307_v21  ;;  %v1963_v28 = vsel %vm648_vm0, %v6380_v51, %v6413_v16  ;;  %v1958_v5 = vsel %vm648_vm0, %v6414_v17, %v6399_v27  ;;  %v1744_v9 = vmul.f32 %v5437_v26, %v6373_v59  ;;  %v6416_v32 = vld [vmem:[#allocation88_spill] sm:$0xff]  ;;  %v6426_v16 = vld [vmem:[#allocation101_spill] sm:$0xff] }
 0x629   : > { %v2607_v0 = vmul.f32 %v5274_v2, %v2306_v29  ;;  %v2615_v52 = vmul.f32 %v5164_v46, %v2314_v14  ;;  %v2317_v23 = vadd.f32 %v2249_v40, %v2029_v3  ;;  %v1737_v51 = vmul.f32 %v6415_v56, %v6401_v22  ;;  %v6417_v29 = vld [vmem:[#allocation100_spill] sm:$0xff]  ;;  %v6420_v22 = vld [vmem:[#allocation173_spill] sm:$0xff]  ;;  %v5463_v40 = vld [vmem:[%s3463_s20 + $0x98] sm:$0xff] }
 0x62a   : > { %v2251_v14 = vsel %vm973_vm1, %v6417_v29, %v6416_v32  ;;  %v2024_v27 = vadd.f32 %v6414_v17, %v1736_v60  ;;  %v2032_v7 = vadd.f32 %v1963_v28, %v1744_v9  ;;  %v1960_v61 = vsel %vm648_vm0, %v6421_v36, %v6406_v24  ;;  %v5486_v56 = vld [vmem:[%s3463_s20 + $0xa8] sm:$0xff]  ;;  %v6428_v32 = vld [vmem:[#allocation99_spill] sm:$0xff] }
 0x62b   : > { %v2618_v49 = vmul.f32 %v5164_v46, %v2317_v23  ;;  %v2025_v21 = vadd.f32 %v1958_v5, %v1737_v51  ;;  %v1742_v9 = vmul.f32 0.0, %v6373_v59  ;;  %v1750_v51 = vmul.f32 %v5486_v56, %v6378_v55  ;;  %v6429_v29 = vld [vmem:[#allocation92_spill] sm:$0xff] }
 0x62c   : > { %v2320_v58 = vadd.f32 %v2251_v14, %v2032_v7  ;;  %v2255_v14 = vsel %vm973_vm1, %v6429_v29, %v6428_v32  ;;  %v6448_v32 = vld [vmem:[#allocation21_spill] sm:$0xff] }
 0x62e   : > { %v2621_v11 = vmul.f32 %v5164_v46, %v2320_v58 }
 0x62f   : > { %2685 = vrot.lane.b32.xlu0 %v2604_v25, %s3305_s6  ;;  %2701 = vrot.lane.b32.xlu2 %v2612_v31, %s3305_s6  ;;  %v2022_v25 = vadd.f32 %v1956_v45, %v1734_v34  ;;  %v6411_v31 = vld [vmem:[#allocation95_spill] sm:$0xff]  ;;  %v1965_v45 = vsel %vm648_vm0, %v6382_v44, %v6420_v22  ;;  %v1739_v34 = vmul.f32 0.0, %v6408_v6  ;;  %v6422_v44 = vld [vmem:[#allocation110_spill] sm:$0xff] }
 0x630   : > { %2687 = vrot.lane.b32.xlu1 %v2605_v54, %s3305_s6  ;;  %v2309_v35 = vadd.f32 %v6411_v31, %v2021_v42  ;;  %v6412_v54 = vld [vmem:[#allocation113_spill] sm:$0xff]  ;;  %v1747_v42 = vmul.f32 %v5463_v40, %v6377_v38  ;;  %v1740_v3 = vmul.f32 %v6422_v44, %v6408_v6  ;;  %v6437_v44 = vld [vmem:[#allocation54_spill] sm:$0xff] }
 0x631   : > { %v2310_v20 = vadd.f32 %v6412_v54, %v2022_v25  ;;  %v6423_v25 = vld [vmem:[#allocation121_spill] sm:$0xff]  ;;  %v2027_v24 = vadd.f32 %v6421_v36, %v1739_v34 }
 0x632   : > { %v2610_v50 = vmul.f32 %v5274_v2, %v2309_v35  ;;  %v6424_v31 = vld [vmem:[#allocation117_spill] sm:$0xff]  ;;  %v2035_v23 = vadd.f32 %v1965_v45, %v1747_v42  ;;  %v2028_v54 = vadd.f32 %v1960_v61, %v1740_v3  ;;  %v6438_v3 = vld [vmem:[#allocation55_spill] sm:$0xff] }
 0x633   : > { %v2611_v43 = vmul.f32 %v5283_v18, %v2310_v20  ;;  %v2253_v35 = vsel %vm973_vm1, %v6424_v31, %v6423_v25  ;;  %v6425_v20 = vld [vmem:[#allocation116_spill] sm:$0xff]  ;;  %v6427_v6 = vld [vmem:[#allocation177_spill] sm:$0xff]  ;;  %v975_v25 = vsel %vm973_vm1, %v6438_v3, %v6437_v44  ;;  %v6439_v31 = vld [vmem:[#allocation18_spill] sm:$0xff] }
 0x634   : > { %v2316_v28 = vadd.f32 %v6426_v16, %v2028_v54  ;;  %v1967_v17 = vsel %vm648_vm0, %v6384_v30, %v6427_v6  ;;  %v2030_v30 = vadd.f32 %v6381_v13, %v1742_v9  ;;  %v6432_v13 = vld [vmem:[#allocation125_spill] sm:$0xff]  ;;  %v6440_v54 = vld [vmem:[#allocation174_spill] sm:$0xff]  ;;  %v6458_v44 = vld [vmem:[#allocation56_spill] sm:$0xff] }
 0x635   : > { %v6436_v36 = vld [vmem:[#allocation97_spill] sm:$0xff] }
 0x636   : > { %v2617_v5 = vmul.f32 %v5283_v18, %v2316_v28  ;;  %v6442_v28 = vld [vmem:[#allocation6_spill] sm:$0xff]  ;;  %v6447_v9 = vld [vmem:[#allocation57_spill] sm:$0xff] }
 0x637   : > { %2691 = vrot.lane.b32.xlu0 %v2607_v0, %s3305_s6  ;;  %2707 = vrot.lane.b32.xlu2 %v2615_v52, %s3305_s6  ;;  %v6418_v0 = vld [vmem:[#allocation89_spill] sm:$0xff] }
 0x638   : > { %2693 = vrot.lane.b32.xlu1 %v2608_v47, %s3305_s6  ;;  %v2312_v52 = vadd.f32 %v6418_v0, %v2024_v27  ;;  %v2313_v47 = vadd.f32 %v6419_v37, %v2025_v21  ;;  %v6430_v27 = vld [vmem:[#allocation115_spill] sm:$0xff]  ;;  %v1745_v37 = vmul.f32 0.0, %v6377_v38  ;;  %v6434_v38 = vld [vmem:[#allocation4_spill] sm:$0xff] }
 0x639   : > { %v2318_v59 = vadd.f32 %v6430_v27, %v2030_v30  ;;  %v6449_v27 = vld [vmem:[#allocation176_spill] sm:$0xff] }
 0x63a   : > { %v2613_v10 = vmul.f32 %v5274_v2, %v2312_v52  ;;  %v2614_v39 = vmul.f32 %v5283_v18, %v2313_v47  ;;  %v2038_v18 = vadd.f32 %v1967_v17, %v1750_v51  ;;  %v6431_v52 = vld [vmem:[#allocation179_spill] sm:$0xff]  ;;  %v5505_v47 = vld [vmem:[%s3463_s20 + $0xb8] sm:$0xff]  ;;  %s3306_s20 = smov 17  }
 0x63b   : > { %v2619_v21 = vmul.f32 %v5274_v2, %v2318_v59  ;;  %v1969_v58 = vsel %vm648_vm0, %v6386_v48, %v6431_v52  ;;  %v2033_v48 = vadd.f32 %v6383_v63, %v1745_v37  ;;  %v1748_v63 = vmul.f32 0.0, %v6378_v55  ;;  %v6445_v17 = vld [vmem:[#allocation102_spill] sm:$0xff] }
 0x63c   : > { %v2326_v7 = vadd.f32 %v2255_v14, %v2038_v18  ;;  %v1751_v18 = vmul.f32 0.0, %v6376_v8  ;;  %v6451_v52 = vld [vmem:[#allocation22_spill] sm:$0xff] }
 0x63d   : > { %v2321_v61 = vadd.f32 %v6436_v36, %v2033_v48  ;;  %v6452_v37 = vld [vmem:[#allocation122_spill] sm:$0xff] }
 0x63e   : > { %v2627_v0 = vmul.f32 %v5164_v46, %v2326_v7  ;;  %v2039_v59 = vadd.f32 %v6449_v27, %v1751_v18  ;;  %v6470_v18 = vld [vmem:[#allocation70_spill] sm:$0xff]  ;;  %v6471_v27 = vld [vmem:[#allocation69_spill] sm:$0xff] }
 0x63f   : > { %2697 = vrot.lane.b32.xlu0 %v2610_v50, %s3305_s6  ;;  %2713 = vrot.lane.b32.xlu2 %v2618_v49, %s3305_s6  ;;  %v2315_v50 = vadd.f32 %v6425_v20, %v2027_v24  ;;  %v2323_v49 = vadd.f32 %v2253_v35, %v2035_v23  ;;  %v2622_v24 = vmul.f32 %v5274_v2, %v2321_v61 }
 0x640   : > { %2699 = vrot.lane.b32.xlu1 %v2611_v43, %s3305_s6  ;;  %v2036_v20 = vadd.f32 %v6440_v54, %v1748_v63 }
 0x641   : > { %v2616_v43 = vmul.f32 %v5274_v2, %v2315_v50  ;;  %v2624_v60 = vmul.f32 %v5164_v46, %v2323_v49  ;;  %v6441_v50 = vld [vmem:[#allocation124_spill] sm:$0xff] }
 0x647   : > { %2703 = vrot.lane.b32.xlu0 %v2613_v10, %s3305_s6  ;;  %2719 = vrot.lane.b32.xlu2 %v2621_v11, %s3305_s6  ;;  %v1753_v10 = vmul.f32 %v5505_v47, %v6376_v8  ;;  %v6433_v11 = vld [vmem:[#allocation103_spill] sm:$0xff]  ;;  %v6453_v8 = vld [vmem:[#allocation104_spill] sm:$0xff] }
 0x648   : > { %2705 = vrot.lane.b32.xlu1 %v2614_v39, %s3305_s6  ;;  %v2257_v22 = vsel %vm973_vm1, %v6433_v11, %v6432_v13  ;;  %v6435_v39 = vld [vmem:[#allocation17_spill] sm:$0xff] }
 0x649   : > { %v2041_v45 = vadd.f32 %v1969_v58, %v1753_v10  ;;  %v422_v34 = vmul.f32 %v6435_v39, %v6434_v38  ;;  %v2327_v10 = vadd.f32 %v6452_v37, %v2039_v59  ;;  %v6454_v11 = vld [vmem:[#allocation61_spill] sm:$0xff]  ;;  %v985_v59 = vsel %vm973_vm1, %v6471_v27, %v6470_v18  ;;  %v6488_v27 = vld [vmem:[#allocation134_spill] sm:$0xff] }
 0x64b   : > { %v2329_v42 = vadd.f32 %v2257_v22, %v2041_v45  ;;  %v711_v35 = vadd.f32 %v6439_v31, %v422_v34  ;;  %v6455_v22 = vld [vmem:[#allocation60_spill] sm:$0xff]  ;;  %v2628_v39 = vmul.f32 %v5274_v2, %v2327_v10 }
 0x64c   : > { %v979_v48 = vsel %vm973_vm1, %v6455_v22, %v6454_v11  ;;  %v6456_v45 = vld [vmem:[#allocation24_spill] sm:$0xff]  ;;  %v6474_v22 = vld [vmem:[#allocation109_spill] sm:$0xff] }
 0x64d   : > { %v2630_v23 = vmul.f32 %v5164_v46, %v2329_v42  ;;  %v6444_v46 = vld [vmem:[#allocation118_spill] sm:$0xff]  ;;  %v6457_v42 = vld [vmem:[#allocation7_spill] sm:$0xff] }
 0x64e   : > { %v2324_v6 = vadd.f32 %v6444_v46, %v2036_v20  ;;  %v431_v3 = vmul.f32 %v6458_v44, %v6457_v42  ;;  %v6465_v46 = vld [vmem:[#allocation67_spill] sm:$0xff]  ;;  %v6478_v44 = vld [vmem:[#allocation128_spill] sm:$0xff] }
 0x64f   : > { %2709 = vrot.lane.b32.xlu0 %v2616_v43, %s3305_s6  ;;  %2725 = vrot.lane.b32.xlu2 %v2624_v60, %s3305_s6  ;;  %v6443_v43 = vld [vmem:[#allocation52_spill] sm:$0xff] }
 0x650   : > { %2711 = vrot.lane.b32.xlu1 %v2617_v5, %s3305_s6  ;;  %v425_v60 = vmul.f32 %v6443_v43, %v6442_v28  ;;  %v6446_v5 = vld [vmem:[#allocation58_spill] sm:$0xff]  ;;  %v2625_v14 = vmul.f32 %v5274_v2, %v2324_v6  ;;  %v6464_v43 = vld [vmem:[#allocation105_spill] sm:$0xff] }
 0x651   : > { %v977_v51 = vsel %vm973_vm1, %v6447_v9, %v6446_v5  ;;  %v6466_v6 = vld [vmem:[#allocation66_spill] sm:$0xff] }
 0x652   : > { %v714_v29 = vadd.f32 %v6448_v32, %v425_v60 }
 0x654   : > { %v1039_v30 = vadd.f32 %v977_v51, %v714_v29 }
 0x656   : > { %v2347_v7 = vmul.f32 %v6441_v50, %v1039_v30 }
 0x657   : > { %2715 = vrot.lane.b32.xlu0 %v2619_v21, %s3305_s6  ;;  %2731 = vrot.lane.b32.xlu2 %v2627_v0, %s3305_s6  ;;  %v6450_v0 = vld [vmem:[#allocation3_spill] sm:$0xff] }
 0x658   : > { %2717 = vrot.lane.b32.xlu1 %v5309_v41, %s3305_s6  ;;  %v1036_v41 = vadd.f32 %v975_v25, %v711_v35  ;;  %v428_v58 = vmul.f32 %v6451_v52, %v6450_v0  ;;  %v2552_v13 = vadd.f32 %v6453_v8, %v2347_v7  ;;  %v6459_v25 = vld [vmem:[#allocation106_spill] sm:$0xff]  ;;  %v6460_v35 = vld [vmem:[#allocation64_spill] sm:$0xff] }
 0x659   : > { %v6472_v7 = vld [vmem:[#allocation32_spill] sm:$0xff] }
 0x65a   : > { %v2344_v49 = vmul.f32 %v6441_v50, %v1036_v41  ;;  %v717_v38 = vadd.f32 %v6456_v45, %v428_v58 }
 0x65c   : > { %v2549_v55 = vadd.f32 %v6445_v17, %v2344_v49  ;;  %v1042_v34 = vadd.f32 %v979_v48, %v717_v38  ;;  %v6463_v49 = vld [vmem:[#allocation5_spill] sm:$0xff]  ;;  %v983_v17 = vsel %vm973_vm1, %v6466_v6, %v6465_v46  ;;  %v6484_v6 = vld [vmem:[#allocation90_spill] sm:$0xff] }
 0x65d   : > { %v434_v28 = vmul.f32 %v5333_v62, %v6463_v49 }
 0x65e   : > { %v2350_v36 = vmul.f32 %v6441_v50, %v1042_v34 }
 0x65f   : > { %2721 = vrot.lane.b32.xlu0 %v2622_v24, %s3305_s6  ;;  %2737 = vrot.lane.b32.xlu2 %v2630_v23, %s3305_s6  ;;  %v6461_v24 = vld [vmem:[#allocation63_spill] sm:$0xff] }
 0x660   : > { %2723 = vrot.lane.b32.xlu1 %v5313_v19, %s3305_s6  ;;  %v2555_v31 = vadd.f32 %v6459_v25, %v2350_v36  ;;  %v981_v2 = vsel %vm973_vm1, %v6461_v24, %v6460_v35  ;;  %v6462_v23 = vld [vmem:[#allocation27_spill] sm:$0xff]  ;;  %v6477_v36 = vld [vmem:[#allocation120_spill] sm:$0xff] }
 0x661   : > { %v5533_v16 = vpop.permute.xlu2 %2671  ;;  %v720_v41 = vadd.f32 %v6462_v23, %v431_v3  ;;  %v6479_v25 = vld [vmem:[#allocation35_spill] sm:$0xff] }
 0x662   : > { %v2802_v19 = vadd.f32 %v5533_v16, %v2549_v55  ;;  %v6467_v55 = vld [vmem:[#allocation29_spill] sm:$0xff] }
 0x663   : > { %v1045_v54 = vadd.f32 %v981_v2, %v720_v41  ;;  %v723_v5 = vadd.f32 %v6467_v55, %v434_v28  ;;  %v6480_v41 = vld [vmem:[#allocation10_spill] sm:$0xff]  ;;  %v6485_v55 = vld [vmem:[#allocation123_spill] sm:$0xff] }
 0x665   : > { %v1048_v51 = vadd.f32 %v983_v17, %v723_v5 }
 0x667   : > { %2727 = vrot.lane.b32.xlu0 %v2625_v14, %s3305_s6  ;;  %2876 = vrot.lane.b32.xlu2 %v2802_v19, %s3306_s20  ;;  %v2356_v32 = vmul.f32 %v6441_v50, %v1048_v51  ;;  %v6468_v19 = vld [vmem:[#allocation9_spill] sm:$0xff]  ;;  %v6469_v14 = vld [vmem:[#allocation107_spill] sm:$0xff] }
 0x668   : > { %2729 = vrot.lane.b32.xlu1 %v5316_v53, %s3305_s6  ;;  %v437_v62 = vmul.f32 %v5359_v1, %v6468_v19 }
 0x669   : > { %v5552_v21 = vpop.permute.xlu2 %2677  ;;  %v2561_v30 = vadd.f32 %v6469_v14, %v2356_v32 }
 0x66a   : > { %v2805_v53 = vadd.f32 %v5552_v21, %v2552_v13  ;;  %v726_v0 = vadd.f32 %v6472_v7, %v437_v62  ;;  %v6473_v13 = vld [vmem:[#allocation8_spill] sm:$0xff] }
 0x66b   : > { %v440_v11 = vmul.f32 %v5385_v33, %v6473_v13  ;;  %v6492_v13 = vld [vmem:[#allocation130_spill] sm:$0xff] }
 0x66c   : > { %v1051_v58 = vadd.f32 %v985_v59, %v726_v0 }
 0x66e   : > { %v2359_v37 = vmul.f32 %v6441_v50, %v1051_v58  ;;  %v6490_v58 = vld [vmem:[#allocation78_spill] sm:$0xff] }
 0x66f   : > { %2733 = vrot.lane.b32.xlu0 %v2628_v39, %s3305_s6  ;;  %2882 = vrot.lane.b32.xlu2 %v2805_v53, %s3306_s20  ;;  %v6475_v53 = vld [vmem:[#allocation73_spill] sm:$0xff]  ;;  %v6476_v39 = vld [vmem:[#allocation72_spill] sm:$0xff] }
 0x670   : > { %2735 = vrot.lane.b32.xlu1 %v5320_v15, %s3305_s6  ;;  %v2353_v15 = vmul.f32 %v6441_v50, %v1045_v54  ;;  %v2564_v48 = vadd.f32 %v6474_v22, %v2359_v37  ;;  %v987_v34 = vsel %vm973_vm1, %v6476_v39, %v6475_v53  ;;  %v6481_v54 = vld [vmem:[#allocation93_spill] sm:$0xff] }
 0x671   : > { %v5569_v61 = vpop.permute.xlu2 %2683  ;;  %v6493_v22 = vld [vmem:[#allocation41_spill] sm:$0xff] }
 0x672   : > { %v2808_v63 = vadd.f32 %v5569_v61, %v2555_v31  ;;  %v2558_v60 = vadd.f32 %v6464_v43, %v2353_v15  ;;  %v729_v31 = vadd.f32 %v6479_v25, %v440_v11  ;;  %v6482_v43 = vld [vmem:[#allocation76_spill] sm:$0xff] }
 0x674   : > { %v1054_v33 = vadd.f32 %v987_v34, %v729_v31  ;;  %v6494_v34 = vld [vmem:[#allocation11_spill] sm:$0xff]  ;;  %v6496_v31 = vld [vmem:[#allocation82_spill] sm:$0xff] }
 0x677   : > { %2888 = vrot.lane.b32.xlu2 %v2808_v63, %s3306_s20  ;;  %v443_v63 = vmul.f32 %v5411_v4, %v6480_v41 }
 0x679   : > { %v5581_v20 = vpop.permute.xlu2 %2689 }
 0x67a   : > { %v2811_v9 = vadd.f32 %v5581_v20, %v2558_v60  ;;  %v6483_v60 = vld [vmem:[#allocation75_spill] sm:$0xff] }
 0x67b   : > { %v989_v46 = vsel %vm973_vm1, %v6483_v60, %v6482_v43  ;;  %v6501_v60 = vld [vmem:[#allocation13_spill] sm:$0xff] }
 0x67f   : > { %2894 = vrot.lane.b32.xlu2 %v2811_v9, %s3306_s20  ;;  %v6486_v9 = vld [vmem:[#allocation38_spill] sm:$0xff] }
 0x680   : > { %v732_v51 = vadd.f32 %v6486_v9, %v443_v63  ;;  %v6500_v63 = vld [vmem:[#allocation44_spill] sm:$0xff] }
 0x681   : > { %v5593_v29 = vpop.permute.xlu2 %2695  ;;  %v6503_v9 = vld [vmem:[#allocation84_spill] sm:$0xff] }
 0x682   : > { %v2814_v52 = vadd.f32 %v5593_v29, %v2561_v30  ;;  %v1057_v4 = vadd.f32 %v989_v46, %v732_v51  ;;  %v6487_v30 = vld [vmem:[#allocation12_spill] sm:$0xff]  ;;  %v452_v46 = vmul.f32 %v5486_v56, %v6501_v60  ;;  %v6504_v51 = vld [vmem:[#allocation83_spill] sm:$0xff] }
 0x683   : > { %v446_v18 = vmul.f32 %v5437_v26, %v6487_v30  ;;  %v6507_v30 = vld [vmem:[#allocation48_spill] sm:$0xff] }
 0x687   : > { %2900 = vrot.lane.b32.xlu2 %v2814_v52, %s3306_s20  ;;  %v6489_v52 = vld [vmem:[#allocation79_spill] sm:$0xff] }
 0x688   : > { %v991_v37 = vsel %vm973_vm1, %v6490_v58, %v6489_v52  ;;  %v6508_v52 = vld [vmem:[#allocation14_spill] sm:$0xff] }
 0x689   : > { %v2668_v10 = vpop.permute.xlu0 %2667  ;;  %v5605_v8 = vpop.permute.xlu2 %2701  ;;  %v455_v58 = vmul.f32 %v5505_v47, %v6508_v52 }
 0x68a   : > { %v2670_v1 = vpop.permute.xlu1 %2669  ;;  %v2817_v35 = vadd.f32 %v5605_v8, %v2564_v48  ;;  %v735_v48 = vadd.f32 %v6493_v22, %v446_v18  ;;  %v741_v18 = vadd.f32 %v6507_v30, %v452_v46  ;;  %v6511_v22 = vld [vmem:[#allocation85_spill] sm:$0xff] }
 0x68b   : > { %v2740_v45 = vsel %vm2739_vm5, %v2668_v10, %v2670_v1  ;;  %v2741_v38 = vsel %vm2739_vm5, %v2670_v1, %v5533_v16  ;;  %v2362_v16 = vmul.f32 %v6441_v50, %v1054_v33  ;;  %v6491_v10 = vld [vmem:[#allocation127_spill] sm:$0xff] }
 0x68c   : > { %v2800_v42 = vadd.f32 %v2740_v45, %v6477_v36  ;;  %v2801_v3 = vadd.f32 %v2741_v38, %v6478_v44  ;;  %v1060_v26 = vadd.f32 %v991_v37, %v735_v48  ;;  %v449_v36 = vmul.f32 %v5463_v40, %v6494_v34  ;;  %v6509_v37 = vld [vmem:[#allocation23_spill] sm:$0xff] }
 0x68d   : > { %v2567_v15 = vadd.f32 %v6481_v54, %v2362_v16  ;;  %v6498_v16 = vld [vmem:[#allocation91_spill] sm:$0xff] }
 0x68e   : > { %2872 = vrot.lane.b32.xlu0 %v2800_v42, %s3306_s20  ;;  %2874 = vrot.lane.b32.xlu1 %v2801_v3, %s3306_s20  ;;  %v6495_v42 = vld [vmem:[#allocation138_spill] sm:$0xff]  ;;  %v738_v54 = vadd.f32 %v6500_v63, %v449_v36 }
 0x68f   : > { %2906 = vrot.lane.b32.xlu2 %v2817_v35, %s3306_s20  ;;  %v6497_v35 = vld [vmem:[#allocation81_spill] sm:$0xff] }
 0x690   : > { %v993_v33 = vsel %vm973_vm1, %v6497_v35, %v6496_v31 }
 0x691   : > { %v2674_v24 = vpop.permute.xlu0 %2673  ;;  %v5624_v2 = vpop.permute.xlu2 %2707  ;;  %v1063_v40 = vadd.f32 %v993_v33, %v738_v54  ;;  %v6515_v33 = vld [vmem:[#allocation132_spill] sm:$0xff] }
 0x692   : > { %v2676_v23 = vpop.permute.xlu1 %2675  ;;  %v2820_v32 = vadd.f32 %v5624_v2, %v2567_v15 }
 0x693   : > { %v2742_v49 = vsel %vm2739_vm5, %v2674_v24, %v2676_v23  ;;  %v2743_v28 = vsel %vm2739_vm5, %v2676_v23, %v5552_v21  ;;  %v2365_v21 = vmul.f32 %v6441_v50, %v1057_v4  ;;  %v6499_v23 = vld [vmem:[#allocation126_spill] sm:$0xff]  ;;  %v6505_v4 = vld [vmem:[#allocation129_spill] sm:$0xff] }
 0x694   : > { %v2803_v17 = vadd.f32 %v2742_v49, %v6484_v6  ;;  %v2804_v5 = vadd.f32 %v2743_v28, %v6485_v55  ;;  %v6502_v6 = vld [vmem:[#allocation16_spill] sm:$0xff] }
 0x695   : > { %v2570_v59 = vadd.f32 %v6488_v27, %v2365_v21 }
 0x696   : > { %2878 = vrot.lane.b32.xlu0 %v2803_v17, %s3306_s20  ;;  %2880 = vrot.lane.b32.xlu1 %v2804_v5, %s3306_s20 }
 0x697   : > { %2912 = vrot.lane.b32.xlu2 %v2820_v32, %s3306_s20  ;;  %v995_v32 = vsel %vm973_vm1, %v6504_v51, %v6503_v9 }
 0x698   : > { %v1066_v56 = vadd.f32 %v995_v32, %v741_v18 }
 0x699   : > { %v2680_v19 = vpop.permute.xlu0 %2679  ;;  %v5643_v62 = vpop.permute.xlu2 %2713 }
 0x69a   : > { %v2682_v14 = vpop.permute.xlu1 %2681  ;;  %v2823_v45 = vadd.f32 %v5643_v62, %v2570_v59 }
 0x69b   : > { %v2744_v7 = vsel %vm2739_vm5, %v2680_v19, %v2682_v14  ;;  %v2745_v0 = vsel %vm2739_vm5, %v2682_v14, %v5569_v61  ;;  %v2368_v61 = vmul.f32 %v6441_v50, %v1060_v26  ;;  %v6506_v19 = vld [vmem:[#allocation133_spill] sm:$0xff] }
 0x69c   : > { %v2806_v1 = vadd.f32 %v2744_v7, %v6491_v10  ;;  %v2807_v11 = vadd.f32 %v2745_v0, %v6492_v13 }
 0x69d   : > { %v2573_v44 = vadd.f32 %v6495_v42, %v2368_v61  ;;  %v6513_v61 = vld [vmem:[#allocation108_spill] sm:$0xff] }
 0x69e   : > { %2884 = vrot.lane.b32.xlu0 %v2806_v1, %s3306_s20  ;;  %2886 = vrot.lane.b32.xlu1 %v2807_v11, %s3306_s20  ;;  %v6510_v11 = vld [vmem:[#allocation86_spill] sm:$0xff] }
 0x69f   : > { %2918 = vrot.lane.b32.xlu2 %v2823_v45, %s3306_s20  ;;  %v997_v48 = vsel %vm973_vm1, %v6511_v22, %v6510_v11  ;;  %v6512_v45 = vld [vmem:[#allocation94_spill] sm:$0xff] }
 0x6a1   : > { %v2686_v38 = vpop.permute.xlu0 %2685  ;;  %v5662_v53 = vpop.permute.xlu2 %2719 }
 0x6a2   : > { %v2688_v39 = vpop.permute.xlu1 %2687  ;;  %v2826_v15 = vadd.f32 %v5662_v53, %v2573_v44 }
 0x6a3   : > { %v2746_v3 = vsel %vm2739_vm5, %v2686_v38, %v2688_v39  ;;  %v2747_v25 = vsel %vm2739_vm5, %v2688_v39, %v5581_v20  ;;  %v2371_v20 = vmul.f32 %v6441_v50, %v1063_v40  ;;  %v6514_v39 = vld [vmem:[#allocation50_spill] sm:$0xff]  ;;  %v6518_v40 = vld [vmem:[#allocation139_spill] sm:$0xff] }
 0x6a4   : > { %v2809_v24 = vadd.f32 %v2746_v3, %v6498_v16  ;;  %v2810_v41 = vadd.f32 %v2747_v25, %v6499_v23  ;;  %v744_v34 = vadd.f32 %v6514_v39, %v455_v58 }
 0x6a5   : > { %v2576_v17 = vadd.f32 %v6502_v6, %v2371_v20  ;;  %v6519_v6 = vld [vmem:[#allocation111_spill] sm:$0xff] }
 0x6a6   : > { %2890 = vrot.lane.b32.xlu0 %v2809_v24, %s3306_s20  ;;  %2892 = vrot.lane.b32.xlu1 %v2810_v41, %s3306_s20  ;;  %v1069_v47 = vadd.f32 %v997_v48, %v744_v34  ;;  %v6516_v24 = vld [vmem:[#allocation135_spill] sm:$0xff] }
 0x6a7   : > { %2924 = vrot.lane.b32.xlu2 %v2826_v15, %s3306_s20  ;;  %v6517_v15 = vld [vmem:[#allocation136_spill] sm:$0xff] }
 0x6a9   : > { %v2692_v49 = vpop.permute.xlu0 %2691  ;;  %v5681_v28 = vpop.permute.xlu2 %2725 }
 0x6aa   : > { %v2694_v43 = vpop.permute.xlu1 %2693  ;;  %v2829_v27 = vadd.f32 %v5681_v28, %v2576_v17 }
 0x6ab   : > { %v2748_v55 = vsel %vm2739_vm5, %v2692_v49, %v2694_v43  ;;  %v2749_v5 = vsel %vm2739_vm5, %v2694_v43, %v5593_v29  ;;  %v2374_v29 = vmul.f32 %v6441_v50, %v1066_v56  ;;  %v6523_v56 = vld [vmem:[#allocation20_spill] sm:$0xff] }
 0x6ac   : > { %v2812_v21 = vadd.f32 %v2748_v55, %v6505_v4  ;;  %v2813_v14 = vadd.f32 %v2749_v5, %v6506_v19  ;;  %v6520_v55 = vld [vmem:[#allocation51_spill] sm:$0xff] }
 0x6ad   : > { %v2579_v10 = vadd.f32 %v6509_v37, %v2374_v29  ;;  %v6521_v4 = vld [vmem:[#allocation15_spill] sm:$0xff] }
 0x6ae   : > { %2896 = vrot.lane.b32.xlu0 %v2812_v21, %s3306_s20  ;;  %2898 = vrot.lane.b32.xlu1 %v2813_v14, %s3306_s20  ;;  %v6522_v19 = vld [vmem:[#allocation19_spill] sm:$0xff] }
 0x6af   : > { %2930 = vrot.lane.b32.xlu2 %v2829_v27, %s3306_s20 }
 0x6b1   : > { %v2698_v59 = vpop.permute.xlu0 %2697  ;;  %v2732_v7 = vpop.permute.xlu2 %2731 }
 0x6b2   : > { %v2700_v0 = vpop.permute.xlu1 %2699  ;;  %v2832_v36 = vadd.f32 %v2732_v7, %v2579_v10  ;;  %v6525_v10 = vld [vmem:[#allocation53_spill] sm:$0xff] }
 0x6b3   : > { %v2750_v1 = vsel %vm2739_vm5, %v2698_v59, %v2700_v0  ;;  %v2751_v13 = vsel %vm2739_vm5, %v2700_v0, %v5605_v8  ;;  %v2377_v8 = vmul.f32 %v6441_v50, %v1069_v47  ;;  %v6524_v59 = vld [vmem:[#allocation26_spill] sm:$0xff] }
 0x6b4   : > { %v2815_v26 = vadd.f32 %v2750_v1, %v6512_v45  ;;  %v2816_v38 = vadd.f32 %v2751_v13, %v6513_v61 }
 0x6b5   : > { %v2582_v25 = vadd.f32 %v5276_v57, %v2377_v8 }
 0x6b6   : > { %2902 = vrot.lane.b32.xlu0 %v2815_v26, %s3306_s20  ;;  %2904 = vrot.lane.b32.xlu1 %v2816_v38, %s3306_s20 }
 0x6b7   : > { %2936 = vrot.lane.b32.xlu2 %v2832_v36, %s3306_s20 }
 0x6b9   : > { %v2704_v42 = vpop.permute.xlu0 %2703  ;;  %v2738_v44 = vpop.permute.xlu2 %2737 }
 0x6ba   : > { %v2706_v3 = vpop.permute.xlu1 %2705  ;;  %v2835_v41 = vadd.f32 %v2738_v44, %v2582_v25 }
 0x6bb   : > { %v2752_v31 = vsel %vm2739_vm5, %v2704_v42, %v2706_v3  ;;  %v2753_v35 = vsel %vm2739_vm5, %v2706_v3, %v5624_v2 }
 0x6bc   : > { %v2818_v16 = vadd.f32 %v2752_v31, %v6515_v33  ;;  %v2819_v23 = vadd.f32 %v2753_v35, %v6516_v24 }
 0x6be   : > { %2908 = vrot.lane.b32.xlu0 %v2818_v16, %s3306_s20  ;;  %2910 = vrot.lane.b32.xlu1 %v2819_v23, %s3306_s20 }
 0x6bf   : > { %2942 = vrot.lane.b32.xlu2 %v2835_v41, %s3306_s20 }
 0x6c1   : > { %v2710_v50 = vpop.permute.xlu0 %2709 }
 0x6c2   : > { %v2712_v63 = vpop.permute.xlu1 %2711 }
 0x6c3   : > { %v2754_v57 = vsel %vm2739_vm5, %v2710_v50, %v2712_v63  ;;  %v2755_v54 = vsel %vm2739_vm5, %v2712_v63, %v5643_v62 }
 0x6c4   : > { %v2821_v2 = vadd.f32 %v2754_v57, %v6517_v15  ;;  %v2822_v20 = vadd.f32 %v2755_v54, %v6518_v40 }
 0x6c6   : > { %2914 = vrot.lane.b32.xlu0 %v2821_v2, %s3306_s20  ;;  %2916 = vrot.lane.b32.xlu1 %v2822_v20, %s3306_s20 }
 0x6c9   : > { %v2716_v49 = vpop.permute.xlu0 %2715 }
 0x6ca   : > { %v2718_v43 = vpop.permute.xlu1 %2717 }
 0x6cb   : > { %v2756_v60 = vsel %vm2739_vm5, %v2716_v49, %v2718_v43  ;;  %v2757_v46 = vsel %vm2739_vm5, %v2718_v43, %v5662_v53 }
 0x6cc   : > { %v2824_v17 = vadd.f32 %v2756_v60, %v6519_v6  ;;  %v2825_v5 = vadd.f32 %v2757_v46, %v6520_v55 }
 0x6ce   : > { %2920 = vrot.lane.b32.xlu0 %v2824_v17, %s3306_s20  ;;  %2922 = vrot.lane.b32.xlu1 %v2825_v5, %s3306_s20 }
 0x6d1   : > { %v2722_v62 = vpop.permute.xlu0 %2721 }
 0x6d2   : > { %v2724_v9 = vpop.permute.xlu1 %2723 }
 0x6d3   : > { %v2758_v51 = vsel %vm2739_vm5, %v2722_v62, %v2724_v9  ;;  %v2759_v32 = vsel %vm2739_vm5, %v2724_v9, %v5681_v28 }
 0x6d4   : > { %v2827_v21 = vadd.f32 %v2758_v51, %v6521_v4  ;;  %v2828_v14 = vadd.f32 %v2759_v32, %v6522_v19 }
 0x6d6   : > { %2926 = vrot.lane.b32.xlu0 %v2827_v21, %s3306_s20  ;;  %2928 = vrot.lane.b32.xlu1 %v2828_v14, %s3306_s20 }
 0x6d9   : > { %v2728_v53 = vpop.permute.xlu0 %2727 }
 0x6da   : > { %v2730_v30 = vpop.permute.xlu1 %2729 }
 0x6db   : > { %v2760_v18 = vsel %vm2739_vm5, %v2728_v53, %v2730_v30  ;;  %v2761_v27 = vsel %vm2739_vm5, %v2730_v30, %v2732_v7  ;;  %v2877_v7 = vpop.permute.xlu2 %2876 }
 0x6dc   : > { %v2830_v29 = vadd.f32 %v2760_v18, %v6523_v56  ;;  %v2831_v0 = vadd.f32 %v2761_v27, %v6524_v59 }
 0x6de   : > { %2932 = vrot.lane.b32.xlu0 %v2830_v29, %s3306_s20  ;;  %2934 = vrot.lane.b32.xlu1 %v2831_v0, %s3306_s20 }
 0x6e1   : > { %v2734_v28 = vpop.permute.xlu0 %2733 }
 0x6e2   : > { %v2736_v52 = vpop.permute.xlu1 %2735 }
 0x6e3   : > { %v2762_v58 = vsel %vm2739_vm5, %v2734_v28, %v2736_v52  ;;  %v2763_v37 = vsel %vm2739_vm5, %v2736_v52, %v2738_v44  ;;  %v2883_v11 = vpop.permute.xlu2 %2882 }
 0x6e4   : > { %v2833_v1 = vadd.f32 %v2762_v58, %v6525_v10  ;;  %v2834_v13 = vadd.f32 %v2763_v37, %v5293_v12 }
 0x6e6   : > { %2938 = vrot.lane.b32.xlu0 %v2833_v1, %s3306_s20  ;;  %2940 = vrot.lane.b32.xlu1 %v2834_v13, %s3306_s20 }
 0x6eb   : > { %v2889_v22 = vpop.permute.xlu2 %2888 }
 0x6f3   : > { %v2895_v61 = vpop.permute.xlu2 %2894 }
 0x6fb   : > { %v2901_v42 = vpop.permute.xlu2 %2900 }
 0x700   : > { %v2873_v48 = vpop.permute.xlu0 %2872  ;;  %v2875_v12 = vpop.permute.xlu1 %2874 }
 0x701   : > { %v2945_v45 = vsel %vm2944_vm6, %v2873_v48, %v2875_v12  ;;  %v2946_v26 = vsel %vm2944_vm6, %v2875_v12, %v2877_v7 }
 0x702   : > { %2993 = vst [vmem:[%s5763_s9] sm:$0xff] %v2945_v45 }
 0x703   : > { %2994 = vst [vmem:[%s5763_s9 + $0x8] sm:$0xff] %v2946_v26  ;;  %v2907_v16 = vpop.permute.xlu2 %2906 }
 0x708   : > { %v2879_v38 = vpop.permute.xlu0 %2878  ;;  %v2881_v39 = vpop.permute.xlu1 %2880 }
 0x709   : > { %v2947_v34 = vsel %vm2944_vm6, %v2879_v38, %v2881_v39  ;;  %v2948_v36 = vsel %vm2944_vm6, %v2881_v39, %v2883_v11 }
 0x70a   : > { %2995 = vst [vmem:[%s5763_s9 + $0x10] sm:$0xff] %v2947_v34 }
 0x70b   : > { %2996 = vst [vmem:[%s5763_s9 + $0x18] sm:$0xff] %v2948_v36  ;;  %v2913_v63 = vpop.permute.xlu2 %2912 }
 0x710   : > { %v2885_v47 = vpop.permute.xlu0 %2884  ;;  %v2887_v8 = vpop.permute.xlu1 %2886 }
 0x711   : > { %v2949_v44 = vsel %vm2944_vm6, %v2885_v47, %v2887_v8  ;;  %v2950_v3 = vsel %vm2944_vm6, %v2887_v8, %v2889_v22 }
 0x712   : > { %2997 = vst [vmem:[%s5763_s9 + $0x20] sm:$0xff] %v2949_v44 }
 0x713   : > { %2998 = vst [vmem:[%s5763_s9 + $0x28] sm:$0xff] %v2950_v3  ;;  %v2919_v40 = vpop.permute.xlu2 %2918 }
 0x718   : > { %v2891_v25 = vpop.permute.xlu0 %2890  ;;  %v2893_v31 = vpop.permute.xlu1 %2892 }
 0x719   : > { %v2951_v35 = vsel %vm2944_vm6, %v2891_v25, %v2893_v31  ;;  %v2952_v33 = vsel %vm2944_vm6, %v2893_v31, %v2895_v61 }
 0x71a   : > { %2999 = vst [vmem:[%s5763_s9 + $0x30] sm:$0xff] %v2951_v35 }
 0x71b   : > { %3000 = vst [vmem:[%s5763_s9 + $0x38] sm:$0xff] %v2952_v33  ;;  %v2925_v17 = vpop.permute.xlu2 %2924 }
 0x720   : > { %v2897_v24 = vpop.permute.xlu0 %2896  ;;  %v2899_v23 = vpop.permute.xlu1 %2898 }
 0x721   : > { %v2953_v41 = vsel %vm2944_vm6, %v2897_v24, %v2899_v23  ;;  %v2954_v50 = vsel %vm2944_vm6, %v2899_v23, %v2901_v42 }
 0x722   : > { %3001 = vst [vmem:[%s5763_s9 + $0x40] sm:$0xff] %v2953_v41 }
 0x723   : > { %3002 = vst [vmem:[%s5763_s9 + $0x48] sm:$0xff] %v2954_v50  ;;  %v2931_v4 = vpop.permute.xlu2 %2930 }
 0x728   : > { %v2903_v57 = vpop.permute.xlu0 %2902  ;;  %v2905_v54 = vpop.permute.xlu1 %2904 }
 0x729   : > { %v2955_v15 = vsel %vm2944_vm6, %v2903_v57, %v2905_v54  ;;  %v2956_v2 = vsel %vm2944_vm6, %v2905_v54, %v2907_v16 }
 0x72a   : > { %3003 = vst [vmem:[%s5763_s9 + $0x50] sm:$0xff] %v2955_v15 }
 0x72b   : > { %3004 = vst [vmem:[%s5763_s9 + $0x58] sm:$0xff] %v2956_v2  ;;  %v2937_v30 = vpop.permute.xlu2 %2936 }
 0x730   : > { %v2909_v20 = vpop.permute.xlu0 %2908  ;;  %v2911_v49 = vpop.permute.xlu1 %2910 }
 0x731   : > { %v2957_v43 = vsel %vm2944_vm6, %v2909_v20, %v2911_v49  ;;  %v2958_v60 = vsel %vm2944_vm6, %v2911_v49, %v2913_v63 }
 0x732   : > { %3005 = vst [vmem:[%s5763_s9 + $0x60] sm:$0xff] %v2957_v43 }
 0x733   : > { %3006 = vst [vmem:[%s5763_s9 + $0x68] sm:$0xff] %v2958_v60  ;;  %v2943_v59 = vpop.permute.xlu2 %2942 }
 0x738   : > { %v2915_v46 = vpop.permute.xlu0 %2914  ;;  %v2917_v6 = vpop.permute.xlu1 %2916 }
 0x739   : > { %v2959_v55 = vsel %vm2944_vm6, %v2915_v46, %v2917_v6  ;;  %v2960_v5 = vsel %vm2944_vm6, %v2917_v6, %v2919_v40 }
 0x73a   : > { %3007 = vst [vmem:[%s5763_s9 + $0x70] sm:$0xff] %v2959_v55 }
 0x73b   : > { %3008 = vst [vmem:[%s5763_s9 + $0x78] sm:$0xff] %v2960_v5 }
 0x740   : > { %v2921_v62 = vpop.permute.xlu0 %2920  ;;  %v2923_v9 = vpop.permute.xlu1 %2922 }
 0x741   : > { %v2961_v51 = vsel %vm2944_vm6, %v2921_v62, %v2923_v9  ;;  %v2962_v32 = vsel %vm2944_vm6, %v2923_v9, %v2925_v17 }
 0x742   : > { %3009 = vst [vmem:[%s5763_s9 + $0x80] sm:$0xff] %v2961_v51 }
 0x743   : > { %3010 = vst [vmem:[%s5763_s9 + $0x88] sm:$0xff] %v2962_v32 }
 0x748   : > { %v2927_v21 = vpop.permute.xlu0 %2926  ;;  %v2929_v19 = vpop.permute.xlu1 %2928 }
 0x749   : > { %v2963_v14 = vsel %vm2944_vm6, %v2927_v21, %v2929_v19  ;;  %v2964_v53 = vsel %vm2944_vm6, %v2929_v19, %v2931_v4 }
 0x74a   : > { %3011 = vst [vmem:[%s5763_s9 + $0x90] sm:$0xff] %v2963_v14 }
 0x74b   : > { %3012 = vst [vmem:[%s5763_s9 + $0x98] sm:$0xff] %v2964_v53 }
 0x750   : > { %v2933_v18 = vpop.permute.xlu0 %2932  ;;  %v2935_v27 = vpop.permute.xlu1 %2934 }
 0x751   : > { %v2965_v56 = vsel %vm2944_vm6, %v2933_v18, %v2935_v27  ;;  %v2966_v29 = vsel %vm2944_vm6, %v2935_v27, %v2937_v30 }
 0x752   : > { %3013 = vst [vmem:[%s5763_s9 + $0xa0] sm:$0xff] %v2965_v56 }
 0x753   : > { %3014 = vst [vmem:[%s5763_s9 + $0xa8] sm:$0xff] %v2966_v29 }
 0x758   : > { %v2939_v0 = vpop.permute.xlu0 %2938  ;;  %v2941_v28 = vpop.permute.xlu1 %2940 }
 0x759   : > { %v2967_v52 = vsel %vm2944_vm6, %v2939_v0, %v2941_v28  ;;  %v2968_v58 = vsel %vm2944_vm6, %v2941_v28, %v2943_v59 }
 0x75a   : > { %3015 = vst [vmem:[%s5763_s9 + $0xb0] sm:$0xff] %v2967_v52 }
 0x75b   : > { %3016 = vst [vmem:[%s5763_s9 + $0xb8] sm:$0xff] %v2968_v58 }
 0x75c PF: > { %s13_s14 = sadd.s32 1, %s3289_s14   ;;  %s6526_s12 = smov %s3285_s13 }
 0x75d   : > { %p10_p5 = scmp.ge.s32.totalorder %s13_s14, 4   ;;  %s6527_s13 = smov %s6529_s15 }
 0x75f   :  { %12 = sbr.rel (!%p10_p5) target bundleno = 2 (0x2), region = 66 }

</bundles_post_ra>
